<compile_context>
chip_gen: v5e
topology: v5e:2x2
jax: 0.10.0
libtpu: 0.0.40
codegen_flags: <defaults>
</compile_context>

<pallas_src>
import jax
import jax.numpy as jnp
from jax import lax
from jax.experimental import pallas as pl
from jax.experimental.pallas import tpu as pltpu


def _round_up(x, m):
    return ((x + m - 1) // m) * m


# ----------------------------------------------------------------------------
# Kernel 1: x-dependent gate pre-activations for ALL time steps at once.
# Runs off the serial critical path; one big matmul per gate (bf16 in, f32 acc).
# ----------------------------------------------------------------------------
def x_projection_kernel(xcat_ref, wxz_ref, wxr_ref, wxc_ref,
                        bz_ref, br_ref, bc_ref,
                        pz_ref, pr_ref, pc_ref):
    xcat = xcat_ref[...]                                   # (S*BNp, 2C) bf16
    pz_ref[...] = (jnp.dot(xcat, wxz_ref[...],
                           preferred_element_type=jnp.float32) + bz_ref[...])
    pr_ref[...] = (jnp.dot(xcat, wxr_ref[...],
                           preferred_element_type=jnp.float32) + br_ref[...])
    pc_ref[...] = (jnp.dot(xcat, wxc_ref[...],
                           preferred_element_type=jnp.float32) + bc_ref[...])


# ----------------------------------------------------------------------------
# Kernel 2: serial GC-GRU recurrence + fused mean-pool / classifier readout.
# Single invocation (no grid); the time loop is a fully-unrolled fori_loop.
# ----------------------------------------------------------------------------
def gcgru_recurrent_kernel(pz_ref, pr_ref, pc_ref, akron_ref,
                           whz_ref, whr_ref, whc_ref,
                           pool_ref, wro_ref, bro_ref,
                           h_ref, out_ref):
    n_steps = pz_ref.shape[0]

    # Loop-invariant operands loaded once (constants never re-fetched).
    akron = akron_ref[...]                                 # (BNp, BNp)
    whz = whz_ref[...]                                     # (2*Hp, Hp)
    whr = whr_ref[...]                                     # (2*Hp, Hp)
    whc = whc_ref[...]                                     # (2*Hp, Hp)

    def step(t, h):
        # Graph propagation for the whole batch as ONE 2-D matmul
        # (kron(I_B, A) @ h), no batched einsum / reshape.
        ah = jnp.dot(akron, h, preferred_element_type=jnp.float32)
        # Hp is a multiple of 128, so this concat is lane-tile aligned.
        hcat = jnp.concatenate([h, ah], axis=1)            # (BNp, 2*Hp)
        z = jax.nn.sigmoid(
            pz_ref[t] + jnp.dot(hcat, whz, preferred_element_type=jnp.float32))
        r = jax.nn.sigmoid(
            pr_ref[t] + jnp.dot(hcat, whr, preferred_element_type=jnp.float32))
        rh = r * h
        arh = jnp.dot(akron, rh, preferred_element_type=jnp.float32)
        rcat = jnp.concatenate([rh, arh], axis=1)          # (BNp, 2*Hp)
        c = jnp.tanh(
            pc_ref[t] + jnp.dot(rcat, whc, preferred_element_type=jnp.float32))
        # GRU convention kept identical to the previous revision.
        return z * h + (1.0 - z) * c

    h0 = jnp.zeros(h_ref.shape, jnp.float32)
    # S is small and static -> full unroll gives the LLO scheduler visibility.
    h = lax.fori_loop(0, n_steps, step, h0, unroll=True)

    h_ref[...] = h
    # Node-mean-pool expressed as a constant matmul (no in-kernel reshape or
    # cross-sublane reduce), then the classification head.
    pooled = jnp.dot(pool_ref[...], h, preferred_element_type=jnp.float32)
    out_ref[...] = (jnp.dot(pooled, wro_ref[...],
                            preferred_element_type=jnp.float32) + bro_ref[...])


# ----------------------------------------------------------------------------
# Wrapper
# ----------------------------------------------------------------------------
def dgla_classifier_forward(x, adj, params):
    """x: (B, S, N, C) float32 ('b s n c', as in the torch module).

    Returns (representation, output) as the torch module does in eval mode:
      representation: (B, N, H) final per-node hidden state
      output:         (B, n_class) classification logits
    """
    B, S, N, C = x.shape
    H = params['w_c'].shape[-1]
    n_class = params['w_ro'].shape[-1]
    BN = B * N
    Hp = _round_up(H, 128)      # lane-aligned hidden width (zero-padded)
    BNp = _round_up(BN, 8)      # sublane-aligned row count (zero-padded)

    f32 = jnp.float32
    w_zr = params['w_zr'].astype(f32)          # (2C+2H, 2H)
    b_zr = params['b_zr'].astype(f32)[0]       # (2H,)
    w_c = params['w_c'].astype(f32)            # (2C+2H, H)
    b_c = params['b_c'].astype(f32)[0]         # (H,)

    def pad_cols(w):
        return jnp.pad(w, ((0, 0), (0, Hp - w.shape[1])))

    # x-path weights / biases (consumed once, off the serial path).
    wx_z = pad_cols(w_zr[:2 * C, :H])
    wx_r = pad_cols(w_zr[:2 * C, H:])
    wx_c = pad_cols(w_c[:2 * C, :])
    bz = jnp.pad(b_zr[:H], (0, Hp - H))[None, :]
    br = jnp.pad(b_zr[H:], (0, Hp - H))[None, :]
    bc = jnp.pad(b_c, (0, Hp - H))[None, :]

    # h-path weight slabs: ONE matmul per gate against concat([h, A h]).
    # Row blocks land at lane offsets 0 and Hp of the concatenated activation.
    def make_slab(w_h, w_ah):
        slab = jnp.zeros((2 * Hp, Hp), f32)
        slab = slab.at[:H, :H].set(w_h)
        slab = slab.at[Hp:Hp + H, :H].set(w_ah)
        return slab

    wh_z = make_slab(w_zr[2 * C:2 * C + H, :H], w_zr[2 * C + H:, :H])
    wh_r = make_slab(w_zr[2 * C:2 * C + H, H:], w_zr[2 * C + H:, H:])
    wh_c = make_slab(w_c[2 * C:2 * C + H, :], w_c[2 * C + H:, :])

    # Block-diagonal adjacency: A @ h for every batch element as one matmul.
    a_kron = jnp.kron(jnp.eye(B, dtype=f32), adj.astype(f32))
    a_kron = jnp.pad(a_kron, ((0, BNp - BN), (0, BNp - BN)))

    # Node-mean-pool as a constant matmul (B, BNp) @ (BNp, Hp).
    pool = jnp.kron(jnp.eye(B, dtype=f32), jnp.full((1, N), 1.0 / N, f32))
    pool = jnp.pad(pool, ((0, 0), (0, BNp - BN)))

    w_ro = jnp.pad(params['w_ro'].astype(f32), ((0, Hp - H), (0, 0)))
    b_ro = params['b_ro'].astype(f32)          # (1, n_class)

    # ---- x-dependent precompute: graph conv of the inputs + feature concat.
    # (One-time parallel XLA work; the big gate projection itself runs in
    # kernel 1 on the MXU.)
    ax = jnp.einsum('nm,bsmc->bsnc', adj.astype(f32), x.astype(f32))
    xcat = jnp.concatenate([x.astype(f32), ax], axis=-1)   # (B, S, N, 2C)
    xcat = jnp.transpose(xcat, (1, 0, 2, 3)).reshape(S, BN, 2 * C)
    xcat = jnp.pad(xcat, ((0, 0), (0, BNp - BN), (0, 0)))
    xcat = xcat.reshape(S * BNp, 2 * C)

    pz, pr, pc = pl.pallas_call(
        x_projection_kernel,
        out_shape=(jax.ShapeDtypeStruct((S * BNp, Hp), f32),
                   jax.ShapeDtypeStruct((S * BNp, Hp), f32),
                   jax.ShapeDtypeStruct((S * BNp, Hp), f32)),
    )(xcat.astype(jnp.bfloat16),
      wx_z.astype(jnp.bfloat16), wx_r.astype(jnp.bfloat16),
      wx_c.astype(jnp.bfloat16),
      bz, br, bc)

    pz = pz.reshape(S, BNp, Hp)
    pr = pr.reshape(S, BNp, Hp)
    pc = pc.reshape(S, BNp, Hp)

    # ---- serial recurrence + fused readout, single invocation.
    h_pad, logits = pl.pallas_call(
        gcgru_recurrent_kernel,
        out_shape=(jax.ShapeDtypeStruct((BNp, Hp), f32),
                   jax.ShapeDtypeStruct((B, n_class), f32)),
    )(pz, pr, pc, a_kron, wh_z, wh_r, wh_c, pool, w_ro, b_ro)

    representation = h_pad[:BN, :H].reshape(B, N, H)
    return representation, logits


# ----------------------------------------------------------------------------
# Deterministic parameter / input construction
# ----------------------------------------------------------------------------
def make_params(key, d_in, d_hidden, n_class):
    ks = jax.random.split(key, 6)
    f = 2 * d_in + 2 * d_hidden
    return {
        'w_zr': 0.1 * jax.random.normal(ks[0], (f, 2 * d_hidden), jnp.float32),
        'b_zr': jnp.zeros((1, 2 * d_hidden), jnp.float32),
        'w_c':  0.1 * jax.random.normal(ks[1], (f, d_hidden), jnp.float32),
        'b_c':  jnp.zeros((1, d_hidden), jnp.float32),
        'w_ro': 0.1 * jax.random.normal(ks[2], (d_hidden, n_class), jnp.float32),
        'b_ro': jnp.zeros((1, n_class), jnp.float32),
    }


def make_ring_adj(n_nodes):
    eye = jnp.eye(n_nodes, dtype=jnp.float32)
    right = jnp.roll(eye, 1, axis=1)
    left = jnp.roll(eye, -1, axis=1)
    a = eye + right + left
    return a / jnp.sum(a, axis=1, keepdims=True)   # row-normalized


if __name__ == "__main__":
    B, S, N, C, H, N_CLASS = 2, 8, 8, 4, 32, 2

    key = jax.random.PRNGKey(0)
    k_x, k_p = jax.random.split(key)
    x = jax.random.normal(k_x, (B, S, N, C), jnp.float32)   # 'b s n c'
    adj = make_ring_adj(N)
    params = make_params(k_p, C, H, N_CLASS)

    fwd = jax.jit(dgla_classifier_forward)
    representation, output = fwd(x, adj, params)
    jax.block_until_ready((representation, output))

    assert representation.shape == (B, N, H)
    assert output.shape == (B, N_CLASS)
    assert bool(jnp.all(jnp.isfinite(representation)))
    assert bool(jnp.all(jnp.isfinite(output)))
    print("KERNEL_OK")
</pallas_src>

<mosaic_0001>
module attributes {stable_mosaic.version = 11 : i64} {
  func.func @x_projection_kernel(%arg0: memref<128x8xbf16, #tpu.memory_space<vmem>>, %arg1: memref<8x128xbf16, #tpu.memory_space<vmem>>, %arg2: memref<8x128xbf16, #tpu.memory_space<vmem>>, %arg3: memref<8x128xbf16, #tpu.memory_space<vmem>>, %arg4: memref<1x128xf32, #tpu.memory_space<vmem>>, %arg5: memref<1x128xf32, #tpu.memory_space<vmem>>, %arg6: memref<1x128xf32, #tpu.memory_space<vmem>>, %arg7: memref<128x128xf32, #tpu.memory_space<vmem>>, %arg8: memref<128x128xf32, #tpu.memory_space<vmem>>, %arg9: memref<128x128xf32, #tpu.memory_space<vmem>>) attributes {dimension_semantics = [], scalar_prefetch = 0 : i64, scratch_operands = 0 : i64, tpu.core_type = #tpu.core_type<tc>} {
    %c0 = arith.constant 0 : index
    %c0_0 = arith.constant 0 : index
    %0 = vector.load %arg0[%c0, %c0_0] : memref<128x8xbf16, #tpu.memory_space<vmem>>, vector<128x8xbf16>
    %c0_1 = arith.constant 0 : index
    %c0_2 = arith.constant 0 : index
    %1 = vector.load %arg1[%c0_1, %c0_2] : memref<8x128xbf16, #tpu.memory_space<vmem>>, vector<8x128xbf16>
    %cst = arith.constant dense<0.000000e+00> : vector<128x128xf32>
    %2 = tpu.matmul %0, %1, %cst {dimension_numbers = #tpu.dot_dimension_numbers<[1], [0], [0], [1], [0, 0, 1, 1], [], []>} : vector<128x8xbf16>, vector<8x128xbf16>, vector<128x128xf32> -> vector<128x128xf32>
    %c0_3 = arith.constant 0 : index
    %c0_4 = arith.constant 0 : index
    %3 = vector.load %arg4[%c0_3, %c0_4] : memref<1x128xf32, #tpu.memory_space<vmem>>, vector<1x128xf32>
    %4 = vector.broadcast %3 : vector<1x128xf32> to vector<128x128xf32>
    %5 = arith.addf %2, %4 : vector<128x128xf32>
    %c0_5 = arith.constant 0 : index
    %c0_6 = arith.constant 0 : index
    %6 = vector.load %arg7[%c0_5, %c0_6] : memref<128x128xf32, #tpu.memory_space<vmem>>, vector<128x128xf32>
    tpu.vector_store %arg7[%c0_5, %c0_6], %5 {strides = array<i32>} : memref<128x128xf32, #tpu.memory_space<vmem>>, vector<128x128xf32>,
    %c0_7 = arith.constant 0 : index
    %c0_8 = arith.constant 0 : index
    %7 = vector.load %arg2[%c0_7, %c0_8] : memref<8x128xbf16, #tpu.memory_space<vmem>>, vector<8x128xbf16>
    %cst_9 = arith.constant dense<0.000000e+00> : vector<128x128xf32>
    %8 = tpu.matmul %0, %7, %cst_9 {dimension_numbers = #tpu.dot_dimension_numbers<[1], [0], [0], [1], [0, 0, 1, 1], [], []>} : vector<128x8xbf16>, vector<8x128xbf16>, vector<128x128xf32> -> vector<128x128xf32>
    %c0_10 = arith.constant 0 : index
    %c0_11 = arith.constant 0 : index
    %9 = vector.load %arg5[%c0_10, %c0_11] : memref<1x128xf32, #tpu.memory_space<vmem>>, vector<1x128xf32>
    %10 = vector.broadcast %9 : vector<1x128xf32> to vector<128x128xf32>
    %11 = arith.addf %8, %10 : vector<128x128xf32>
    %c0_12 = arith.constant 0 : index
    %c0_13 = arith.constant 0 : index
    %12 = vector.load %arg8[%c0_12, %c0_13] : memref<128x128xf32, #tpu.memory_space<vmem>>, vector<128x128xf32>
    tpu.vector_store %arg8[%c0_12, %c0_13], %11 {strides = array<i32>} : memref<128x128xf32, #tpu.memory_space<vmem>>, vector<128x128xf32>,
    %c0_14 = arith.constant 0 : index
    %c0_15 = arith.constant 0 : index
    %13 = vector.load %arg3[%c0_14, %c0_15] : memref<8x128xbf16, #tpu.memory_space<vmem>>, vector<8x128xbf16>
    %cst_16 = arith.constant dense<0.000000e+00> : vector<128x128xf32>
    %14 = tpu.matmul %0, %13, %cst_16 {dimension_numbers = #tpu.dot_dimension_numbers<[1], [0], [0], [1], [0, 0, 1, 1], [], []>} : vector<128x8xbf16>, vector<8x128xbf16>, vector<128x128xf32> -> vector<128x128xf32>
    %c0_17 = arith.constant 0 : index
    %c0_18 = arith.constant 0 : index
    %15 = vector.load %arg6[%c0_17, %c0_18] : memref<1x128xf32, #tpu.memory_space<vmem>>, vector<1x128xf32>
    %16 = vector.broadcast %15 : vector<1x128xf32> to vector<128x128xf32>
    %17 = arith.addf %14, %16 : vector<128x128xf32>
    %c0_19 = arith.constant 0 : index
    %c0_20 = arith.constant 0 : index
    %18 = vector.load %arg9[%c0_19, %c0_20] : memref<128x128xf32, #tpu.memory_space<vmem>>, vector<128x128xf32>
    tpu.vector_store %arg9[%c0_19, %c0_20], %17 {strides = array<i32>} : memref<128x128xf32, #tpu.memory_space<vmem>>, vector<128x128xf32>,
    return
  }
}

module attributes {stable_mosaic.version = 11 : i64} {
  func.func @gcgru_recurrent_kernel(%arg0: memref<8x16x128xf32, #tpu.memory_space<vmem>>, %arg1: memref<8x16x128xf32, #tpu.memory_space<vmem>>, %arg2: memref<8x16x128xf32, #tpu.memory_space<vmem>>, %arg3: memref<16x16xf32, #tpu.memory_space<vmem>>, %arg4: memref<256x128xf32, #tpu.memory_space<vmem>>, %arg5: memref<256x128xf32, #tpu.memory_space<vmem>>, %arg6: memref<256x128xf32, #tpu.memory_space<vmem>>, %arg7: memref<2x16xf32, #tpu.memory_space<vmem>>, %arg8: memref<128x2xf32, #tpu.memory_space<vmem>>, %arg9: memref<1x2xf32, #tpu.memory_space<vmem>>, %arg10: memref<16x128xf32, #tpu.memory_space<vmem>>, %arg11: memref<2x2xf32, #tpu.memory_space<vmem>>) attributes {dimension_semantics = [], scalar_prefetch = 0 : i64, scratch_operands = 0 : i64, tpu.core_type = #tpu.core_type<tc>} {
    %c0 = arith.constant 0 : index
    %c0_0 = arith.constant 0 : index
    %0 = vector.load %arg3[%c0, %c0_0] : memref<16x16xf32, #tpu.memory_space<vmem>>, vector<16x16xf32>
    %c0_1 = arith.constant 0 : index
    %c0_2 = arith.constant 0 : index
    %1 = vector.load %arg4[%c0_1, %c0_2] : memref<256x128xf32, #tpu.memory_space<vmem>>, vector<256x128xf32>
    %c0_3 = arith.constant 0 : index
    %c0_4 = arith.constant 0 : index
    %2 = vector.load %arg5[%c0_3, %c0_4] : memref<256x128xf32, #tpu.memory_space<vmem>>, vector<256x128xf32>
    %c0_5 = arith.constant 0 : index
    %c0_6 = arith.constant 0 : index
    %3 = vector.load %arg6[%c0_5, %c0_6] : memref<256x128xf32, #tpu.memory_space<vmem>>, vector<256x128xf32>
    %cst = arith.constant 0.000000e+00 : f32
    %4 = vector.broadcast %cst : f32 to vector<16x128xf32>
    %c0_i32 = arith.constant 0 : i32
    %cst_7 = arith.constant dense<0.000000e+00> : vector<16x128xf32>
    %5 = tpu.matmul %0, %4, %cst_7 {dimension_numbers = #tpu.dot_dimension_numbers<[1], [0], [0], [1], [0, 0, 1, 1], [], []>} : vector<16x16xf32>, vector<16x128xf32>, vector<16x128xf32> -> vector<16x128xf32>
    %6 = tpu.concatenate %4, %5 in 1 : vector<16x128xf32>, vector<16x128xf32> -> vector<16x256xf32>
    %7 = arith.index_cast %c0_i32 : i32 to index
    %c0_8 = arith.constant 0 : index
    %c0_9 = arith.constant 0 : index
    %8 = vector.load %arg0[%7, %c0_8, %c0_9] : memref<8x16x128xf32, #tpu.memory_space<vmem>>, vector<1x16x128xf32>
    %9 = vector.shape_cast %8 : vector<1x16x128xf32> to vector<16x128xf32>
    %cst_10 = arith.constant dense<0.000000e+00> : vector<16x128xf32>
    %10 = tpu.matmul %6, %1, %cst_10 {dimension_numbers = #tpu.dot_dimension_numbers<[1], [0], [0], [1], [0, 0, 1, 1], [], []>} : vector<16x256xf32>, vector<256x128xf32>, vector<16x128xf32> -> vector<16x128xf32>
    %11 = arith.addf %9, %10 : vector<16x128xf32>
    %12 = arith.negf %11 : vector<16x128xf32>
    %13 = math.exp %12 : vector<16x128xf32>
    %cst_11 = arith.constant 1.000000e+00 : f32
    %14 = vector.broadcast %cst_11 : f32 to vector<16x128xf32>
    %15 = arith.addf %14, %13 : vector<16x128xf32>
    %16 = arith.divf %14, %15 : vector<16x128xf32>
    %17 = arith.index_cast %c0_i32 : i32 to index
    %c0_12 = arith.constant 0 : index
    %c0_13 = arith.constant 0 : index
    %18 = vector.load %arg1[%17, %c0_12, %c0_13] : memref<8x16x128xf32, #tpu.memory_space<vmem>>, vector<1x16x128xf32>
    %19 = vector.shape_cast %18 : vector<1x16x128xf32> to vector<16x128xf32>
    %cst_14 = arith.constant dense<0.000000e+00> : vector<16x128xf32>
    %20 = tpu.matmul %6, %2, %cst_14 {dimension_numbers = #tpu.dot_dimension_numbers<[1], [0], [0], [1], [0, 0, 1, 1], [], []>} : vector<16x256xf32>, vector<256x128xf32>, vector<16x128xf32> -> vector<16x128xf32>
    %21 = arith.addf %19, %20 : vector<16x128xf32>
    %22 = arith.negf %21 : vector<16x128xf32>
    %23 = math.exp %22 : vector<16x128xf32>
    %cst_15 = arith.constant 1.000000e+00 : f32
    %24 = vector.broadcast %cst_15 : f32 to vector<16x128xf32>
    %25 = arith.addf %24, %23 : vector<16x128xf32>
    %26 = arith.divf %24, %25 : vector<16x128xf32>
    %27 = arith.mulf %26, %4 : vector<16x128xf32>
    %cst_16 = arith.constant dense<0.000000e+00> : vector<16x128xf32>
    %28 = tpu.matmul %0, %27, %cst_16 {dimension_numbers = #tpu.dot_dimension_numbers<[1], [0], [0], [1], [0, 0, 1, 1], [], []>} : vector<16x16xf32>, vector<16x128xf32>, vector<16x128xf32> -> vector<16x128xf32>
    %29 = tpu.concatenate %27, %28 in 1 : vector<16x128xf32>, vector<16x128xf32> -> vector<16x256xf32>
    %30 = arith.index_cast %c0_i32 : i32 to index
    %c0_17 = arith.constant 0 : index
    %c0_18 = arith.constant 0 : index
    %31 = vector.load %arg2[%30, %c0_17, %c0_18] : memref<8x16x128xf32, #tpu.memory_space<vmem>>, vector<1x16x128xf32>
    %32 = vector.shape_cast %31 : vector<1x16x128xf32> to vector<16x128xf32>
    %cst_19 = arith.constant dense<0.000000e+00> : vector<16x128xf32>
    %33 = tpu.matmul %29, %3, %cst_19 {dimension_numbers = #tpu.dot_dimension_numbers<[1], [0], [0], [1], [0, 0, 1, 1], [], []>} : vector<16x256xf32>, vector<256x128xf32>, vector<16x128xf32> -> vector<16x128xf32>
    %34 = arith.addf %32, %33 : vector<16x128xf32>
    %35 = math.tanh %34 : vector<16x128xf32>
    %36 = arith.mulf %16, %4 : vector<16x128xf32>
    %cst_20 = arith.constant 1.000000e+00 : f32
    %37 = vector.broadcast %cst_20 : f32 to vector<16x128xf32>
    %38 = arith.subf %37, %16 : vector<16x128xf32>
    %39 = arith.mulf %38, %35 : vector<16x128xf32>
    %40 = arith.addf %36, %39 : vector<16x128xf32>
    %c1_i32 = arith.constant 1 : i32
    %cst_21 = arith.constant dense<0.000000e+00> : vector<16x128xf32>
    %41 = tpu.matmul %0, %40, %cst_21 {dimension_numbers = #tpu.dot_dimension_numbers<[1], [0], [0], [1], [0, 0, 1, 1], [], []>} : vector<16x16xf32>, vector<16x128xf32>, vector<16x128xf32> -> vector<16x128xf32>
    %42 = tpu.concatenate %40, %41 in 1 : vector<16x128xf32>, vector<16x128xf32> -> vector<16x256xf32>
    %43 = arith.index_cast %c1_i32 : i32 to index
    %c0_22 = arith.constant 0 : index
    %c0_23 = arith.constant 0 : index
    %44 = vector.load %arg0[%43, %c0_22, %c0_23] : memref<8x16x128xf32, #tpu.memory_space<vmem>>, vector<1x16x128xf32>
    %45 = vector.shape_cast %44 : vector<1x16x128xf32> to vector<16x128xf32>
    %cst_24 = arith.constant dense<0.000000e+00> : vector<16x128xf32>
    %46 = tpu.matmul %42, %1, %cst_24 {dimension_numbers = #tpu.dot_dimension_numbers<[1], [0], [0], [1], [0, 0, 1, 1], [], []>} : vector<16x256xf32>, vector<256x128xf32>, vector<16x128xf32> -> vector<16x128xf32>
    %47 = arith.addf %45, %46 : vector<16x128xf32>
    %48 = arith.negf %47 : vector<16x128xf32>
    %49 = math.exp %48 : vector<16x128xf32>
    %cst_25 = arith.constant 1.000000e+00 : f32
    %50 = vector.broadcast %cst_25 : f32 to vector<16x128xf32>
    %51 = arith.addf %50, %49 : vector<16x128xf32>
    %52 = arith.divf %50, %51 : vector<16x128xf32>
    %53 = arith.index_cast %c1_i32 : i32 to index
    %c0_26 = arith.constant 0 : index
    %c0_27 = arith.constant 0 : index
    %54 = vector.load %arg1[%53, %c0_26, %c0_27] : memref<8x16x128xf32, #tpu.memory_space<vmem>>, vector<1x16x128xf32>
    %55 = vector.shape_cast %54 : vector<1x16x128xf32> to vector<16x128xf32>
    %cst_28 = arith.constant dense<0.000000e+00> : vector<16x128xf32>
    %56 = tpu.matmul %42, %2, %cst_28 {dimension_numbers = #tpu.dot_dimension_numbers<[1], [0], [0], [1], [0, 0, 1, 1], [], []>} : vector<16x256xf32>, vector<256x128xf32>, vector<16x128xf32> -> vector<16x128xf32>
    %57 = arith.addf %55, %56 : vector<16x128xf32>
    %58 = arith.negf %57 : vector<16x128xf32>
    %59 = math.exp %58 : vector<16x128xf32>
    %cst_29 = arith.constant 1.000000e+00 : f32
    %60 = vector.broadcast %cst_29 : f32 to vector<16x128xf32>
    %61 = arith.addf %60, %59 : vector<16x128xf32>
    %62 = arith.divf %60, %61 : vector<16x128xf32>
    %63 = arith.mulf %62, %40 : vector<16x128xf32>
    %cst_30 = arith.constant dense<0.000000e+00> : vector<16x128xf32>
    %64 = tpu.matmul %0, %63, %cst_30 {dimension_numbers = #tpu.dot_dimension_numbers<[1], [0], [0], [1], [0, 0, 1, 1], [], []>} : vector<16x16xf32>, vector<16x128xf32>, vector<16x128xf32> -> vector<16x128xf32>
    %65 = tpu.concatenate %63, %64 in 1 : vector<16x128xf32>, vector<16x128xf32> -> vector<16x256xf32>
    %66 = arith.index_cast %c1_i32 : i32 to index
    %c0_31 = arith.constant 0 : index
    %c0_32 = arith.constant 0 : index
    %67 = vector.load %arg2[%66, %c0_31, %c0_32] : memref<8x16x128xf32, #tpu.memory_space<vmem>>, vector<1x16x128xf32>
    %68 = vector.shape_cast %67 : vector<1x16x128xf32> to vector<16x128xf32>
    %cst_33 = arith.constant dense<0.000000e+00> : vector<16x128xf32>
    %69 = tpu.matmul %65, %3, %cst_33 {dimension_numbers = #tpu.dot_dimension_numbers<[1], [0], [0], [1], [0, 0, 1, 1], [], []>} : vector<16x256xf32>, vector<256x128xf32>, vector<16x128xf32> -> vector<16x128xf32>
    %70 = arith.addf %68, %69 : vector<16x128xf32>
    %71 = math.tanh %70 : vector<16x128xf32>
    %72 = arith.mulf %52, %40 : vector<16x128xf32>
    %cst_34 = arith.constant 1.000000e+00 : f32
    %73 = vector.broadcast %cst_34 : f32 to vector<16x128xf32>
    %74 = arith.subf %73, %52 : vector<16x128xf32>
    %75 = arith.mulf %74, %71 : vector<16x128xf32>
    %76 = arith.addf %72, %75 : vector<16x128xf32>
    %c2_i32 = arith.constant 2 : i32
    %cst_35 = arith.constant dense<0.000000e+00> : vector<16x128xf32>
    %77 = tpu.matmul %0, %76, %cst_35 {dimension_numbers = #tpu.dot_dimension_numbers<[1], [0], [0], [1], [0, 0, 1, 1], [], []>} : vector<16x16xf32>, vector<16x128xf32>, vector<16x128xf32> -> vector<16x128xf32>
    %78 = tpu.concatenate %76, %77 in 1 : vector<16x128xf32>, vector<16x128xf32> -> vector<16x256xf32>
    %79 = arith.index_cast %c2_i32 : i32 to index
    %c0_36 = arith.constant 0 : index
    %c0_37 = arith.constant 0 : index
    %80 = vector.load %arg0[%79, %c0_36, %c0_37] : memref<8x16x128xf32, #tpu.memory_space<vmem>>, vector<1x16x128xf32>
    %81 = vector.shape_cast %80 : vector<1x16x128xf32> to vector<16x128xf32>
    %cst_38 = arith.constant dense<0.000000e+00> : vector<16x128xf32>
    %82 = tpu.matmul %78, %1, %cst_38 {dimension_numbers = #tpu.dot_dimension_numbers<[1], [0], [0], [1], [0, 0, 1, 1], [], []>} : vector<16x256xf32>, vector<256x128xf32>, vector<16x128xf32> -> vector<16x128xf32>
    %83 = arith.addf %81, %82 : vector<16x128xf32>
    %84 = arith.negf %83 : vector<16x128xf32>
    %85 = math.exp %84 : vector<16x128xf32>
    %cst_39 = arith.constant 1.000000e+00 : f32
    %86 = vector.broadcast %cst_39 : f32 to vector<16x128xf32>
    %87 = arith.addf %86, %85 : vector<16x128xf32>
    %88 = arith.divf %86, %87 : vector<16x128xf32>
    %89 = arith.index_cast %c2_i32 : i32 to index
    %c0_40 = arith.constant 0 : index
    %c0_41 = arith.constant 0 : index
    %90 = vector.load %arg1[%89, %c0_40, %c0_41] : memref<8x16x128xf32, #tpu.memory_space<vmem>>, vector<1x16x128xf32>
    %91 = vector.shape_cast %90 : vector<1x16x128xf32> to vector<16x128xf32>
    %cst_42 = arith.constant dense<0.000000e+00> : vector<16x128xf32>
    %92 = tpu.matmul %78, %2, %cst_42 {dimension_numbers = #tpu.dot_dimension_numbers<[1], [0], [0], [1], [0, 0, 1, 1], [], []>} : vector<16x256xf32>, vector<256x128xf32>, vector<16x128xf32> -> vector<16x128xf32>
    %93 = arith.addf %91, %92 : vector<16x128xf32>
    %94 = arith.negf %93 : vector<16x128xf32>
    %95 = math.exp %94 : vector<16x128xf32>
    %cst_43 = arith.constant 1.000000e+00 : f32
    %96 = vector.broadcast %cst_43 : f32 to vector<16x128xf32>
    %97 = arith.addf %96, %95 : vector<16x128xf32>
    %98 = arith.divf %96, %97 : vector<16x128xf32>
    %99 = arith.mulf %98, %76 : vector<16x128xf32>
    %cst_44 = arith.constant dense<0.000000e+00> : vector<16x128xf32>
    %100 = tpu.matmul %0, %99, %cst_44 {dimension_numbers = #tpu.dot_dimension_numbers<[1], [0], [0], [1], [0, 0, 1, 1], [], []>} : vector<16x16xf32>, vector<16x128xf32>, vector<16x128xf32> -> vector<16x128xf32>
    %101 = tpu.concatenate %99, %100 in 1 : vector<16x128xf32>, vector<16x128xf32> -> vector<16x256xf32>
    %102 = arith.index_cast %c2_i32 : i32 to index
    %c0_45 = arith.constant 0 : index
    %c0_46 = arith.constant 0 : index
    %103 = vector.load %arg2[%102, %c0_45, %c0_46] : memref<8x16x128xf32, #tpu.memory_space<vmem>>, vector<1x16x128xf32>
    %104 = vector.shape_cast %103 : vector<1x16x128xf32> to vector<16x128xf32>
    %cst_47 = arith.constant dense<0.000000e+00> : vector<16x128xf32>
    %105 = tpu.matmul %101, %3, %cst_47 {dimension_numbers = #tpu.dot_dimension_numbers<[1], [0], [0], [1], [0, 0, 1, 1], [], []>} : vector<16x256xf32>, vector<256x128xf32>, vector<16x128xf32> -> vector<16x128xf32>
    %106 = arith.addf %104, %105 : vector<16x128xf32>
    %107 = math.tanh %106 : vector<16x128xf32>
    %108 = arith.mulf %88, %76 : vector<16x128xf32>
    %cst_48 = arith.constant 1.000000e+00 : f32
    %109 = vector.broadcast %cst_48 : f32 to vector<16x128xf32>
    %110 = arith.subf %109, %88 : vector<16x128xf32>
    %111 = arith.mulf %110, %107 : vector<16x128xf32>
    %112 = arith.addf %108, %111 : vector<16x128xf32>
    %c3_i32 = arith.constant 3 : i32
    %cst_49 = arith.constant dense<0.000000e+00> : vector<16x128xf32>
    %113 = tpu.matmul %0, %112, %cst_49 {dimension_numbers = #tpu.dot_dimension_numbers<[1], [0], [0], [1], [0, 0, 1, 1], [], []>} : vector<16x16xf32>, vector<16x128xf32>, vector<16x128xf32> -> vector<16x128xf32>
    %114 = tpu.concatenate %112, %113 in 1 : vector<16x128xf32>, vector<16x128xf32> -> vector<16x256xf32>
    %115 = arith.index_cast %c3_i32 : i32 to index
    %c0_50 = arith.constant 0 : index
    %c0_51 = arith.constant 0 : index
    %116 = vector.load %arg0[%115, %c0_50, %c0_51] : memref<8x16x128xf32, #tpu.memory_space<vmem>>, vector<1x16x128xf32>
    %117 = vector.shape_cast %116 : vector<1x16x128xf32> to vector<16x128xf32>
    %cst_52 = arith.constant dense<0.000000e+00> : vector<16x128xf32>
    %118 = tpu.matmul %114, %1, %cst_52 {dimension_numbers = #tpu.dot_dimension_numbers<[1], [0], [0], [1], [0, 0, 1, 1], [], []>} : vector<16x256xf32>, vector<256x128xf32>, vector<16x128xf32> -> vector<16x128xf32>
    %119 = arith.addf %117, %118 : vector<16x128xf32>
    %120 = arith.negf %119 : vector<16x128xf32>
    %121 = math.exp %120 : vector<16x128xf32>
    %cst_53 = arith.constant 1.000000e+00 : f32
    %122 = vector.broadcast %cst_53 : f32 to vector<16x128xf32>
    %123 = arith.addf %122, %121 : vector<16x128xf32>
    %124 = arith.divf %122, %123 : vector<16x128xf32>
    %125 = arith.index_cast %c3_i32 : i32 to index
    %c0_54 = arith.constant 0 : index
    %c0_55 = arith.constant 0 : index
    %126 = vector.load %arg1[%125, %c0_54, %c0_55] : memref<8x16x128xf32, #tpu.memory_space<vmem>>, vector<1x16x128xf32>
    %127 = vector.shape_cast %126 : vector<1x16x128xf32> to vector<16x128xf32>
    %cst_56 = arith.constant dense<0.000000e+00> : vector<16x128xf32>
    %128 = tpu.matmul %114, %2, %cst_56 {dimension_numbers = #tpu.dot_dimension_numbers<[1], [0], [0], [1], [0, 0, 1, 1], [], []>} : vector<16x256xf32>, vector<256x128xf32>, vector<16x128xf32> -> vector<16x128xf32>
    %129 = arith.addf %127, %128 : vector<16x128xf32>
    %130 = arith.negf %129 : vector<16x128xf32>
    %131 = math.exp %130 : vector<16x128xf32>
    %cst_57 = arith.constant 1.000000e+00 : f32
    %132 = vector.broadcast %cst_57 : f32 to vector<16x128xf32>
    %133 = arith.addf %132, %131 : vector<16x128xf32>
    %134 = arith.divf %132, %133 : vector<16x128xf32>
    %135 = arith.mulf %134, %112 : vector<16x128xf32>
    %cst_58 = arith.constant dense<0.000000e+00> : vector<16x128xf32>
    %136 = tpu.matmul %0, %135, %cst_58 {dimension_numbers = #tpu.dot_dimension_numbers<[1], [0], [0], [1], [0, 0, 1, 1], [], []>} : vector<16x16xf32>, vector<16x128xf32>, vector<16x128xf32> -> vector<16x128xf32>
    %137 = tpu.concatenate %135, %136 in 1 : vector<16x128xf32>, vector<16x128xf32> -> vector<16x256xf32>
    %138 = arith.index_cast %c3_i32 : i32 to index
    %c0_59 = arith.constant 0 : index
    %c0_60 = arith.constant 0 : index
    %139 = vector.load %arg2[%138, %c0_59, %c0_60] : memref<8x16x128xf32, #tpu.memory_space<vmem>>, vector<1x16x128xf32>
    %140 = vector.shape_cast %139 : vector<1x16x128xf32> to vector<16x128xf32>
    %cst_61 = arith.constant dense<0.000000e+00> : vector<16x128xf32>
    %141 = tpu.matmul %137, %3, %cst_61 {dimension_numbers = #tpu.dot_dimension_numbers<[1], [0], [0], [1], [0, 0, 1, 1], [], []>} : vector<16x256xf32>, vector<256x128xf32>, vector<16x128xf32> -> vector<16x128xf32>
    %142 = arith.addf %140, %141 : vector<16x128xf32>
    %143 = math.tanh %142 : vector<16x128xf32>
    %144 = arith.mulf %124, %112 : vector<16x128xf32>
    %cst_62 = arith.constant 1.000000e+00 : f32
    %145 = vector.broadcast %cst_62 : f32 to vector<16x128xf32>
    %146 = arith.subf %145, %124 : vector<16x128xf32>
    %147 = arith.mulf %146, %143 : vector<16x128xf32>
    %148 = arith.addf %144, %147 : vector<16x128xf32>
    %c4_i32 = arith.constant 4 : i32
    %cst_63 = arith.constant dense<0.000000e+00> : vector<16x128xf32>
    %149 = tpu.matmul %0, %148, %cst_63 {dimension_numbers = #tpu.dot_dimension_numbers<[1], [0], [0], [1], [0, 0, 1, 1], [], []>} : vector<16x16xf32>, vector<16x128xf32>, vector<16x128xf32> -> vector<16x128xf32>
    %150 = tpu.concatenate %148, %149 in 1 : vector<16x128xf32>, vector<16x128xf32> -> vector<16x256xf32>
    %151 = arith.index_cast %c4_i32 : i32 to index
    %c0_64 = arith.constant 0 : index
    %c0_65 = arith.constant 0 : index
    %152 = vector.load %arg0[%151, %c0_64, %c0_65] : memref<8x16x128xf32, #tpu.memory_space<vmem>>, vector<1x16x128xf32>
    %153 = vector.shape_cast %152 : vector<1x16x128xf32> to vector<16x128xf32>
    %cst_66 = arith.constant dense<0.000000e+00> : vector<16x128xf32>
    %154 = tpu.matmul %150, %1, %cst_66 {dimension_numbers = #tpu.dot_dimension_numbers<[1], [0], [0], [1], [0, 0, 1, 1], [], []>} : vector<16x256xf32>, vector<256x128xf32>, vector<16x128xf32> -> vector<16x128xf32>
    %155 = arith.addf %153, %154 : vector<16x128xf32>
    %156 = arith.negf %155 : vector<16x128xf32>
    %157 = math.exp %156 : vector<16x128xf32>
    %cst_67 = arith.constant 1.000000e+00 : f32
    %158 = vector.broadcast %cst_67 : f32 to vector<16x128xf32>
    %159 = arith.addf %158, %157 : vector<16x128xf32>
    %160 = arith.divf %158, %159 : vector<16x128xf32>
    %161 = arith.index_cast %c4_i32 : i32 to index
    %c0_68 = arith.constant 0 : index
    %c0_69 = arith.constant 0 : index
    %162 = vector.load %arg1[%161, %c0_68, %c0_69] : memref<8x16x128xf32, #tpu.memory_space<vmem>>, vector<1x16x128xf32>
    %163 = vector.shape_cast %162 : vector<1x16x128xf32> to vector<16x128xf32>
    %cst_70 = arith.constant dense<0.000000e+00> : vector<16x128xf32>
    %164 = tpu.matmul %150, %2, %cst_70 {dimension_numbers = #tpu.dot_dimension_numbers<[1], [0], [0], [1], [0, 0, 1, 1], [], []>} : vector<16x256xf32>, vector<256x128xf32>, vector<16x128xf32> -> vector<16x128xf32>
    %165 = arith.addf %163, %164 : vector<16x128xf32>
    %166 = arith.negf %165 : vector<16x128xf32>
    %167 = math.exp %166 : vector<16x128xf32>
    %cst_71 = arith.constant 1.000000e+00 : f32
    %168 = vector.broadcast %cst_71 : f32 to vector<16x128xf32>
    %169 = arith.addf %168, %167 : vector<16x128xf32>
    %170 = arith.divf %168, %169 : vector<16x128xf32>
    %171 = arith.mulf %170, %148 : vector<16x128xf32>
    %cst_72 = arith.constant dense<0.000000e+00> : vector<16x128xf32>
    %172 = tpu.matmul %0, %171, %cst_72 {dimension_numbers = #tpu.dot_dimension_numbers<[1], [0], [0], [1], [0, 0, 1, 1], [], []>} : vector<16x16xf32>, vector<16x128xf32>, vector<16x128xf32> -> vector<16x128xf32>
    %173 = tpu.concatenate %171, %172 in 1 : vector<16x128xf32>, vector<16x128xf32> -> vector<16x256xf32>
    %174 = arith.index_cast %c4_i32 : i32 to index
    %c0_73 = arith.constant 0 : index
    %c0_74 = arith.constant 0 : index
    %175 = vector.load %arg2[%174, %c0_73, %c0_74] : memref<8x16x128xf32, #tpu.memory_space<vmem>>, vector<1x16x128xf32>
    %176 = vector.shape_cast %175 : vector<1x16x128xf32> to vector<16x128xf32>
    %cst_75 = arith.constant dense<0.000000e+00> : vector<16x128xf32>
    %177 = tpu.matmul %173, %3, %cst_75 {dimension_numbers = #tpu.dot_dimension_numbers<[1], [0], [0], [1], [0, 0, 1, 1], [], []>} : vector<16x256xf32>, vector<256x128xf32>, vector<16x128xf32> -> vector<16x128xf32>
    %178 = arith.addf %176, %177 : vector<16x128xf32>
    %179 = math.tanh %178 : vector<16x128xf32>
    %180 = arith.mulf %160, %148 : vector<16x128xf32>
    %cst_76 = arith.constant 1.000000e+00 : f32
    %181 = vector.broadcast %cst_76 : f32 to vector<16x128xf32>
    %182 = arith.subf %181, %160 : vector<16x128xf32>
    %183 = arith.mulf %182, %179 : vector<16x128xf32>
    %184 = arith.addf %180, %183 : vector<16x128xf32>
    %c5_i32 = arith.constant 5 : i32
    %cst_77 = arith.constant dense<0.000000e+00> : vector<16x128xf32>
    %185 = tpu.matmul %0, %184, %cst_77 {dimension_numbers = #tpu.dot_dimension_numbers<[1], [0], [0], [1], [0, 0, 1, 1], [], []>} : vector<16x16xf32>, vector<16x128xf32>, vector<16x128xf32> -> vector<16x128xf32>
    %186 = tpu.concatenate %184, %185 in 1 : vector<16x128xf32>, vector<16x128xf32> -> vector<16x256xf32>
    %187 = arith.index_cast %c5_i32 : i32 to index
    %c0_78 = arith.constant 0 : index
    %c0_79 = arith.constant 0 : index
    %188 = vector.load %arg0[%187, %c0_78, %c0_79] : memref<8x16x128xf32, #tpu.memory_space<vmem>>, vector<1x16x128xf32>
    %189 = vector.shape_cast %188 : vector<1x16x128xf32> to vector<16x128xf32>
    %cst_80 = arith.constant dense<0.000000e+00> : vector<16x128xf32>
    %190 = tpu.matmul %186, %1, %cst_80 {dimension_numbers = #tpu.dot_dimension_numbers<[1], [0], [0], [1], [0, 0, 1, 1], [], []>} : vector<16x256xf32>, vector<256x128xf32>, vector<16x128xf32> -> vector<16x128xf32>
    %191 = arith.addf %189, %190 : vector<16x128xf32>
    %192 = arith.negf %191 : vector<16x128xf32>
    %193 = math.exp %192 : vector<16x128xf32>
    %cst_81 = arith.constant 1.000000e+00 : f32
    %194 = vector.broadcast %cst_81 : f32 to vector<16x128xf32>
    %195 = arith.addf %194, %193 : vector<16x128xf32>
    %196 = arith.divf %194, %195 : vector<16x128xf32>
    %197 = arith.index_cast %c5_i32 : i32 to index
    %c0_82 = arith.constant 0 : index
    %c0_83 = arith.constant 0 : index
    %198 = vector.load %arg1[%197, %c0_82, %c0_83] : memref<8x16x128xf32, #tpu.memory_space<vmem>>, vector<1x16x128xf32>
    %199 = vector.shape_cast %198 : vector<1x16x128xf32> to vector<16x128xf32>
    %cst_84 = arith.constant dense<0.000000e+00> : vector<16x128xf32>
    %200 = tpu.matmul %186, %2, %cst_84 {dimension_numbers = #tpu.dot_dimension_numbers<[1], [0], [0], [1], [0, 0, 1, 1], [], []>} : vector<16x256xf32>, vector<256x128xf32>, vector<16x128xf32> -> vector<16x128xf32>
    %201 = arith.addf %199, %200 : vector<16x128xf32>
    %202 = arith.negf %201 : vector<16x128xf32>
    %203 = math.exp %202 : vector<16x128xf32>
    %cst_85 = arith.constant 1.000000e+00 : f32
    %204 = vector.broadcast %cst_85 : f32 to vector<16x128xf32>
    %205 = arith.addf %204, %203 : vector<16x128xf32>
    %206 = arith.divf %204, %205 : vector<16x128xf32>
    %207 = arith.mulf %206, %184 : vector<16x128xf32>
    %cst_86 = arith.constant dense<0.000000e+00> : vector<16x128xf32>
    %208 = tpu.matmul %0, %207, %cst_86 {dimension_numbers = #tpu.dot_dimension_numbers<[1], [0], [0], [1], [0, 0, 1, 1], [], []>} : vector<16x16xf32>, vector<16x128xf32>, vector<16x128xf32> -> vector<16x128xf32>
    %209 = tpu.concatenate %207, %208 in 1 : vector<16x128xf32>, vector<16x128xf32> -> vector<16x256xf32>
    %210 = arith.index_cast %c5_i32 : i32 to index
    %c0_87 = arith.constant 0 : index
    %c0_88 = arith.constant 0 : index
    %211 = vector.load %arg2[%210, %c0_87, %c0_88] : memref<8x16x128xf32, #tpu.memory_space<vmem>>, vector<1x16x128xf32>
    %212 = vector.shape_cast %211 : vector<1x16x128xf32> to vector<16x128xf32>
    %cst_89 = arith.constant dense<0.000000e+00> : vector<16x128xf32>
    %213 = tpu.matmul %209, %3, %cst_89 {dimension_numbers = #tpu.dot_dimension_numbers<[1], [0], [0], [1], [0, 0, 1, 1], [], []>} : vector<16x256xf32>, vector<256x128xf32>, vector<16x128xf32> -> vector<16x128xf32>
    %214 = arith.addf %212, %213 : vector<16x128xf32>
    %215 = math.tanh %214 : vector<16x128xf32>
    %216 = arith.mulf %196, %184 : vector<16x128xf32>
    %cst_90 = arith.constant 1.000000e+00 : f32
    %217 = vector.broadcast %cst_90 : f32 to vector<16x128xf32>
    %218 = arith.subf %217, %196 : vector<16x128xf32>
    %219 = arith.mulf %218, %215 : vector<16x128xf32>
    %220 = arith.addf %216, %219 : vector<16x128xf32>
    %c6_i32 = arith.constant 6 : i32
    %cst_91 = arith.constant dense<0.000000e+00> : vector<16x128xf32>
    %221 = tpu.matmul %0, %220, %cst_91 {dimension_numbers = #tpu.dot_dimension_numbers<[1], [0], [0], [1], [0, 0, 1, 1], [], []>} : vector<16x16xf32>, vector<16x128xf32>, vector<16x128xf32> -> vector<16x128xf32>
    %222 = tpu.concatenate %220, %221 in 1 : vector<16x128xf32>, vector<16x128xf32> -> vector<16x256xf32>
    %223 = arith.index_cast %c6_i32 : i32 to index
    %c0_92 = arith.constant 0 : index
    %c0_93 = arith.constant 0 : index
    %224 = vector.load %arg0[%223, %c0_92, %c0_93] : memref<8x16x128xf32, #tpu.memory_space<vmem>>, vector<1x16x128xf32>
    %225 = vector.shape_cast %224 : vector<1x16x128xf32> to vector<16x128xf32>
    %cst_94 = arith.constant dense<0.000000e+00> : vector<16x128xf32>
    %226 = tpu.matmul %222, %1, %cst_94 {dimension_numbers = #tpu.dot_dimension_numbers<[1], [0], [0], [1], [0, 0, 1, 1], [], []>} : vector<16x256xf32>, vector<256x128xf32>, vector<16x128xf32> -> vector<16x128xf32>
    %227 = arith.addf %225, %226 : vector<16x128xf32>
    %228 = arith.negf %227 : vector<16x128xf32>
    %229 = math.exp %228 : vector<16x128xf32>
    %cst_95 = arith.constant 1.000000e+00 : f32
    %230 = vector.broadcast %cst_95 : f32 to vector<16x128xf32>
    %231 = arith.addf %230, %229 : vector<16x128xf32>
    %232 = arith.divf %230, %231 : vector<16x128xf32>
    %233 = arith.index_cast %c6_i32 : i32 to index
    %c0_96 = arith.constant 0 : index
    %c0_97 = arith.constant 0 : index
    %234 = vector.load %arg1[%233, %c0_96, %c0_97] : memref<8x16x128xf32, #tpu.memory_space<vmem>>, vector<1x16x128xf32>
    %235 = vector.shape_cast %234 : vector<1x16x128xf32> to vector<16x128xf32>
    %cst_98 = arith.constant dense<0.000000e+00> : vector<16x128xf32>
    %236 = tpu.matmul %222, %2, %cst_98 {dimension_numbers = #tpu.dot_dimension_numbers<[1], [0], [0], [1], [0, 0, 1, 1], [], []>} : vector<16x256xf32>, vector<256x128xf32>, vector<16x128xf32> -> vector<16x128xf32>
    %237 = arith.addf %235, %236 : vector<16x128xf32>
    %238 = arith.negf %237 : vector<16x128xf32>
    %239 = math.exp %238 : vector<16x128xf32>
    %cst_99 = arith.constant 1.000000e+00 : f32
    %240 = vector.broadcast %cst_99 : f32 to vector<16x128xf32>
    %241 = arith.addf %240, %239 : vector<16x128xf32>
    %242 = arith.divf %240, %241 : vector<16x128xf32>
    %243 = arith.mulf %242, %220 : vector<16x128xf32>
    %cst_100 = arith.constant dense<0.000000e+00> : vector<16x128xf32>
    %244 = tpu.matmul %0, %243, %cst_100 {dimension_numbers = #tpu.dot_dimension_numbers<[1], [0], [0], [1], [0, 0, 1, 1], [], []>} : vector<16x16xf32>, vector<16x128xf32>, vector<16x128xf32> -> vector<16x128xf32>
    %245 = tpu.concatenate %243, %244 in 1 : vector<16x128xf32>, vector<16x128xf32> -> vector<16x256xf32>
    %246 = arith.index_cast %c6_i32 : i32 to index
    %c0_101 = arith.constant 0 : index
    %c0_102 = arith.constant 0 : index
    %247 = vector.load %arg2[%246, %c0_101, %c0_102] : memref<8x16x128xf32, #tpu.memory_space<vmem>>, vector<1x16x128xf32>
    %248 = vector.shape_cast %247 : vector<1x16x128xf32> to vector<16x128xf32>
    %cst_103 = arith.constant dense<0.000000e+00> : vector<16x128xf32>
    %249 = tpu.matmul %245, %3, %cst_103 {dimension_numbers = #tpu.dot_dimension_numbers<[1], [0], [0], [1], [0, 0, 1, 1], [], []>} : vector<16x256xf32>, vector<256x128xf32>, vector<16x128xf32> -> vector<16x128xf32>
    %250 = arith.addf %248, %249 : vector<16x128xf32>
    %251 = math.tanh %250 : vector<16x128xf32>
    %252 = arith.mulf %232, %220 : vector<16x128xf32>
    %cst_104 = arith.constant 1.000000e+00 : f32
    %253 = vector.broadcast %cst_104 : f32 to vector<16x128xf32>
    %254 = arith.subf %253, %232 : vector<16x128xf32>
    %255 = arith.mulf %254, %251 : vector<16x128xf32>
    %256 = arith.addf %252, %255 : vector<16x128xf32>
    %c7_i32 = arith.constant 7 : i32
    %cst_105 = arith.constant dense<0.000000e+00> : vector<16x128xf32>
    %257 = tpu.matmul %0, %256, %cst_105 {dimension_numbers = #tpu.dot_dimension_numbers<[1], [0], [0], [1], [0, 0, 1, 1], [], []>} : vector<16x16xf32>, vector<16x128xf32>, vector<16x128xf32> -> vector<16x128xf32>
    %258 = tpu.concatenate %256, %257 in 1 : vector<16x128xf32>, vector<16x128xf32> -> vector<16x256xf32>
    %259 = arith.index_cast %c7_i32 : i32 to index
    %c0_106 = arith.constant 0 : index
    %c0_107 = arith.constant 0 : index
    %260 = vector.load %arg0[%259, %c0_106, %c0_107] : memref<8x16x128xf32, #tpu.memory_space<vmem>>, vector<1x16x128xf32>
    %261 = vector.shape_cast %260 : vector<1x16x128xf32> to vector<16x128xf32>
    %cst_108 = arith.constant dense<0.000000e+00> : vector<16x128xf32>
    %262 = tpu.matmul %258, %1, %cst_108 {dimension_numbers = #tpu.dot_dimension_numbers<[1], [0], [0], [1], [0, 0, 1, 1], [], []>} : vector<16x256xf32>, vector<256x128xf32>, vector<16x128xf32> -> vector<16x128xf32>
    %263 = arith.addf %261, %262 : vector<16x128xf32>
    %264 = arith.negf %263 : vector<16x128xf32>
    %265 = math.exp %264 : vector<16x128xf32>
    %cst_109 = arith.constant 1.000000e+00 : f32
    %266 = vector.broadcast %cst_109 : f32 to vector<16x128xf32>
    %267 = arith.addf %266, %265 : vector<16x128xf32>
    %268 = arith.divf %266, %267 : vector<16x128xf32>
    %269 = arith.index_cast %c7_i32 : i32 to index
    %c0_110 = arith.constant 0 : index
    %c0_111 = arith.constant 0 : index
    %270 = vector.load %arg1[%269, %c0_110, %c0_111] : memref<8x16x128xf32, #tpu.memory_space<vmem>>, vector<1x16x128xf32>
    %271 = vector.shape_cast %270 : vector<1x16x128xf32> to vector<16x128xf32>
    %cst_112 = arith.constant dense<0.000000e+00> : vector<16x128xf32>
    %272 = tpu.matmul %258, %2, %cst_112 {dimension_numbers = #tpu.dot_dimension_numbers<[1], [0], [0], [1], [0, 0, 1, 1], [], []>} : vector<16x256xf32>, vector<256x128xf32>, vector<16x128xf32> -> vector<16x128xf32>
    %273 = arith.addf %271, %272 : vector<16x128xf32>
    %274 = arith.negf %273 : vector<16x128xf32>
    %275 = math.exp %274 : vector<16x128xf32>
    %cst_113 = arith.constant 1.000000e+00 : f32
    %276 = vector.broadcast %cst_113 : f32 to vector<16x128xf32>
    %277 = arith.addf %276, %275 : vector<16x128xf32>
    %278 = arith.divf %276, %277 : vector<16x128xf32>
    %279 = arith.mulf %278, %256 : vector<16x128xf32>
    %cst_114 = arith.constant dense<0.000000e+00> : vector<16x128xf32>
    %280 = tpu.matmul %0, %279, %cst_114 {dimension_numbers = #tpu.dot_dimension_numbers<[1], [0], [0], [1], [0, 0, 1, 1], [], []>} : vector<16x16xf32>, vector<16x128xf32>, vector<16x128xf32> -> vector<16x128xf32>
    %281 = tpu.concatenate %279, %280 in 1 : vector<16x128xf32>, vector<16x128xf32> -> vector<16x256xf32>
    %282 = arith.index_cast %c7_i32 : i32 to index
    %c0_115 = arith.constant 0 : index
    %c0_116 = arith.constant 0 : index
    %283 = vector.load %arg2[%282, %c0_115, %c0_116] : memref<8x16x128xf32, #tpu.memory_space<vmem>>, vector<1x16x128xf32>
    %284 = vector.shape_cast %283 : vector<1x16x128xf32> to vector<16x128xf32>
    %cst_117 = arith.constant dense<0.000000e+00> : vector<16x128xf32>
    %285 = tpu.matmul %281, %3, %cst_117 {dimension_numbers = #tpu.dot_dimension_numbers<[1], [0], [0], [1], [0, 0, 1, 1], [], []>} : vector<16x256xf32>, vector<256x128xf32>, vector<16x128xf32> -> vector<16x128xf32>
    %286 = arith.addf %284, %285 : vector<16x128xf32>
    %287 = math.tanh %286 : vector<16x128xf32>
    %288 = arith.mulf %268, %256 : vector<16x128xf32>
    %cst_118 = arith.constant 1.000000e+00 : f32
    %289 = vector.broadcast %cst_118 : f32 to vector<16x128xf32>
    %290 = arith.subf %289, %268 : vector<16x128xf32>
    %291 = arith.mulf %290, %287 : vector<16x128xf32>
    %292 = arith.addf %288, %291 : vector<16x128xf32>
    %c8_i32 = arith.constant 8 : i32
    %c0_119 = arith.constant 0 : index
    %c0_120 = arith.constant 0 : index
    %293 = vector.load %arg10[%c0_119, %c0_120] : memref<16x128xf32, #tpu.memory_space<vmem>>, vector<16x128xf32>
    tpu.vector_store %arg10[%c0_119, %c0_120], %292 {strides = array<i32>} : memref<16x128xf32, #tpu.memory_space<vmem>>, vector<16x128xf32>,
    %c0_121 = arith.constant 0 : index
    %c0_122 = arith.constant 0 : index
    %294 = vector.load %arg7[%c0_121, %c0_122] : memref<2x16xf32, #tpu.memory_space<vmem>>, vector<2x16xf32>
    %cst_123 = arith.constant dense<0.000000e+00> : vector<2x128xf32>
    %295 = tpu.matmul %294, %292, %cst_123 {dimension_numbers = #tpu.dot_dimension_numbers<[1], [0], [0], [1], [0, 0, 1, 1], [], []>} : vector<2x16xf32>, vector<16x128xf32>, vector<2x128xf32> -> vector<2x128xf32>
    %c0_124 = arith.constant 0 : index
    %c0_125 = arith.constant 0 : index
    %296 = vector.load %arg8[%c0_124, %c0_125] : memref<128x2xf32, #tpu.memory_space<vmem>>, vector<128x2xf32>
    %cst_126 = arith.constant dense<0.000000e+00> : vector<2x2xf32>
    %297 = tpu.matmul %295, %296, %cst_126 {dimension_numbers = #tpu.dot_dimension_numbers<[1], [0], [0], [1], [0, 0, 1, 1], [], []>} : vector<2x128xf32>, vector<128x2xf32>, vector<2x2xf32> -> vector<2x2xf32>
    %c0_127 = arith.constant 0 : index
    %c0_128 = arith.constant 0 : index
    %298 = vector.load %arg9[%c0_127, %c0_128] : memref<1x2xf32, #tpu.memory_space<vmem>>, vector<1x2xf32>
    %299 = vector.broadcast %298 : vector<1x2xf32> to vector<2x2xf32>
    %300 = arith.addf %297, %299 : vector<2x2xf32>
    %c0_129 = arith.constant 0 : index
    %c0_130 = arith.constant 0 : index
    %301 = vector.load %arg11[%c0_129, %c0_130] : memref<2x2xf32, #tpu.memory_space<vmem>>, vector<2x2xf32>
    tpu.vector_store %arg11[%c0_129, %c0_130], %300 {strides = array<i32>} : memref<2x2xf32, #tpu.memory_space<vmem>>, vector<2x2xf32>,
    return
  }
}

</mosaic_0001>

<bundles_post_ra>
// kernel: dgla_classifier_forward.2
= control target key start
LH: loop header
LB: loop body
LE: loop exit
PB: predicated region body
PF: predicated region fallthrough
CT: control target
= control target key end

     0   :  { %vm116_vm0 = vcmask 1043456   ;;  %vm91_vm1 = vcmask 64512   ;;  %s727_s1 = inlined_call_operand.vmem [shape: bf16[8,128], index: 1, kind: input, shape index: {}]   ;;  %s728_s2 = inlined_call_operand.vmem [shape: bf16[8,128], index: 2, kind: input, shape index: {}]   ;;  %s729_s3 = inlined_call_operand.vmem [shape: bf16[8,128], index: 3, kind: input, shape index: {}]   ;;  %s730_s0 = inlined_call_operand.vmem [shape: bf16[128,8], index: 0, kind: input, shape index: {}]   ;;  %s731_s4 = inlined_call_operand.vmem [shape: f32[1,128], index: 4, kind: input, shape index: {}]   ;;  %s732_s5 = inlined_call_operand.vmem [shape: f32[1,128], index: 5, kind: input, shape index: {}]   ;;  %s733_s6 = inlined_call_operand.vmem [shape: f32[1,128], index: 6, kind: input, shape index: {}]   ;;  %s734_s7 = inlined_call_operand.vmem [shape: f32[128,128], index: 7, kind: output, shape index: {0}]   ;;  %s735_s8 = inlined_call_operand.vmem [shape: f32[128,128], index: 8, kind: output, shape index: {1}]   ;;  %s736_s9 = inlined_call_operand.vmem [shape: f32[128,128], index: 9, kind: output, shape index: {2}]  }
   0x1   :  { %v46_v0 = vld [vmem:[%s727_s1] sm:$0xf]  ;;  %v405_v7 = vld [vmem:[%s730_s0 + $0x30] sm:$0xff]  ;;  %v400_v8 = vld [vmem:[%s730_s0 + $0x8] sm:$0xff] }
   0x2   :  { %v185_v1 = vld [vmem:[%s728_s2] sm:$0xf]  ;;  %v118_v3 = vsel %vm116_vm0, %v46_v0, 0  ;;  %v406_v9 = vld [vmem:[%s730_s0 + $0x38] sm:$0xff]  ;;  %v401_v10 = vld [vmem:[%s730_s0 + $0x10] sm:$0xff] }
   0x3   :  { %v258_v2 = vld [vmem:[%s729_s3] sm:$0xf]  ;;  %v191_v4 = vsel %vm116_vm0, %v185_v1, 0  ;;  %127 = vmatpush.bf16.msra.mxu0 %v118_v3  ;;  %407 = vmatpush.bf16.msra.mxu3 %v118_v3  ;;  %v402_v11 = vld [vmem:[%s730_s0 + $0x18] sm:$0xff]  ;;  %v404_v13 = vld [vmem:[%s730_s0 + $0x28] sm:$0xff] }
   0x4   :  { %v264_v5 = vsel %vm116_vm0, %v258_v2, 0  ;;  %v399_v6 = vld [vmem:[%s730_s0] sm:$0xff]  ;;  %200 = vmatpush.bf16.msra.mxu1 %v191_v4 }
   0x5   :  { %273 = vmatpush.bf16.msra.mxu2 %v264_v5  ;;  %v403_v12 = vld [vmem:[%s730_s0 + $0x20] sm:$0xff] }
   0x6   :  { %375 = vmatmul.msk.bf16.vlgmr.msra.gmra.mxu0 %vm91_vm1, %v399_v6  ;;  %381 = vmatmul.msk.bf16.vlgmr.msra.gmra.mxu3 %vm91_vm1, %v405_v7  ;;  %v523_v14 = vld [vmem:[%s731_s4] ss:$0 sm:$0xff] }
   0x7   :  { %408 = vmatpush.bf16.msrb.mxu3 %v191_v4  ;;  %383 = vmatmul.msk.bf16.vlgmr.msra.gmra.mxu1 %vm91_vm1, %v399_v6  ;;  %v528_v15 = vld [vmem:[%s732_s5] ss:$0 sm:$0xff] }
   0x8   :  { %391 = vmatmul.msk.bf16.vlgmr.msra.gmra.mxu2 %vm91_vm1, %v399_v6  ;;  %v541_v20 = vld [vmem:[%s733_s6] ss:$0 sm:$0xff] }
   0xb   :  { %409 = vmatpush.bf16.msra.mxu3 %v264_v5 }
  0x16   :  { %376 = vmatmul.msk.bf16.gmra.mxu0 %vm91_vm1, %v400_v8  ;;  %382 = vmatmul.msk.bf16.gmra.mxu3 %vm91_vm1, %v406_v9 }
  0x17   :  { %384 = vmatmul.msk.bf16.gmra.mxu1 %vm91_vm1, %v400_v8 }
  0x18   :  { %392 = vmatmul.msk.bf16.gmra.mxu2 %vm91_vm1, %v400_v8 }
  0x26   :  { %377 = vmatmul.msk.bf16.gmra.mxu0 %vm91_vm1, %v401_v10  ;;  %389 = vmatmul.msk.bf16.vlgmr.msrb.gmra.mxu3 %vm91_vm1, %v405_v7 }
  0x27   :  { %385 = vmatmul.msk.bf16.gmra.mxu1 %vm91_vm1, %v401_v10 }
  0x28   :  { %393 = vmatmul.msk.bf16.gmra.mxu2 %vm91_vm1, %v401_v10 }
  0x36   :  { %378 = vmatmul.msk.bf16.gmra.mxu0 %vm91_vm1, %v402_v11  ;;  %390 = vmatmul.msk.bf16.gmra.mxu3 %vm91_vm1, %v406_v9 }
  0x37   :  { %386 = vmatmul.msk.bf16.gmra.mxu1 %vm91_vm1, %v402_v11 }
  0x38   :  { %394 = vmatmul.msk.bf16.gmra.mxu2 %vm91_vm1, %v402_v11 }
  0x46   :  { %379 = vmatmul.msk.bf16.gmra.mxu0 %vm91_vm1, %v403_v12  ;;  %397 = vmatmul.msk.bf16.vlgmr.msra.gmra.mxu3 %vm91_vm1, %v405_v7 }
  0x47   :  { %387 = vmatmul.msk.bf16.gmra.mxu1 %vm91_vm1, %v403_v12 }
  0x48   :  { %395 = vmatmul.msk.bf16.gmra.mxu2 %vm91_vm1, %v403_v12 }
  0x56   :  { %380 = vmatmul.msk.bf16.gmra.mxu0 %vm91_vm1, %v404_v13  ;;  %398 = vmatmul.msk.bf16.gmra.mxu3 %vm91_vm1, %v406_v9 }
  0x57   :  { %388 = vmatmul.msk.bf16.gmra.mxu1 %vm91_vm1, %v404_v13 }
  0x58   :  { %396 = vmatmul.msk.bf16.gmra.mxu2 %vm91_vm1, %v404_v13 }
  0x83   :  { %v129_v16 = vpop.f32.mrf.mxu0 }
  0x84   :  { %v130_v17 = vadd.f32 %v523_v14, %v129_v16  ;;  %v202_v18 = vpop.f32.mrf.mxu1 }
  0x85   :  { %v203_v19 = vadd.f32 %v528_v15, %v202_v18 }
  0x86   :  { %169 = vst [vmem:[%s734_s7] sm:$0xff] %v130_v17 }
  0x87   :  { %242 = vst [vmem:[%s735_s8] sm:$0xff] %v203_v19 }
  0x89   :  { %v159_v21 = vpop.f32.mrf.mxu3 }
  0x8a   :  { %v160_v22 = vadd.f32 %v523_v14, %v159_v21 }
  0x8b   :  { %v275_v23 = vpop.f32.mrf.mxu2  ;;  %v131_v25 = vpop.f32.mrf.mxu0 }
  0x8c   :  { %v276_v24 = vadd.f32 %v541_v20, %v275_v23  ;;  %181 = vst [vmem:[%s734_s7 + $0x60] sm:$0xff] %v160_v22  ;;  %v132_v26 = vadd.f32 %v523_v14, %v131_v25  ;;  %v204_v27 = vpop.f32.mrf.mxu1 }
  0x8d   :  { %v205_v28 = vadd.f32 %v528_v15, %v204_v27 }
  0x8e   :  { %315 = vst [vmem:[%s736_s9] sm:$0xff] %v276_v24 }
  0x8f   :  { %170 = vst [vmem:[%s734_s7 + $0x8] sm:$0xff] %v132_v26 }
  0x90   :  { %243 = vst [vmem:[%s735_s8 + $0x8] sm:$0xff] %v205_v28 }
  0x91   :  { %v161_v29 = vpop.f32.mrf.mxu3 }
  0x92   :  { %v162_v30 = vadd.f32 %v523_v14, %v161_v29 }
  0x93   :  { %v277_v31 = vpop.f32.mrf.mxu2  ;;  %v134_v33 = vpop.f32.mrf.mxu0 }
  0x94   :  { %v278_v32 = vadd.f32 %v541_v20, %v277_v31  ;;  %182 = vst [vmem:[%s734_s7 + $0x68] sm:$0xff] %v162_v30  ;;  %v135_v34 = vadd.f32 %v523_v14, %v134_v33  ;;  %v207_v35 = vpop.f32.mrf.mxu1 }
  0x95   :  { %v208_v36 = vadd.f32 %v528_v15, %v207_v35 }
  0x96   :  { %316 = vst [vmem:[%s736_s9 + $0x8] sm:$0xff] %v278_v32 }
  0x97   :  { %171 = vst [vmem:[%s734_s7 + $0x10] sm:$0xff] %v135_v34 }
  0x98   :  { %244 = vst [vmem:[%s735_s8 + $0x10] sm:$0xff] %v208_v36 }
  0x99   :  { %v164_v37 = vpop.f32.mrf.mxu3 }
  0x9a   :  { %v165_v38 = vadd.f32 %v523_v14, %v164_v37 }
  0x9b   :  { %v280_v39 = vpop.f32.mrf.mxu2  ;;  %v136_v41 = vpop.f32.mrf.mxu0 }
  0x9c   :  { %v281_v40 = vadd.f32 %v541_v20, %v280_v39  ;;  %183 = vst [vmem:[%s734_s7 + $0x70] sm:$0xff] %v165_v38  ;;  %v137_v42 = vadd.f32 %v523_v14, %v136_v41  ;;  %v209_v43 = vpop.f32.mrf.mxu1 }
  0x9d   :  { %v210_v44 = vadd.f32 %v528_v15, %v209_v43 }
  0x9e   :  { %317 = vst [vmem:[%s736_s9 + $0x10] sm:$0xff] %v281_v40 }
  0x9f   :  { %172 = vst [vmem:[%s734_s7 + $0x18] sm:$0xff] %v137_v42 }
  0xa0   :  { %245 = vst [vmem:[%s735_s8 + $0x18] sm:$0xff] %v210_v44 }
  0xa1   :  { %v166_v45 = vpop.f32.mrf.mxu3 }
  0xa2   :  { %v167_v46 = vadd.f32 %v523_v14, %v166_v45 }
  0xa3   :  { %v282_v47 = vpop.f32.mrf.mxu2  ;;  %v139_v49 = vpop.f32.mrf.mxu0 }
  0xa4   :  { %v283_v48 = vadd.f32 %v541_v20, %v282_v47  ;;  %184 = vst [vmem:[%s734_s7 + $0x78] sm:$0xff] %v167_v46  ;;  %v140_v50 = vadd.f32 %v523_v14, %v139_v49  ;;  %v212_v51 = vpop.f32.mrf.mxu1 }
  0xa5   :  { %v213_v52 = vadd.f32 %v528_v15, %v212_v51 }
  0xa6   :  { %318 = vst [vmem:[%s736_s9 + $0x18] sm:$0xff] %v283_v48 }
  0xa7   :  { %173 = vst [vmem:[%s734_s7 + $0x20] sm:$0xff] %v140_v50 }
  0xa8   :  { %246 = vst [vmem:[%s735_s8 + $0x20] sm:$0xff] %v213_v52 }
  0xa9   :  { %v232_v53 = vpop.f32.mrf.mxu3 }
  0xaa   :  { %v233_v54 = vadd.f32 %v528_v15, %v232_v53 }
  0xab   :  { %v285_v55 = vpop.f32.mrf.mxu2  ;;  %v141_v57 = vpop.f32.mrf.mxu0 }
  0xac   :  { %v286_v56 = vadd.f32 %v541_v20, %v285_v55  ;;  %254 = vst [vmem:[%s735_s8 + $0x60] sm:$0xff] %v233_v54  ;;  %v142_v58 = vadd.f32 %v523_v14, %v141_v57  ;;  %v214_v59 = vpop.f32.mrf.mxu1 }
  0xad   :  { %v215_v60 = vadd.f32 %v528_v15, %v214_v59 }
  0xae   :  { %319 = vst [vmem:[%s736_s9 + $0x20] sm:$0xff] %v286_v56 }
  0xaf   :  { %174 = vst [vmem:[%s734_s7 + $0x28] sm:$0xff] %v142_v58 }
  0xb0   :  { %247 = vst [vmem:[%s735_s8 + $0x28] sm:$0xff] %v215_v60 }
  0xb1   :  { %v234_v61 = vpop.f32.mrf.mxu3 }
  0xb2   :  { %v235_v62 = vadd.f32 %v528_v15, %v234_v61 }
  0xb3   :  { %v287_v63 = vpop.f32.mrf.mxu2  ;;  %v144_v1 = vpop.f32.mrf.mxu0 }
  0xb4   :  { %v288_v0 = vadd.f32 %v541_v20, %v287_v63  ;;  %255 = vst [vmem:[%s735_s8 + $0x68] sm:$0xff] %v235_v62  ;;  %v145_v2 = vadd.f32 %v523_v14, %v144_v1  ;;  %v217_v3 = vpop.f32.mrf.mxu1 }
  0xb5   :  { %v218_v4 = vadd.f32 %v528_v15, %v217_v3 }
  0xb6   :  { %320 = vst [vmem:[%s736_s9 + $0x28] sm:$0xff] %v288_v0 }
  0xb7   :  { %175 = vst [vmem:[%s734_s7 + $0x30] sm:$0xff] %v145_v2 }
  0xb8   :  { %248 = vst [vmem:[%s735_s8 + $0x30] sm:$0xff] %v218_v4 }
  0xb9   :  { %v237_v5 = vpop.f32.mrf.mxu3 }
  0xba   :  { %v238_v6 = vadd.f32 %v528_v15, %v237_v5 }
  0xbb   :  { %v290_v7 = vpop.f32.mrf.mxu2  ;;  %v146_v9 = vpop.f32.mrf.mxu0 }
  0xbc   :  { %v291_v8 = vadd.f32 %v541_v20, %v290_v7  ;;  %256 = vst [vmem:[%s735_s8 + $0x70] sm:$0xff] %v238_v6  ;;  %v147_v10 = vadd.f32 %v523_v14, %v146_v9  ;;  %v219_v11 = vpop.f32.mrf.mxu1 }
  0xbd   :  { %v220_v12 = vadd.f32 %v528_v15, %v219_v11 }
  0xbe   :  { %321 = vst [vmem:[%s736_s9 + $0x30] sm:$0xff] %v291_v8 }
  0xbf   :  { %176 = vst [vmem:[%s734_s7 + $0x38] sm:$0xff] %v147_v10 }
  0xc0   :  { %249 = vst [vmem:[%s735_s8 + $0x38] sm:$0xff] %v220_v12 }
  0xc1   :  { %v239_v13 = vpop.f32.mrf.mxu3 }
  0xc2   :  { %v240_v16 = vadd.f32 %v528_v15, %v239_v13 }
  0xc3   :  { %v292_v17 = vpop.f32.mrf.mxu2  ;;  %v149_v19 = vpop.f32.mrf.mxu0 }
  0xc4   :  { %v293_v18 = vadd.f32 %v541_v20, %v292_v17  ;;  %257 = vst [vmem:[%s735_s8 + $0x78] sm:$0xff] %v240_v16  ;;  %v150_v21 = vadd.f32 %v523_v14, %v149_v19  ;;  %v222_v22 = vpop.f32.mrf.mxu1 }
  0xc5   :  { %v223_v23 = vadd.f32 %v528_v15, %v222_v22 }
  0xc6   :  { %322 = vst [vmem:[%s736_s9 + $0x38] sm:$0xff] %v293_v18 }
  0xc7   :  { %177 = vst [vmem:[%s734_s7 + $0x40] sm:$0xff] %v150_v21 }
  0xc8   :  { %250 = vst [vmem:[%s735_s8 + $0x40] sm:$0xff] %v223_v23 }
  0xc9   :  { %v305_v24 = vpop.f32.mrf.mxu3 }
  0xca   :  { %v306_v26 = vadd.f32 %v541_v20, %v305_v24 }
  0xcb   :  { %v295_v25 = vpop.f32.mrf.mxu2  ;;  %v151_v28 = vpop.f32.mrf.mxu0 }
  0xcc   :  { %v296_v27 = vadd.f32 %v541_v20, %v295_v25  ;;  %327 = vst [vmem:[%s736_s9 + $0x60] sm:$0xff] %v306_v26  ;;  %v152_v29 = vadd.f32 %v523_v14, %v151_v28  ;;  %v224_v30 = vpop.f32.mrf.mxu1 }
  0xcd   :  { %v225_v31 = vadd.f32 %v528_v15, %v224_v30 }
  0xce   :  { %323 = vst [vmem:[%s736_s9 + $0x40] sm:$0xff] %v296_v27 }
  0xcf   :  { %178 = vst [vmem:[%s734_s7 + $0x48] sm:$0xff] %v152_v29 }
  0xd0   :  { %251 = vst [vmem:[%s735_s8 + $0x48] sm:$0xff] %v225_v31 }
  0xd1   :  { %v307_v32 = vpop.f32.mrf.mxu3 }
  0xd2   :  { %v308_v34 = vadd.f32 %v541_v20, %v307_v32 }
  0xd3   :  { %v297_v33 = vpop.f32.mrf.mxu2  ;;  %v154_v36 = vpop.f32.mrf.mxu0 }
  0xd4   :  { %v298_v35 = vadd.f32 %v541_v20, %v297_v33  ;;  %328 = vst [vmem:[%s736_s9 + $0x68] sm:$0xff] %v308_v34  ;;  %v155_v37 = vadd.f32 %v523_v14, %v154_v36  ;;  %v227_v38 = vpop.f32.mrf.mxu1 }
  0xd5   :  { %v228_v39 = vadd.f32 %v528_v15, %v227_v38 }
  0xd6   :  { %324 = vst [vmem:[%s736_s9 + $0x48] sm:$0xff] %v298_v35 }
  0xd7   :  { %179 = vst [vmem:[%s734_s7 + $0x50] sm:$0xff] %v155_v37 }
  0xd8   :  { %252 = vst [vmem:[%s735_s8 + $0x50] sm:$0xff] %v228_v39 }
  0xd9   :  { %v310_v40 = vpop.f32.mrf.mxu3 }
  0xda   :  { %v311_v42 = vadd.f32 %v541_v20, %v310_v40 }
  0xdb   :  { %v300_v41 = vpop.f32.mrf.mxu2  ;;  %v156_v44 = vpop.f32.mrf.mxu0 }
  0xdc   :  { %v301_v43 = vadd.f32 %v541_v20, %v300_v41  ;;  %329 = vst [vmem:[%s736_s9 + $0x70] sm:$0xff] %v311_v42  ;;  %v157_v45 = vadd.f32 %v523_v14, %v156_v44  ;;  %v229_v46 = vpop.f32.mrf.mxu1 }
  0xdd   :  { %v230_v47 = vadd.f32 %v528_v15, %v229_v46 }
  0xde   :  { %325 = vst [vmem:[%s736_s9 + $0x50] sm:$0xff] %v301_v43 }
  0xdf   :  { %180 = vst [vmem:[%s734_s7 + $0x58] sm:$0xff] %v157_v45 }
  0xe0   :  { %253 = vst [vmem:[%s735_s8 + $0x58] sm:$0xff] %v230_v47 }
  0xe1   :  { %v312_v48 = vpop.f32.mrf.mxu3 }
  0xe2   :  { %v313_v50 = vadd.f32 %v541_v20, %v312_v48 }
  0xe3   :  { %v302_v49 = vpop.f32.mrf.mxu2 }
  0xe4   :  { %v303_v14 = vadd.f32 %v541_v20, %v302_v49  ;;  %330 = vst [vmem:[%s736_s9 + $0x78] sm:$0xff] %v313_v50 }
  0xe6   :  { %326 = vst [vmem:[%s736_s9 + $0x58] sm:$0xff] %v303_v14 }

// kernel: dgla_classifier_forward.3
= control target key start
LH: loop header
LB: loop body
LE: loop exit
PB: predicated region body
PF: predicated region fallthrough
CT: control target
= control target key end

     0   :  { %vm136_vm0 = vcmask 130048   ;;  %v5697_v2 = vmov 0.0   ;;  %s5685_s0 = inlined_call_operand.vmem [shape: f32[8,16,128], index: 0, kind: input, shape index: {}]   ;;  %s5686_s1 = inlined_call_operand.vmem [shape: f32[8,16,128], index: 1, kind: input, shape index: {}]   ;;  %s5687_s2 = inlined_call_operand.vmem [shape: f32[8,16,128], index: 2, kind: input, shape index: {}]   ;;  %s5688_s3 = inlined_call_operand.vmem [shape: f32[16,16], index: 3, kind: input, shape index: {}]   ;;  %s5689_s4 = inlined_call_operand.vmem [shape: f32[256,128], index: 4, kind: input, shape index: {}]   ;;  %s5690_s5 = inlined_call_operand.vmem [shape: f32[256,128], index: 5, kind: input, shape index: {}]   ;;  %s5691_s6 = inlined_call_operand.vmem [shape: f32[256,128], index: 6, kind: input, shape index: {}]   ;;  %s5692_s7 = inlined_call_operand.vmem [shape: f32[2,16], index: 7, kind: input, shape index: {}]   ;;  %s5693_s8 = inlined_call_operand.vmem [shape: f32[128,2], index: 8, kind: input, shape index: {}]   ;;  %s5694_s9 = inlined_call_operand.vmem [shape: f32[1,2], index: 9, kind: input, shape index: {}]   ;;  %s5695_s10 = inlined_call_operand.vmem [shape: f32[16,128], index: 10, kind: output, shape index: {0}]   ;;  %s5696_s11 = inlined_call_operand.hbm [shape: f32[2,2], index: 11, kind: output, shape index: {1}]  }
   0x1   :  { %v3083_v0 = vld [vmem:[%s5688_s3] sm:$0xff]  ;;  %v3088_v1 = vld [vmem:[%s5690_s5 + $0x78] sm:$0xff]  ;;  %158 = vmatpush.msra.mxu0 %v5697_v2  ;;  %v3095_v3 = vld [vmem:[%s5690_s5 + $0x70] sm:$0xff] }
   0x2   :  { %256 = vmatpush.msra.mxu3 %v3088_v1  ;;  %v3100_v4 = vld [vmem:[%s5689_s4 + $0xf8] sm:$0xff]  ;;  %2524 = vmatmul.msk.f32.vlgmr.msra.gmra.mxu0 %vm136_vm0, %v3083_v0  ;;  %v3107_v5 = vld [vmem:[%s5690_s5 + $0x68] sm:$0xff]  ;;  %v3118_v7 = vld [vmem:[%s5689_s4 + $0xf0] sm:$0xff] }
   0x3   :  { %5878 = vst [vmem:[#allocation5_spill] sm:$0xff] %v3100_v4  ;;  %191 = vmatpush.msra.mxu2 %v3100_v4  ;;  %v3113_v6 = vld [vmem:[%s5690_s5 + $0xf8] sm:$0xff]  ;;  %v3125_v8 = vld [vmem:[%s5690_s5 + $0xf0] sm:$0xff]  ;;  %v3130_v9 = vld [vmem:[%s5689_s4 + $0xe8] sm:$0xff] }
   0x4   :  { %5879 = vst [vmem:[#allocation6_spill] sm:$0xff] %v3118_v7  ;;  %257 = vmatpush.msra.mxu3 %v3095_v3  ;;  %279 = vmatpush.msrb.mxu0 %v3113_v6  ;;  %v3135_v10 = vld [vmem:[%s5690_s5 + $0x60] sm:$0xff]  ;;  %v3141_v11 = vld [vmem:[%s5690_s5 + $0xe8] sm:$0xff]  ;;  %v3146_v12 = vld [vmem:[%s5689_s4 + $0x78] sm:$0xff] }
   0x5   :  { %5880 = vst [vmem:[#allocation7_spill] sm:$0xff] %v3130_v9  ;;  %192 = vmatpush.msra.mxu2 %v3118_v7  ;;  %v3153_v13 = vld [vmem:[%s5689_s4 + $0xe0] sm:$0xff]  ;;  %v3158_v14 = vld [vmem:[%s5690_s5 + $0x58] sm:$0xff]  ;;  %168 = vmatpush.msra.mxu1 %v3146_v12  ;;  %v3170_v16 = vld [vmem:[%s5689_s4 + $0x70] sm:$0xff] }
   0x6   :  { %258 = vmatpush.msra.mxu3 %v3107_v5  ;;  %280 = vmatpush.msrb.mxu0 %v3125_v8  ;;  %5881 = vst [vmem:[#allocation8_spill] sm:$0xff] %v3153_v13  ;;  %v3165_v15 = vld [vmem:[%s5690_s5 + $0xe0] sm:$0xff]  ;;  %v3175_v17 = vld [vmem:[%s5688_s3 + $0x8] sm:$0xff]  ;;  %v3182_v18 = vld [vmem:[%s5689_s4 + $0xd8] sm:$0xff] }
   0x7   :  { %193 = vmatpush.msra.mxu2 %v3130_v9  ;;  %5882 = vst [vmem:[#allocation9_spill] sm:$0xff] %v3182_v18  ;;  %v3187_v19 = vld [vmem:[%s5690_s5 + $0x50] sm:$0xff]  ;;  %169 = vmatpush.msra.mxu1 %v3170_v16  ;;  %v3194_v20 = vld [vmem:[%s5690_s5 + $0xd8] sm:$0xff]  ;;  %v3201_v21 = vld [vmem:[%s5689_s4 + $0x68] sm:$0xff] }
   0x8   :  { %259 = vmatpush.msra.mxu3 %v3135_v10  ;;  %281 = vmatpush.msrb.mxu0 %v3141_v11  ;;  %v3206_v22 = vld [vmem:[%s5689_s4 + $0xd0] sm:$0xff]  ;;  %v3213_v23 = vld [vmem:[%s5690_s5 + $0x48] sm:$0xff]  ;;  %v3226_v25 = vld [vmem:[%s5689_s4 + $0x60] sm:$0xff] }
   0x9   :  { %194 = vmatpush.msra.mxu2 %v3153_v13  ;;  %5883 = vst [vmem:[#allocation10_spill] sm:$0xff] %v3206_v22  ;;  %v3219_v24 = vld [vmem:[%s5690_s5 + $0xd0] sm:$0xff]  ;;  %v3231_v26 = vld [vmem:[%s5689_s4 + $0xc8] sm:$0xff]  ;;  %v3236_v27 = vld [vmem:[%s5690_s5 + $0x40] sm:$0xff]  ;;  %170 = vmatpush.msra.mxu1 %v3201_v21 }
   0xa   :  { %260 = vmatpush.msra.mxu3 %v3158_v14  ;;  %282 = vmatpush.msrb.mxu0 %v3165_v15  ;;  %5884 = vst [vmem:[#allocation11_spill] sm:$0xff] %v3231_v26  ;;  %v3243_v28 = vld [vmem:[%s5690_s5 + $0xc8] sm:$0xff]  ;;  %v3250_v29 = vld [vmem:[%s5689_s4 + $0x58] sm:$0xff]  ;;  %v3255_v30 = vld [vmem:[%s5689_s4 + $0xc0] sm:$0xff] }
   0xb   :  { %2525 = vmatmul.msk.f32.gmra.mxu0 %vm136_vm0, %v3175_v17  ;;  %195 = vmatpush.msra.mxu2 %v3182_v18  ;;  %5885 = vst [vmem:[#allocation12_spill] sm:$0xff] %v3250_v29  ;;  %v3260_v31 = vld [vmem:[%s5690_s5 + $0x38] sm:$0xff]  ;;  %v3267_v32 = vld [vmem:[%s5690_s5 + $0xc0] sm:$0xff]  ;;  %v3274_v33 = vld [vmem:[%s5689_s4 + $0x50] sm:$0xff] }
   0xc   :  { %261 = vmatpush.msra.mxu3 %v3187_v19  ;;  %283 = vmatpush.msrb.mxu0 %v3194_v20  ;;  %5886 = vst [vmem:[#allocation13_spill] sm:$0xff] %v3255_v30  ;;  %v3279_v34 = vld [vmem:[%s5689_s4 + $0xb8] sm:$0xff]  ;;  %v3284_v35 = vld [vmem:[%s5690_s5 + $0x30] sm:$0xff]  ;;  %v3298_v37 = vld [vmem:[%s5689_s4 + $0x48] sm:$0xff] }
   0xd   :  { %196 = vmatpush.msra.mxu2 %v3206_v22  ;;  %171 = vmatpush.msra.mxu1 %v3226_v25  ;;  %5887 = vst [vmem:[#allocation14_spill] sm:$0xff] %v3274_v33  ;;  %v3291_v36 = vld [vmem:[%s5690_s5 + $0xb8] sm:$0xff]  ;;  %v3303_v38 = vld [vmem:[%s5689_s4 + $0xb0] sm:$0xff]  ;;  %v3308_v39 = vld [vmem:[%s5690_s5 + $0x28] sm:$0xff] }
   0xe   :  { %262 = vmatpush.msra.mxu3 %v3213_v23  ;;  %284 = vmatpush.msrb.mxu0 %v3219_v24  ;;  %5888 = vst [vmem:[#allocation15_spill] sm:$0xff] %v3279_v34  ;;  %v3315_v40 = vld [vmem:[%s5690_s5 + $0xb0] sm:$0xff]  ;;  %v3321_v41 = vld [vmem:[%s5690_s5 + $0x20] sm:$0xff]  ;;  %v3332_v43 = vld [vmem:[%s5689_s4 + $0xa8] sm:$0xff] }
   0xf   :  { %197 = vmatpush.msra.mxu2 %v3231_v26  ;;  %172 = vmatpush.msra.mxu1 %v3250_v29  ;;  %5889 = vst [vmem:[#allocation16_spill] sm:$0xff] %v3298_v37  ;;  %v3327_v42 = vld [vmem:[%s5689_s4 + $0x40] sm:$0xff]  ;;  %v3339_v44 = vld [vmem:[%s5690_s5 + $0xa8] sm:$0xff] }
  0x10   :  { %263 = vmatpush.msra.mxu3 %v3236_v27  ;;  %285 = vmatpush.msrb.mxu0 %v3243_v28  ;;  %5890 = vst [vmem:[#allocation17_spill] sm:$0xff] %v3303_v38 }
  0x11   :  { %198 = vmatpush.msra.mxu2 %v3255_v30  ;;  %173 = vmatpush.msra.mxu1 %v3274_v33  ;;  %5891 = vst [vmem:[#allocation18_spill] sm:$0xff] %v3327_v42 }
  0x12   :  { %264 = vmatpush.msra.mxu3 %v3260_v31  ;;  %286 = vmatpush.msrb.mxu0 %v3267_v32  ;;  %5892 = vst [vmem:[#allocation19_spill] sm:$0xff] %v3332_v43 }
  0x13   :  { %199 = vmatpush.msra.mxu2 %v3279_v34  ;;  %174 = vmatpush.msra.mxu1 %v3298_v37  ;;  %5893 = vst [vmem:[#allocation20_spill] sm:$0xff] %v3339_v44 }
  0x14   :  { %265 = vmatpush.msra.mxu3 %v3284_v35  ;;  %287 = vmatpush.msrb.mxu0 %v3291_v36 }
  0x15   :  { %200 = vmatpush.msra.mxu2 %v3303_v38 }
  0x16   :  { %17 = vsyncpa [#allocation3], 0  ;;  %266 = vmatpush.msra.mxu3 %v3308_v39  ;;  %288 = vmatpush.msrb.mxu0 %v3315_v40  ;;  %v3346_v45 = vld [vmem:[%s5689_s4 + $0x38] sm:$0xff]  ;;  %v3351_v46 = vld [vmem:[%s5689_s4 + $0xa0] sm:$0xff] }
  0x17   :  { %5894 = vst [vmem:[#allocation21_spill] sm:$0xff] %v3346_v45  ;;  %v3356_v47 = vld [vmem:[%s5690_s5 + $0x18] sm:$0xff]  ;;  %175 = vmatpush.msra.mxu1 %v3327_v42  ;;  %201 = vmatpush.msra.mxu2 %v3332_v43  ;;  %v3363_v48 = vld [vmem:[%s5690_s5 + $0xa0] sm:$0xff]  ;;  %v3370_v49 = vld [vmem:[%s5689_s4 + $0x30] sm:$0xff] }
  0x18   :  { %5895 = vst [vmem:[#allocation22_spill] sm:$0xff] %v3351_v46  ;;  %267 = vmatpush.msra.mxu3 %v3321_v41  ;;  %289 = vmatpush.msrb.mxu0 %v3339_v44  ;;  %v3375_v50 = vld [vmem:[%s5689_s4 + $0x98] sm:$0xff]  ;;  %v3380_v51 = vld [vmem:[%s5690_s5 + $0x10] sm:$0xff]  ;;  %v3394_v53 = vld [vmem:[%s5689_s4 + $0x28] sm:$0xff] }
  0x19   :  { %5896 = vst [vmem:[#allocation23_spill] sm:$0xff] %v3363_v48  ;;  %176 = vmatpush.msra.mxu1 %v3346_v45  ;;  %202 = vmatpush.msra.mxu2 %v3351_v46  ;;  %v3387_v52 = vld [vmem:[%s5690_s5 + $0x98] sm:$0xff]  ;;  %v3399_v54 = vld [vmem:[%s5689_s4 + $0x90] sm:$0xff]  ;;  %v3404_v55 = vld [vmem:[%s5690_s5 + $0x8] sm:$0xff] }
  0x1a   :  { %5897 = vst [vmem:[#allocation24_spill] sm:$0xff] %v3370_v49  ;;  %268 = vmatpush.msra.mxu3 %v3356_v47  ;;  %290 = vmatpush.msrb.mxu0 %v3363_v48  ;;  %v3411_v56 = vld [vmem:[%s5690_s5 + $0x90] sm:$0xff]  ;;  %v3418_v57 = vld [vmem:[%s5689_s4 + $0x20] sm:$0xff]  ;;  %v3423_v58 = vld [vmem:[%s5689_s4 + $0x88] sm:$0xff] }
  0x1b   :  { %5898 = vst [vmem:[#allocation25_spill] sm:$0xff] %v3375_v50  ;;  %177 = vmatpush.msra.mxu1 %v3370_v49  ;;  %203 = vmatpush.msra.mxu2 %v3375_v50  ;;  %v3428_v59 = vld [vmem:[%s5690_s5] sm:$0xff]  ;;  %v3435_v60 = vld [vmem:[%s5690_s5 + $0x88] sm:$0xff]  ;;  %v3448_v61 = vld [vmem:[%s5689_s4 + $0x18] sm:$0xff] }
  0x1c   :  { %5899 = vst [vmem:[#allocation26_spill] sm:$0xff] %v3387_v52  ;;  %269 = vmatpush.msra.mxu3 %v3380_v51  ;;  %291 = vmatpush.msrb.mxu0 %v3387_v52  ;;  %v3453_v62 = vld [vmem:[%s5689_s4 + $0x80] sm:$0xff] }
  0x1d   :  { %5900 = vst [vmem:[#allocation27_spill] sm:$0xff] %v3394_v53  ;;  %178 = vmatpush.msra.mxu1 %v3394_v53  ;;  %204 = vmatpush.msra.mxu2 %v3399_v54  ;;  %v3458_v63 = vld [vmem:[%s5690_s5 + $0x80] sm:$0xff] }
  0x1e   :  { %5901 = vst [vmem:[#allocation28_spill] sm:$0xff] %v3399_v54  ;;  %270 = vmatpush.msra.mxu3 %v3404_v55  ;;  %292 = vmatpush.msrb.mxu0 %v3411_v56  ;;  %v3477_v54 = vld [vmem:[%s5689_s4] sm:$0xff] }
  0x1f   :  { %5902 = vst [vmem:[#allocation29_spill] sm:$0xff] %v3411_v56  ;;  %179 = vmatpush.msra.mxu1 %v3418_v57  ;;  %205 = vmatpush.msra.mxu2 %v3423_v58  ;;  %v254_v43 = vld [vmem:[%s5686_s1] sm:$0xff] }
  0x20   :  { %5903 = vst [vmem:[#allocation30_spill] sm:$0xff] %v3418_v57  ;;  %271 = vmatpush.msra.mxu3 %v3428_v59  ;;  %293 = vmatpush.msrb.mxu0 %v3435_v60 }
  0x21   :  { %5904 = vst [vmem:[#allocation31_spill] sm:$0xff] %v3423_v58  ;;  %272 = vmatmul.f32.vlgmr.msra.gmra.mxu3 %v5697_v2  ;;  %180 = vmatpush.msra.mxu1 %v3448_v61  ;;  %v3471_v58 = vld [vmem:[%s5689_s4 + $0x8] sm:$0xff] }
  0x22   :  { %5905 = vst [vmem:[#allocation32_spill] sm:$0xff] %v3435_v60  ;;  %206 = vmatpush.msra.mxu2 %v3453_v62  ;;  %294 = vmatpush.msrb.mxu0 %v3458_v63 }
  0x23   :  { %5906 = vst [vmem:[#allocation33_spill] sm:$0xff] %v3448_v61 }
  0x24   :  { %5907 = vst [vmem:[#allocation34_spill] sm:$0xff] %v3453_v62  ;;  %v5912_v62 = vmov 0.0  }
  0x25   :  { %5908 = vst [vmem:[#allocation35_spill] sm:$0xff] %v3458_v63 }
  0x26   :  { %5910 = vst [vmem:[#allocation37_spill] sm:$0xff] %v3471_v58 }
  0x27   :  { %5911 = vst [vmem:[#allocation38_spill] sm:$0xff] %v3477_v54 }
  0x29   :  { %275 = vmatmul.f32.gmra.mxu3 %v5697_v2  ;;  %v3466_v2 = vld [vmem:[%s5689_s4 + $0x10] sm:$0xff] }
  0x2a   :  { %5909 = vst [vmem:[#allocation36_spill] sm:$0xff] %v3466_v2  ;;  %181 = vmatpush.msra.mxu1 %v3466_v2 }
  0x2c   :  { %182 = vmatpush.msra.mxu1 %v3471_v58 }
  0x2e   :  { %183 = vmatpush.msra.mxu1 %v3477_v54 }
  0x2f   :  { %184 = vmatmul.f32.vlgmr.msra.gmra.mxu1 %v5912_v62 }
  0x30   :  { %453 = vmatpush.msrb.mxu1 %v3146_v12 }
  0x32   :  { %454 = vmatpush.msrb.mxu1 %v3170_v16 }
  0x34   :  { %455 = vmatpush.msrb.mxu1 %v3201_v21 }
  0x36   :  { %456 = vmatpush.msrb.mxu1 %v3226_v25 }
  0x37   :  { %187 = vmatmul.f32.gmra.mxu1 %v5912_v62 }
  0x38   :  { %457 = vmatpush.msrb.mxu1 %v3250_v29 }
  0x3a   :  { %458 = vmatpush.msrb.mxu1 %v3274_v33 }
  0x3c   :  { %459 = vmatpush.msrb.mxu1 %v3298_v37 }
  0x3e   :  { %460 = vmatpush.msrb.mxu1 %v3327_v42 }
  0x40   :  { %461 = vmatpush.msrb.mxu1 %v3346_v45 }
  0x42   :  { %462 = vmatpush.msrb.mxu1 %v3370_v49 }
  0x44   :  { %463 = vmatpush.msrb.mxu1 %v3394_v53 }
  0x46   :  { %464 = vmatpush.msrb.mxu1 %v3418_v57 }
  0x48   :  { %465 = vmatpush.msrb.mxu1 %v3448_v61 }
  0x4a   :  { %466 = vmatpush.msrb.mxu1 %v3466_v2 }
  0x4c   :  { %467 = vmatpush.msrb.mxu1 %v3471_v58 }
  0x4e   :  { %468 = vmatpush.msrb.mxu1 %v3477_v54 }
  0x7f   :  { %v160_v50 = vpop.f32.mrf.mxu0 }
  0x80   :  { %207 = vmatmul.f32.vlgmr.msra.gmra.mxu2 %v160_v50  ;;  %295 = vmatmul.f32.vlgmr.msrb.gmra.mxu0 %v160_v50  ;;  %v255_v50 = vld [vmem:[%s5686_s1 + $0x8] sm:$0xff] }
  0x88   :  { %v163_v62 = vpop.f32.mrf.mxu0 }
  0x89   :  { %210 = vmatmul.f32.gmra.mxu2 %v163_v62  ;;  %298 = vmatmul.f32.gmra.mxu0 %v163_v62 }
  0xa4   :  { %v273_v46 = vpop.f32.mrf.mxu3 }
  0xac   :  { %v276_v22 = vpop.f32.mrf.mxu3 }
  0xfd   :  { %v296_v38 = vpop.f32.mrf.mxu0 }
  0xfe   :  { %v297_v34 = vadd.f32 %v296_v38, %v273_v46 }
 0x100   :  { %v302_v30 = vadd.f32 %v297_v34, %v254_v43 }
 0x102   :  { %v2528_v26 = vmul.f32 -1.442695, %v302_v30 }
 0x104   :  { %2634 = vpow2.f32 %v2528_v26 }
 0x106   :  { %v299_v18 = vpop.f32.mrf.mxu0 }
 0x107   :  { %v300_v13 = vadd.f32 %v299_v18, %v276_v22 }
 0x109   :  { %v303_v9 = vadd.f32 %v300_v13, %v255_v50 }
 0x10a   :  { %v2635_v7 = vpop.eup %2634 }
 0x10b   :  { %v2529_v62 = vmul.f32 -1.442695, %v303_v9  ;;  %v310_v4 = vadd.f32 1.0, %v2635_v7 }
 0x10d   :  { %2636 = vpow2.f32 %v2529_v62  ;;  %vm317_vm2 = vweird.f32 %v310_v4  ;;  %v323_v13 = vand.u32 2147483648, %v310_v4  ;;  %v321_v9 = vand.u32 2147483647, %v310_v4 }
 0x10e   :  { %2638 = vrcp.f32 %v310_v4 }
 0x10f   :  { %v324_v62 = vor.u32 1.1754944e-38, %v323_v13  ;;  %vm322_vm8 = vcmp.eq.f32.partialorder %v321_v9, 8.507059e+37  ;;  %v3549_v13 = vld [vmem:[%s5691_s6 + $0xf8] sm:$0xff]  ;;  %v3566_v9 = vld [vmem:[%s5691_s6 + $0xe8] sm:$0xff] }
 0x110   :  { %5913 = vst [vmem:[#allocation39_spill] sm:$0xff] %v3549_v13  ;;  %392 = vmatpush.msrb.mxu3 %v3549_v13  ;;  %v3645_v13 = vld [vmem:[%s5691_s6 + $0x10] sm:$0xff] }
 0x111   :  { %5915 = vst [vmem:[#allocation41_spill] sm:$0xff] %v3566_v9 }
 0x112   :  { %5924 = vst [vmem:[#allocation50_spill] sm:$0xff] %v3645_v13 }
 0x113   :  { %v2637_v54 = vpop.eup %2636 }
 0x114   :  { %v2639_v58 = vpop.eup %2638  ;;  %v311_v2 = vadd.f32 1.0, %v2637_v54 }
 0x115   :  { %v313_v38 = vmul.f32 %v2639_v58, %v310_v4  ;;  %vm318_vm1 = vweird.f32 %v2639_v58  ;;  %v3511_v4 = vld [vmem:[%s5691_s6 + $0x78] sm:$0xff] }
 0x116   :  { %2640 = vrcp.f32 %v311_v2  ;;  %v338_v57 = vand.u32 2147483648, %v311_v2  ;;  %v336_v7 = vand.u32 2147483647, %v311_v2  ;;  %vm319_vm4 = vmor %vm317_vm2, %vm318_vm1  ;;  %vm332_vm5 = vweird.f32 %v311_v2 }
 0x117   :  { %v314_v30 = vsub.f32 1.0, %v313_v38 }
 0x118   :  { %v339_v50 = vor.u32 1.1754944e-38, %v338_v57  ;;  %vm337_vm7 = vcmp.eq.f32.partialorder %v336_v7, 8.507059e+37  ;;  %v3524_v57 = vld [vmem:[%s5691_s6 + $0x68] sm:$0xff] }
 0x119   :  { %v315_v34 = vmul.f32 %v2639_v58, %v314_v30  ;;  %v3561_v7 = vld [vmem:[%s5691_s6 + $0x48] sm:$0xff] }
 0x11b   :  { %v316_v61 = vadd.f32 %v2639_v58, %v315_v34 }
 0x11c   :  { %v2641_v26 = vpop.eup %2640 }
 0x11d   :  { %v328_v43 = vmul.f32 %v2641_v26, %v311_v2  ;;  %vm333_vm3 = vweird.f32 %v2641_v26  ;;  %v320_v54 = vsel %vm319_vm4, %v2639_v58, %v316_v61  ;;  %v3518_v2 = vld [vmem:[%s5691_s6 + $0x70] sm:$0xff]  ;;  %v3530_v58 = vld [vmem:[%s5691_s6 + $0x60] sm:$0xff]  ;;  %v3536_v61 = vld [vmem:[%s5691_s6 + $0x58] sm:$0xff] }
 0x11e   :  { %vm334_vm6 = vmor %vm332_vm5, %vm333_vm3  ;;  %v325_v34 = vsel %vm322_vm8, %v324_v62, %v320_v54  ;;  %v3578_v54 = vld [vmem:[%s5691_s6 + $0xe0] sm:$0xff]  ;;  %v3590_v62 = vld [vmem:[%s5691_s6 + $0xd8] sm:$0xff] }
 0x11f   :  { %v329_v46 = vsub.f32 1.0, %v328_v43  ;;  %5916 = vst [vmem:[#allocation42_spill] sm:$0xff] %v3578_v54 }
 0x120   :  { %5917 = vst [vmem:[#allocation43_spill] sm:$0xff] %v3590_v62 }
 0x121   :  { %v330_v18 = vmul.f32 %v2641_v26, %v329_v46  ;;  %v342_v46 = vmul.f32 0.0, %v325_v34  ;;  %v3609_v34 = vld [vmem:[%s5691_s6 + $0x28] sm:$0xff] }
 0x123   :  { %v331_v22 = vadd.f32 %v2641_v26, %v330_v18  ;;  %v3554_v18 = vld [vmem:[%s5691_s6 + $0xf0] sm:$0xff] }
 0x124   :  { %5914 = vst [vmem:[#allocation40_spill] sm:$0xff] %v3554_v18  ;;  %393 = vmatpush.msrb.mxu3 %v3554_v18  ;;  %v3633_v18 = vld [vmem:[%s5691_s6 + $0x18] sm:$0xff] }
 0x125   :  { %v335_v38 = vsel %vm334_vm6, %v2641_v26, %v331_v22  ;;  %v3544_v26 = vld [vmem:[%s5691_s6 + $0x50] sm:$0xff]  ;;  %v3573_v22 = vld [vmem:[%s5691_s6 + $0x40] sm:$0xff]  ;;  %5922 = vst [vmem:[#allocation48_spill] sm:$0xff] %v3633_v18 }
 0x126   :  { %v340_v30 = vsel %vm337_vm7, %v339_v50, %v335_v38  ;;  %394 = vmatpush.msrb.mxu3 %v3566_v9  ;;  %v3585_v50 = vld [vmem:[%s5691_s6 + $0x38] sm:$0xff]  ;;  %v3597_v38 = vld [vmem:[%s5691_s6 + $0x30] sm:$0xff]  ;;  %v3621_v9 = vld [vmem:[%s5691_s6 + $0x20] sm:$0xff] }
 0x127   :  { %v3505_v43 = vmul.f32 0.0, %v340_v30  ;;  %v3602_v30 = vld [vmem:[%s5691_s6 + $0xd0] sm:$0xff]  ;;  %5920 = vst [vmem:[#allocation46_spill] sm:$0xff] %v3621_v9 }
 0x128   :  { %395 = vmatpush.msrb.mxu3 %v3578_v54  ;;  %5918 = vst [vmem:[#allocation44_spill] sm:$0xff] %v3602_v30  ;;  %v3614_v54 = vld [vmem:[%s5691_s6 + $0xc8] sm:$0xff] }
 0x129   :  { %358 = vmatpush.msrb.mxu2 %v3505_v43  ;;  %5919 = vst [vmem:[#allocation45_spill] sm:$0xff] %v3614_v54 }
 0x12a   :  { %396 = vmatpush.msrb.mxu3 %v3590_v62  ;;  %v3626_v62 = vld [vmem:[%s5691_s6 + $0xc0] sm:$0xff] }
 0x12b   :  { %359 = vmatpush.msrb.mxu2 %v342_v46  ;;  %5921 = vst [vmem:[#allocation47_spill] sm:$0xff] %v3626_v62 }
 0x12c   :  { %2530 = vmatmul.msk.f32.vlgmr.msrb.gmra.mxu2 %vm136_vm0, %v3083_v0  ;;  %397 = vmatpush.msrb.mxu3 %v3602_v30  ;;  %v3638_v30 = vld [vmem:[%s5691_s6 + $0xb8] sm:$0xff] }
 0x12d   :  { %369 = vmatpush.msra.mxu2 %v3511_v4  ;;  %5923 = vst [vmem:[#allocation49_spill] sm:$0xff] %v3638_v30 }
 0x12e   :  { %398 = vmatpush.msrb.mxu3 %v3614_v54  ;;  %v3650_v54 = vld [vmem:[%s5691_s6 + $0xb0] sm:$0xff] }
 0x12f   :  { %370 = vmatpush.msra.mxu2 %v3518_v2  ;;  %5925 = vst [vmem:[#allocation51_spill] sm:$0xff] %v3650_v54 }
 0x130   :  { %399 = vmatpush.msrb.mxu3 %v3626_v62  ;;  %v3662_v62 = vld [vmem:[%s5691_s6 + $0xa8] sm:$0xff] }
 0x131   :  { %371 = vmatpush.msra.mxu2 %v3524_v57  ;;  %5926 = vst [vmem:[#allocation52_spill] sm:$0xff] %v3662_v62 }
 0x132   :  { %400 = vmatpush.msrb.mxu3 %v3638_v30  ;;  %v3674_v30 = vld [vmem:[%s5691_s6 + $0xa0] sm:$0xff] }
 0x133   :  { %372 = vmatpush.msra.mxu2 %v3530_v58 }
 0x134   :  { %2531 = vmatmul.msk.f32.gmra.mxu2 %vm136_vm0, %v3175_v17  ;;  %401 = vmatpush.msrb.mxu3 %v3650_v54  ;;  %v3688_v54 = vld [vmem:[%s5691_s6 + $0x90] sm:$0xff] }
 0x135   :  { %373 = vmatpush.msra.mxu2 %v3536_v61 }
 0x136   :  { %402 = vmatpush.msrb.mxu3 %v3662_v62  ;;  %v3695_v62 = vld [vmem:[%s5691_s6 + $0x88] sm:$0xff] }
 0x137   :  { %374 = vmatpush.msra.mxu2 %v3544_v26 }
 0x138   :  { %403 = vmatpush.msrb.mxu3 %v3674_v30 }
 0x139   :  { %375 = vmatpush.msra.mxu2 %v3561_v7 }
 0x13b   :  { %376 = vmatpush.msra.mxu2 %v3573_v22 }
 0x13d   :  { %377 = vmatpush.msra.mxu2 %v3585_v50 }
 0x13f   :  { %378 = vmatpush.msra.mxu2 %v3597_v38 }
 0x141   :  { %379 = vmatpush.msra.mxu2 %v3609_v34 }
 0x143   :  { %380 = vmatpush.msra.mxu2 %v3621_v9  ;;  %v3657_v9 = vld [vmem:[%s5691_s6 + $0x8] sm:$0xff] }
 0x145   :  { %381 = vmatpush.msra.mxu2 %v3633_v18  ;;  %v3669_v18 = vld [vmem:[%s5691_s6] sm:$0xff] }
 0x147   :  { %382 = vmatpush.msra.mxu2 %v3645_v13  ;;  %v3681_v13 = vld [vmem:[%s5691_s6 + $0x98] sm:$0xff] }
 0x148   :  { %404 = vmatpush.msrb.mxu3 %v3681_v13 }
 0x149   :  { %383 = vmatpush.msra.mxu2 %v3657_v9 }
 0x14a   :  { %405 = vmatpush.msrb.mxu3 %v3688_v54 }
 0x14b   :  { %384 = vmatpush.msra.mxu2 %v3669_v18 }
 0x14c   :  { %385 = vmatmul.f32.vlgmr.msra.gmra.mxu2 %v342_v46  ;;  %406 = vmatpush.msrb.mxu3 %v3695_v62  ;;  %v208_v46 = vpop.f32.mrf.mxu2 }
 0x14d   :  { %542 = vmatpush.msrb.mxu2 %v3088_v1 }
 0x14f   :  { %543 = vmatpush.msrb.mxu2 %v3095_v3 }
 0x151   :  { %544 = vmatpush.msrb.mxu2 %v3107_v5 }
 0x153   :  { %545 = vmatpush.msrb.mxu2 %v3135_v10 }
 0x154   :  { %388 = vmatmul.f32.gmra.mxu2 %v3505_v43  ;;  %v3718_v43 = vld [vmem:[%s5691_s6 + $0x80] sm:$0xff] }
 0x155   :  { %546 = vmatpush.msrb.mxu2 %v3158_v14  ;;  %407 = vmatpush.msrb.mxu3 %v3718_v43 }
 0x157   :  { %547 = vmatpush.msrb.mxu2 %v3187_v19  ;;  %565 = vmatpush.msra.mxu3 %v3113_v6  ;;  %v211_v6 = vpop.f32.mrf.mxu2 }
 0x159   :  { %548 = vmatpush.msrb.mxu2 %v3213_v23  ;;  %566 = vmatpush.msra.mxu3 %v3125_v8 }
 0x15b   :  { %549 = vmatpush.msrb.mxu2 %v3236_v27  ;;  %567 = vmatpush.msra.mxu3 %v3141_v11 }
 0x15d   :  { %550 = vmatpush.msrb.mxu2 %v3260_v31  ;;  %568 = vmatpush.msra.mxu3 %v3165_v15  ;;  %v5928_v15 = vld [vmem:[#allocation33_spill] sm:$0xff] }
 0x15f   :  { %551 = vmatpush.msrb.mxu2 %v3284_v35  ;;  %569 = vmatpush.msra.mxu3 %v3194_v20 }
 0x161   :  { %552 = vmatpush.msrb.mxu2 %v3308_v39  ;;  %570 = vmatpush.msra.mxu3 %v3219_v24 }
 0x163   :  { %553 = vmatpush.msrb.mxu2 %v3321_v41  ;;  %571 = vmatpush.msra.mxu3 %v3243_v28 }
 0x165   :  { %554 = vmatpush.msrb.mxu2 %v3356_v47  ;;  %572 = vmatpush.msra.mxu3 %v3267_v32 }
 0x167   :  { %555 = vmatpush.msrb.mxu2 %v3380_v51  ;;  %573 = vmatpush.msra.mxu3 %v3291_v36 }
 0x169   :  { %556 = vmatpush.msrb.mxu2 %v3404_v55  ;;  %574 = vmatpush.msra.mxu3 %v3315_v40 }
 0x16b   :  { %557 = vmatpush.msrb.mxu2 %v3428_v59  ;;  %575 = vmatpush.msra.mxu3 %v3339_v44 }
 0x16d   :  { %576 = vmatpush.msra.mxu3 %v3363_v48 }
 0x16f   :  { %577 = vmatpush.msra.mxu3 %v3387_v52  ;;  %v368_v52 = vld [vmem:[%s5687_s2 + $0x8] sm:$0xff] }
 0x171   :  { %578 = vmatpush.msra.mxu3 %v3411_v56 }
 0x173   :  { %579 = vmatpush.msra.mxu3 %v3435_v60 }
 0x175   :  { %580 = vmatpush.msra.mxu3 %v3458_v63 }
 0x1af   :  { %v361_v8 = vpop.f32.mrf.mxu2 }
 0x1b0   :  { %408 = vmatmul.f32.vlgmr.msrb.gmra.mxu3 %v361_v8  ;;  %v185_v8 = vpop.f32.mrf.mxu1 }
 0x1b1   :  { %740 = vmatpush.msrb.mxu3 %v3146_v12  ;;  %v5927_v12 = vld [vmem:[#allocation30_spill] sm:$0xff] }
 0x1b3   :  { %741 = vmatpush.msrb.mxu3 %v3170_v16  ;;  %v5929_v16 = vld [vmem:[#allocation36_spill] sm:$0xff] }
 0x1b5   :  { %742 = vmatpush.msrb.mxu3 %v3201_v21  ;;  %v5930_v21 = vld [vmem:[#allocation37_spill] sm:$0xff] }
 0x1b7   :  { %v364_v11 = vpop.f32.mrf.mxu2  ;;  %743 = vmatpush.msrb.mxu3 %v3226_v25  ;;  %v5931_v25 = vld [vmem:[#allocation38_spill] sm:$0xff] }
 0x1b8   :  { %411 = vmatmul.f32.gmra.mxu3 %v364_v11  ;;  %v209_v11 = vadd.f32 %v208_v46, %v185_v8 }
 0x1b9   :  { %744 = vmatpush.msrb.mxu3 %v3250_v29 }
 0x1bb   :  { %745 = vmatpush.msrb.mxu3 %v3274_v33 }
 0x1bd   :  { %746 = vmatpush.msrb.mxu3 %v3298_v37 }
 0x1bf   :  { %747 = vmatpush.msrb.mxu3 %v3327_v42 }
 0x1c1   :  { %748 = vmatpush.msrb.mxu3 %v3346_v45  ;;  %v166_v45 = vld [vmem:[%s5685_s0] sm:$0xff] }
 0x1c2   :  { %v214_v42 = vadd.f32 %v209_v11, %v166_v45 }
 0x1c3   :  { %749 = vmatpush.msrb.mxu3 %v3370_v49  ;;  %v188_v49 = vpop.f32.mrf.mxu1 }
 0x1c4   :  { %v2526_v37 = vmul.f32 -1.442695, %v214_v42 }
 0x1c5   :  { %750 = vmatpush.msrb.mxu3 %v3394_v53  ;;  %v212_v53 = vadd.f32 %v211_v6, %v188_v49 }
 0x1c6   :  { %2642 = vpow2.f32 %v2526_v37  ;;  %v367_v37 = vld [vmem:[%s5687_s2] sm:$0xff] }
 0x1c7   :  { %751 = vmatpush.msrb.mxu3 %v5927_v12 }
 0x1c9   :  { %752 = vmatpush.msrb.mxu3 %v5928_v15  ;;  %v167_v15 = vld [vmem:[%s5685_s0 + $0x8] sm:$0xff] }
 0x1cb   :  { %753 = vmatpush.msrb.mxu3 %v5929_v16  ;;  %v215_v16 = vadd.f32 %v212_v53, %v167_v15 }
 0x1cd   :  { %754 = vmatpush.msrb.mxu3 %v5930_v21  ;;  %v2527_v12 = vmul.f32 -1.442695, %v215_v16  ;;  %v2643_v21 = vpop.eup %2642 }
 0x1cf   :  { %755 = vmatpush.msrb.mxu3 %v5931_v25  ;;  %2644 = vpow2.f32 %v2527_v12  ;;  %v222_v25 = vadd.f32 1.0, %v2643_v21  ;;  %v386_v6 = vpop.f32.mrf.mxu2 }
 0x1d1   :  { %2646 = vrcp.f32 %v222_v25  ;;  %v235_v12 = vand.u32 2147483648, %v222_v25  ;;  %vm229_vm10 = vweird.f32 %v222_v25  ;;  %v233_v16 = vand.u32 2147483647, %v222_v25 }
 0x1d3   :  { %v236_v56 = vor.u32 1.1754944e-38, %v235_v12  ;;  %vm234_vm12 = vcmp.eq.f32.partialorder %v233_v16, 8.507059e+37 }
 0x1d5   :  { %v2645_v46 = vpop.eup %2644 }
 0x1d6   :  { %v223_v8 = vadd.f32 1.0, %v2645_v46 }
 0x1d7   :  { %v2647_v33 = vpop.eup %2646 }
 0x1d8   :  { %2648 = vrcp.f32 %v223_v8  ;;  %v225_v29 = vmul.f32 %v2647_v33, %v222_v25  ;;  %vm230_vm9 = vweird.f32 %v2647_v33  ;;  %v250_v44 = vand.u32 2147483648, %v223_v8 }
 0x1d9   :  { %vm231_vm11 = vmor %vm229_vm10, %vm230_vm9  ;;  %vm244_vm14 = vweird.f32 %v223_v8 }
 0x1da   :  { %v226_v45 = vsub.f32 1.0, %v225_v29 }
 0x1dc   :  { %v227_v42 = vmul.f32 %v2647_v33, %v226_v45 }
 0x1de   :  { %v2649_v11 = vpop.eup %2648  ;;  %v228_v60 = vadd.f32 %v2647_v33, %v227_v42 }
 0x1df   :  { %v240_v49 = vmul.f32 %v2649_v11, %v223_v8  ;;  %vm245_vm13 = vweird.f32 %v2649_v11 }
 0x1e0   :  { %v232_v29 = vsel %vm231_vm11, %v2647_v33, %v228_v60  ;;  %vm246_vm15 = vmor %vm244_vm14, %vm245_vm13 }
 0x1e1   :  { %v241_v63 = vsub.f32 1.0, %v240_v49  ;;  %v237_v45 = vsel %vm234_vm12, %v236_v56, %v232_v29  ;;  %v389_v49 = vpop.f32.mrf.mxu2  ;;  %v251_v56 = vor.u32 1.1754944e-38, %v250_v44  ;;  %v5932_v44 = vld [vmem:[#allocation5_spill] sm:$0xff] }
 0x1e2   :  { %v421_v25 = vsub.f32 1.0, %v237_v45  ;;  %v419_v12 = vmul.f32 0.0, %v237_v45  ;;  %v5935_v45 = vld [vmem:[#allocation8_spill] sm:$0xff] }
 0x1e3   :  { %v242_v46 = vmul.f32 %v2649_v11, %v241_v63 }
 0x1e5   :  { %v243_v42 = vadd.f32 %v2649_v11, %v242_v46 }
 0x1e7   :  { %v247_v63 = vsel %vm246_vm15, %v2649_v11, %v243_v42  ;;  %v5934_v11 = vld [vmem:[#allocation7_spill] sm:$0xff]  ;;  %v5937_v42 = vld [vmem:[#allocation10_spill] sm:$0xff] }
 0x233   :  { %v409_v53 = vpop.f32.mrf.mxu3 }
 0x234   :  { %v410_v15 = vadd.f32 %v409_v53, %v386_v6  ;;  %v248_v53 = vand.u32 2147483647, %v223_v8 }
 0x236   :  { %v415_v21 = vadd.f32 %v410_v15, %v367_v37  ;;  %vm249_vm1 = vcmp.eq.f32.partialorder %v248_v53, 8.507059e+37  ;;  %v5941_v53 = vld [vmem:[#allocation17_spill] sm:$0xff] }
 0x237   :  { %v252_v16 = vsel %vm249_vm1, %v251_v56, %v247_v63  ;;  %v5945_v63 = vld [vmem:[#allocation28_spill] sm:$0xff]  ;;  %v5947_v56 = vld [vmem:[#allocation34_spill] sm:$0xff] }
 0x238   :  { %2650 = vtanh.f32 %v415_v21  ;;  %v420_v8 = vmul.f32 0.0, %v252_v16 }
 0x23b   :  { %v412_v48 = vpop.f32.mrf.mxu3 }
 0x23c   :  { %v413_v6 = vadd.f32 %v412_v48, %v389_v49  ;;  %v422_v48 = vsub.f32 1.0, %v252_v16  ;;  %v5936_v49 = vld [vmem:[#allocation9_spill] sm:$0xff]  ;;  %v5948_v16 = vld [vmem:[#allocation46_spill] sm:$0xff] }
 0x23e   :  { %v2651_v37 = vpop.eup %2650  ;;  %v416_v33 = vadd.f32 %v413_v6, %v368_v52  ;;  %v5933_v52 = vld [vmem:[#allocation6_spill] sm:$0xff]  ;;  %v5938_v6 = vld [vmem:[#allocation11_spill] sm:$0xff] }
 0x23f   :  { %v423_v60 = vmul.f32 %v2651_v37, %v421_v25  ;;  %v5939_v25 = vld [vmem:[#allocation13_spill] sm:$0xff]  ;;  %v5942_v37 = vld [vmem:[#allocation19_spill] sm:$0xff] }
 0x240   :  { %2652 = vtanh.f32 %v416_v33  ;;  %v5943_v33 = vld [vmem:[#allocation22_spill] sm:$0xff] }
 0x241   :  { %v3765_v15 = vadd.f32 %v423_v60, %v419_v12  ;;  %v5944_v60 = vld [vmem:[#allocation25_spill] sm:$0xff]  ;;  %v5946_v12 = vld [vmem:[#allocation31_spill] sm:$0xff] }
 0x243   :  { %469 = vmatmul.f32.vlgmr.msrb.gmra.mxu1 %v3765_v15  ;;  %558 = vmatmul.f32.vlgmr.msrb.gmra.mxu2 %v3765_v15 }
 0x246   :  { %v2653_v21 = vpop.eup %2652 }
 0x247   :  { %v424_v46 = vmul.f32 %v2653_v21, %v422_v48  ;;  %v5949_v48 = vld [vmem:[#allocation48_spill] sm:$0xff]  ;;  %v5950_v21 = vld [vmem:[#allocation50_spill] sm:$0xff] }
 0x249   :  { %v3769_v29 = vadd.f32 %v424_v46, %v420_v8 }
 0x24b   :  { %441 = vmatpush.msra.mxu0 %v3769_v29  ;;  %472 = vmatmul.f32.gmra.mxu1 %v3769_v29 }
 0x24c   :  { %561 = vmatmul.f32.gmra.mxu2 %v3769_v29 }
 0x24d   :  { %442 = vmatpush.msra.mxu0 %v3765_v15 }
 0x24e   :  { %2532 = vmatmul.msk.f32.vlgmr.msra.gmra.mxu0 %vm136_vm0, %v3083_v0  ;;  %v5940_v0 = vld [vmem:[#allocation15_spill] sm:$0xff] }
 0x24f   :  { %476 = vmatpush.msrb.mxu0 %v5932_v44 }
 0x251   :  { %477 = vmatpush.msrb.mxu0 %v5933_v52 }
 0x253   :  { %478 = vmatpush.msrb.mxu0 %v5934_v11 }
 0x255   :  { %479 = vmatpush.msrb.mxu0 %v5935_v45 }
 0x256   :  { %2533 = vmatmul.msk.f32.gmra.mxu0 %vm136_vm0, %v3175_v17 }
 0x257   :  { %480 = vmatpush.msrb.mxu0 %v5936_v49 }
 0x259   :  { %481 = vmatpush.msrb.mxu0 %v5937_v42 }
 0x25b   :  { %482 = vmatpush.msrb.mxu0 %v5938_v6 }
 0x25d   :  { %483 = vmatpush.msrb.mxu0 %v5939_v25 }
 0x25f   :  { %484 = vmatpush.msrb.mxu0 %v5940_v0 }
 0x261   :  { %485 = vmatpush.msrb.mxu0 %v5941_v53 }
 0x263   :  { %486 = vmatpush.msrb.mxu0 %v5942_v37 }
 0x265   :  { %487 = vmatpush.msrb.mxu0 %v5943_v33 }
 0x267   :  { %488 = vmatpush.msrb.mxu0 %v5944_v60 }
 0x269   :  { %489 = vmatpush.msrb.mxu0 %v5945_v63 }
 0x26b   :  { %490 = vmatpush.msrb.mxu0 %v5946_v12 }
 0x26d   :  { %491 = vmatpush.msrb.mxu0 %v5947_v56 }
 0x26f   :  { %656 = vmatpush.msra.mxu0 %v3511_v4 }
 0x271   :  { %657 = vmatpush.msra.mxu0 %v3518_v2 }
 0x273   :  { %658 = vmatpush.msra.mxu0 %v3524_v57 }
 0x275   :  { %659 = vmatpush.msra.mxu0 %v3530_v58 }
 0x277   :  { %660 = vmatpush.msra.mxu0 %v3536_v61 }
 0x279   :  { %661 = vmatpush.msra.mxu0 %v3544_v26 }
 0x27b   :  { %662 = vmatpush.msra.mxu0 %v3561_v7 }
 0x27d   :  { %663 = vmatpush.msra.mxu0 %v3573_v22 }
 0x27f   :  { %664 = vmatpush.msra.mxu0 %v3585_v50 }
 0x281   :  { %665 = vmatpush.msra.mxu0 %v3597_v38 }
 0x283   :  { %666 = vmatpush.msra.mxu0 %v3609_v34 }
 0x285   :  { %667 = vmatpush.msra.mxu0 %v5948_v16 }
 0x287   :  { %668 = vmatpush.msra.mxu0 %v5949_v48 }
 0x289   :  { %669 = vmatpush.msra.mxu0 %v5950_v21 }
 0x28b   :  { %670 = vmatpush.msra.mxu0 %v3657_v9 }
 0x28d   :  { %671 = vmatpush.msra.mxu0 %v3669_v18 }
 0x2cb   :  { %v444_v46 = vpop.f32.mrf.mxu0 }
 0x2cc   :  { %492 = vmatmul.f32.vlgmr.msrb.gmra.mxu0 %v444_v46  ;;  %581 = vmatmul.f32.vlgmr.msra.gmra.mxu3 %v444_v46 }
 0x2cd   :  { %829 = vmatpush.msrb.mxu0 %v3088_v1  ;;  %v559_v1 = vpop.f32.mrf.mxu2 }
 0x2cf   :  { %830 = vmatpush.msrb.mxu0 %v3095_v3  ;;  %v2538_v3 = vld [vmem:[%s5686_s1 + $0x10] sm:$0xff] }
 0x2d1   :  { %831 = vmatpush.msrb.mxu0 %v3107_v5 }
 0x2d3   :  { %v447_v8 = vpop.f32.mrf.mxu0  ;;  %832 = vmatpush.msrb.mxu0 %v3135_v10 }
 0x2d4   :  { %495 = vmatmul.f32.gmra.mxu0 %v447_v8  ;;  %584 = vmatmul.f32.gmra.mxu3 %v447_v8 }
 0x2d5   :  { %833 = vmatpush.msrb.mxu0 %v3158_v14 }
 0x2d7   :  { %834 = vmatpush.msrb.mxu0 %v3187_v19 }
 0x2d9   :  { %835 = vmatpush.msrb.mxu0 %v3213_v23  ;;  %v562_v23 = vpop.f32.mrf.mxu2 }
 0x2db   :  { %836 = vmatpush.msrb.mxu0 %v3236_v27  ;;  %v2539_v27 = vld [vmem:[%s5686_s1 + $0x18] sm:$0xff] }
 0x2dd   :  { %837 = vmatpush.msrb.mxu0 %v3260_v31 }
 0x2df   :  { %838 = vmatpush.msrb.mxu0 %v3284_v35 }
 0x2e1   :  { %839 = vmatpush.msrb.mxu0 %v3308_v39 }
 0x2e3   :  { %840 = vmatpush.msrb.mxu0 %v3321_v41 }
 0x2e5   :  { %841 = vmatpush.msrb.mxu0 %v3356_v47 }
 0x2e7   :  { %842 = vmatpush.msrb.mxu0 %v3380_v51 }
 0x2e9   :  { %843 = vmatpush.msrb.mxu0 %v3404_v55 }
 0x2eb   :  { %844 = vmatpush.msrb.mxu0 %v3428_v59 }
 0x34f   :  { %v582_v5 = vpop.f32.mrf.mxu3 }
 0x350   :  { %v583_v10 = vadd.f32 %v582_v5, %v559_v1 }
 0x352   :  { %v588_v14 = vadd.f32 %v2538_v3, %v583_v10 }
 0x354   :  { %v2540_v19 = vmul.f32 -1.442695, %v588_v14  ;;  %v3838_v14 = vld [vmem:[%s5688_s3] sm:$0xff] }
 0x356   :  { %2654 = vpow2.f32 %v2540_v19  ;;  %v5951_v19 = vld [vmem:[#allocation39_spill] sm:$0xff] }
 0x357   :  { %v585_v31 = vpop.f32.mrf.mxu3 }
 0x358   :  { %v586_v35 = vadd.f32 %v585_v31, %v562_v23  ;;  %v5952_v23 = vld [vmem:[#allocation40_spill] sm:$0xff]  ;;  %v5954_v31 = vld [vmem:[#allocation42_spill] sm:$0xff] }
 0x35a   :  { %v589_v39 = vadd.f32 %v2539_v27, %v586_v35  ;;  %v5953_v27 = vld [vmem:[#allocation41_spill] sm:$0xff]  ;;  %v5955_v35 = vld [vmem:[#allocation43_spill] sm:$0xff] }
 0x35c   :  { %v2655_v41 = vpop.eup %2654  ;;  %v2541_v47 = vmul.f32 -1.442695, %v589_v39  ;;  %v5956_v39 = vld [vmem:[#allocation44_spill] sm:$0xff] }
 0x35d   :  { %v596_v51 = vadd.f32 1.0, %v2655_v41  ;;  %v5957_v41 = vld [vmem:[#allocation45_spill] sm:$0xff] }
 0x35e   :  { %2656 = vpow2.f32 %v2541_v47  ;;  %v5958_v47 = vld [vmem:[#allocation47_spill] sm:$0xff] }
 0x35f   :  { %2658 = vrcp.f32 %v596_v51  ;;  %v609_v45 = vand.u32 2147483648, %v596_v51  ;;  %v607_v42 = vand.u32 2147483647, %v596_v51  ;;  %vm603_vm3 = vweird.f32 %v596_v51 }
 0x361   :  { %v610_v0 = vor.u32 1.1754944e-38, %v609_v45  ;;  %vm608_vm5 = vcmp.eq.f32.partialorder %v607_v42, 8.507059e+37  ;;  %v5965_v45 = vld [vmem:[#allocation20_spill] sm:$0xff]  ;;  %v5967_v42 = vld [vmem:[#allocation26_spill] sm:$0xff] }
 0x364   :  { %v2657_v55 = vpop.eup %2656 }
 0x365   :  { %v2659_v59 = vpop.eup %2658  ;;  %v597_v44 = vadd.f32 1.0, %v2657_v55  ;;  %v5960_v55 = vld [vmem:[#allocation51_spill] sm:$0xff] }
 0x366   :  { %v599_v52 = vmul.f32 %v2659_v59, %v596_v51  ;;  %vm604_vm2 = vweird.f32 %v2659_v59  ;;  %v5959_v51 = vld [vmem:[#allocation49_spill] sm:$0xff] }
 0x367   :  { %2660 = vrcp.f32 %v597_v44  ;;  %vm605_vm4 = vmor %vm603_vm3, %vm604_vm2  ;;  %v624_v12 = vand.u32 2147483648, %v597_v44  ;;  %v622_v46 = vand.u32 2147483647, %v597_v44  ;;  %vm618_vm7 = vweird.f32 %v597_v44 }
 0x368   :  { %v600_v11 = vsub.f32 1.0, %v599_v52  ;;  %v3875_v52 = vld [vmem:[%s5690_s5 + $0xe8] sm:$0xff] }
 0x369   :  { %v625_v1 = vor.u32 1.1754944e-38, %v624_v12  ;;  %vm623_vm9 = vcmp.eq.f32.partialorder %v622_v46, 8.507059e+37  ;;  %5963 = vst [vmem:[#allocation6_spill] sm:$0xff] %v3875_v52  ;;  %v5978_v12 = vld [vmem:[#allocation18_spill] sm:$0xff]  ;;  %v5980_v46 = vld [vmem:[#allocation24_spill] sm:$0xff] }
 0x36a   :  { %v601_v49 = vmul.f32 %v2659_v59, %v600_v11  ;;  %v3881_v11 = vld [vmem:[%s5690_s5 + $0xe0] sm:$0xff] }
 0x36b   :  { %5964 = vst [vmem:[#allocation7_spill] sm:$0xff] %v3881_v11 }
 0x36c   :  { %v602_v6 = vadd.f32 %v2659_v59, %v601_v49  ;;  %v5966_v49 = vld [vmem:[#allocation23_spill] sm:$0xff] }
 0x36d   :  { %v2661_v25 = vpop.eup %2660 }
 0x36e   :  { %v614_v53 = vmul.f32 %v2661_v25, %v597_v44  ;;  %v606_v37 = vsel %vm605_vm4, %v2659_v59, %v602_v6  ;;  %vm619_vm6 = vweird.f32 %v2661_v25  ;;  %v5961_v59 = vld [vmem:[#allocation52_spill] sm:$0xff]  ;;  %v3869_v44 = vld [vmem:[%s5690_s5 + $0xf0] sm:$0xff]  ;;  %v5968_v6 = vld [vmem:[#allocation29_spill] sm:$0xff] }
 0x36f   :  { %v611_v33 = vsel %vm608_vm5, %v610_v0, %v606_v37  ;;  %vm620_vm8 = vmor %vm618_vm7, %vm619_vm6  ;;  %5962 = vst [vmem:[#allocation5_spill] sm:$0xff] %v3869_v44  ;;  %v3917_v37 = vld [vmem:[%s5689_s4 + $0x60] sm:$0xff] }
 0x370   :  { %v628_v60 = vmul.f32 %v611_v33, %v3765_v15  ;;  %v615_v63 = vsub.f32 1.0, %v614_v53  ;;  %5974 = vst [vmem:[#allocation11_spill] sm:$0xff] %v3917_v37  ;;  %v5975_v33 = vld [vmem:[#allocation12_spill] sm:$0xff] }
 0x372   :  { %672 = vmatmul.f32.vlgmr.msra.gmra.mxu0 %v628_v60  ;;  %v616_v56 = vmul.f32 %v2661_v25, %v615_v63  ;;  %v5977_v63 = vld [vmem:[#allocation16_spill] sm:$0xff] }
 0x374   :  { %v617_v8 = vadd.f32 %v2661_v25, %v616_v56  ;;  %v5979_v56 = vld [vmem:[#allocation21_spill] sm:$0xff] }
 0x376   :  { %v621_v3 = vsel %vm620_vm8, %v2661_v25, %v617_v8  ;;  %v5969_v25 = vld [vmem:[#allocation32_spill] sm:$0xff]  ;;  %v5981_v8 = vld [vmem:[#allocation27_spill] sm:$0xff] }
 0x377   :  { %v626_v5 = vsel %vm623_vm9, %v625_v1, %v621_v3  ;;  %v5982_v1 = vld [vmem:[#allocation30_spill] sm:$0xff]  ;;  %v5983_v3 = vld [vmem:[#allocation33_spill] sm:$0xff] }
 0x378   :  { %v629_v10 = vmul.f32 %v626_v5, %v3769_v29  ;;  %v5984_v5 = vld [vmem:[#allocation36_spill] sm:$0xff] }
 0x37a   :  { %644 = vmatpush.msra.mxu1 %v629_v10  ;;  %675 = vmatmul.f32.gmra.mxu0 %v629_v10  ;;  %v5985_v10 = vld [vmem:[#allocation37_spill] sm:$0xff] }
 0x37c   :  { %645 = vmatpush.msra.mxu1 %v628_v60  ;;  %v5976_v60 = vld [vmem:[#allocation14_spill] sm:$0xff] }
 0x37d   :  { %2542 = vmatmul.msk.f32.vlgmr.msra.gmra.mxu1 %vm136_vm0, %v3838_v14 }
 0x37e   :  { %679 = vmatpush.msrb.mxu1 %v5951_v19  ;;  %v5986_v19 = vld [vmem:[#allocation38_spill] sm:$0xff] }
 0x380   :  { %680 = vmatpush.msrb.mxu1 %v5952_v23  ;;  %v493_v23 = vpop.f32.mrf.mxu0 }
 0x382   :  { %681 = vmatpush.msrb.mxu1 %v5953_v27 }
 0x384   :  { %682 = vmatpush.msrb.mxu1 %v5954_v31  ;;  %v2534_v31 = vld [vmem:[%s5685_s0 + $0x10] sm:$0xff] }
 0x385   :  { %2543 = vmatmul.msk.f32.gmra.mxu1 %vm136_vm0, %v3175_v17  ;;  %v3863_v17 = vld [vmem:[%s5690_s5 + $0xf8] sm:$0xff] }
 0x386   :  { %683 = vmatpush.msrb.mxu1 %v5955_v35 }
 0x388   :  { %684 = vmatpush.msrb.mxu1 %v5956_v39  ;;  %v496_v39 = vpop.f32.mrf.mxu0 }
 0x38a   :  { %685 = vmatpush.msrb.mxu1 %v5957_v41 }
 0x38c   :  { %686 = vmatpush.msrb.mxu1 %v5958_v47 }
 0x38e   :  { %687 = vmatpush.msrb.mxu1 %v5959_v51  ;;  %v2535_v51 = vld [vmem:[%s5685_s0 + $0x18] sm:$0xff] }
 0x390   :  { %688 = vmatpush.msrb.mxu1 %v5960_v55 }
 0x392   :  { %689 = vmatpush.msrb.mxu1 %v5961_v59 }
 0x394   :  { %690 = vmatpush.msrb.mxu1 %v3674_v30 }
 0x396   :  { %691 = vmatpush.msrb.mxu1 %v3681_v13 }
 0x398   :  { %692 = vmatpush.msrb.mxu1 %v3688_v54 }
 0x39a   :  { %693 = vmatpush.msrb.mxu1 %v3695_v62 }
 0x39c   :  { %694 = vmatpush.msrb.mxu1 %v3718_v43 }
 0x39e   :  { %852 = vmatpush.msra.mxu1 %v3863_v17 }
 0x3a0   :  { %853 = vmatpush.msra.mxu1 %v3869_v44 }
 0x3a2   :  { %854 = vmatpush.msra.mxu1 %v3875_v52 }
 0x3a4   :  { %855 = vmatpush.msra.mxu1 %v3881_v11 }
 0x3a6   :  { %856 = vmatpush.msra.mxu1 %v3194_v20  ;;  %v5970_v20 = vld [vmem:[#allocation35_spill] sm:$0xff] }
 0x3a8   :  { %857 = vmatpush.msra.mxu1 %v3219_v24  ;;  %v470_v24 = vpop.f32.mrf.mxu1 }
 0x3a9   :  { %v494_v27 = vadd.f32 %v493_v23, %v470_v24 }
 0x3aa   :  { %858 = vmatpush.msra.mxu1 %v3243_v28 }
 0x3ab   :  { %v499_v35 = vadd.f32 %v2534_v31, %v494_v27 }
 0x3ac   :  { %859 = vmatpush.msra.mxu1 %v3267_v32  ;;  %v3899_v32 = vld [vmem:[%s5689_s4 + $0x78] sm:$0xff] }
 0x3ad   :  { %5971 = vst [vmem:[#allocation8_spill] sm:$0xff] %v3899_v32  ;;  %v2536_v41 = vmul.f32 -1.442695, %v499_v35 }
 0x3ae   :  { %860 = vmatpush.msra.mxu1 %v3291_v36  ;;  %v3905_v36 = vld [vmem:[%s5689_s4 + $0x70] sm:$0xff] }
 0x3af   :  { %5972 = vst [vmem:[#allocation9_spill] sm:$0xff] %v3905_v36  ;;  %2662 = vpow2.f32 %v2536_v41 }
 0x3b0   :  { %861 = vmatpush.msra.mxu1 %v3315_v40  ;;  %v473_v28 = vpop.f32.mrf.mxu1  ;;  %v3911_v40 = vld [vmem:[%s5689_s4 + $0x68] sm:$0xff] }
 0x3b1   :  { %5973 = vst [vmem:[#allocation10_spill] sm:$0xff] %v3911_v40  ;;  %v497_v47 = vadd.f32 %v496_v39, %v473_v28  ;;  %v2545_v39 = vld [vmem:[%s5687_s2 + $0x18] sm:$0xff] }
 0x3b2   :  { %862 = vmatpush.msra.mxu1 %v5965_v45 }
 0x3b3   :  { %v500_v55 = vadd.f32 %v2535_v51, %v497_v47 }
 0x3b4   :  { %863 = vmatpush.msra.mxu1 %v5966_v49 }
 0x3b5   :  { %v2537_v45 = vmul.f32 -1.442695, %v500_v55  ;;  %v2663_v49 = vpop.eup %2662 }
 0x3b6   :  { %864 = vmatpush.msra.mxu1 %v5967_v42  ;;  %v507_v42 = vadd.f32 1.0, %v2663_v49 }
 0x3b7   :  { %2664 = vpow2.f32 %v2537_v45 }
 0x3b8   :  { %865 = vmatpush.msra.mxu1 %v5968_v6  ;;  %2666 = vrcp.f32 %v507_v42  ;;  %vm514_vm11 = vweird.f32 %v507_v42 }
 0x3ba   :  { %866 = vmatpush.msra.mxu1 %v5969_v25 }
 0x3bc   :  { %867 = vmatpush.msra.mxu1 %v5970_v20 }
 0x3bd   :  { %v2665_v6 = vpop.eup %2664 }
 0x3be   :  { %v508_v25 = vadd.f32 1.0, %v2665_v6  ;;  %v2667_v20 = vpop.eup %2666 }
 0x3bf   :  { %v510_v24 = vmul.f32 %v2667_v20, %v507_v42  ;;  %vm515_vm10 = vweird.f32 %v2667_v20 }
 0x3c0   :  { %2668 = vrcp.f32 %v508_v25  ;;  %vm516_vm12 = vmor %vm514_vm11, %vm515_vm10  ;;  %v535_v47 = vand.u32 2147483648, %v508_v25  ;;  %vm529_vm15 = vweird.f32 %v508_v25  ;;  %v533_v45 = vand.u32 2147483647, %v508_v25 }
 0x3c2   :  { %vm534_vm2 = vcmp.eq.f32.partialorder %v533_v45, 8.507059e+37 }
 0x3fa   :  { %v647_v0 = vpop.f32.mrf.mxu1 }
 0x3fb   :  { %695 = vmatmul.f32.vlgmr.msrb.gmra.mxu1 %v647_v0  ;;  %v511_v0 = vsub.f32 1.0, %v510_v24 }
 0x3fc   :  { %1027 = vmatpush.msrb.mxu1 %v3899_v32 }
 0x3fe   :  { %1028 = vmatpush.msrb.mxu1 %v3905_v36 }
 0x400   :  { %1029 = vmatpush.msrb.mxu1 %v3911_v40 }
 0x402   :  { %v650_v53 = vpop.f32.mrf.mxu1  ;;  %1030 = vmatpush.msrb.mxu1 %v3917_v37 }
 0x403   :  { %698 = vmatmul.f32.gmra.mxu1 %v650_v53  ;;  %v2669_v53 = vpop.eup %2668 }
 0x404   :  { %1031 = vmatpush.msrb.mxu1 %v5975_v33  ;;  %v512_v33 = vmul.f32 %v2667_v20, %v511_v0  ;;  %v525_v28 = vmul.f32 %v2669_v53, %v508_v25  ;;  %vm530_vm14 = vweird.f32 %v2669_v53  ;;  %v536_v0 = vor.u32 1.1754944e-38, %v535_v47  ;;  %v4058_v47 = vld [vmem:[%s5689_s4 + $0x80] sm:$0xff] }
 0x405   :  { %vm531_vm1 = vmor %vm529_vm15, %vm530_vm14 }
 0x406   :  { %1032 = vmatpush.msrb.mxu1 %v5976_v60  ;;  %v673_v60 = vpop.f32.mrf.mxu0 }
 0x408   :  { %1033 = vmatpush.msrb.mxu1 %v5977_v63  ;;  %v526_v63 = vsub.f32 1.0, %v525_v28 }
 0x40a   :  { %1034 = vmatpush.msrb.mxu1 %v5978_v12  ;;  %v513_v12 = vadd.f32 %v2667_v20, %v512_v33 }
 0x40c   :  { %1035 = vmatpush.msrb.mxu1 %v5979_v56  ;;  %v2544_v56 = vld [vmem:[%s5687_s2 + $0x10] sm:$0xff] }
 0x40e   :  { %1036 = vmatpush.msrb.mxu1 %v5980_v46  ;;  %v676_v31 = vpop.f32.mrf.mxu0 }
 0x410   :  { %1037 = vmatpush.msrb.mxu1 %v5981_v8  ;;  %v520_v8 = vand.u32 2147483648, %v507_v42 }
 0x412   :  { %1038 = vmatpush.msrb.mxu1 %v5982_v1  ;;  %v521_v23 = vor.u32 1.1754944e-38, %v520_v8  ;;  %v3985_v8 = vld [vmem:[%s5688_s3 + $0x8] sm:$0xff] }
 0x414   :  { %1039 = vmatpush.msrb.mxu1 %v5983_v3  ;;  %v518_v3 = vand.u32 2147483647, %v507_v42 }
 0x416   :  { %1040 = vmatpush.msrb.mxu1 %v5984_v5  ;;  %vm519_vm13 = vcmp.eq.f32.partialorder %v518_v3, 8.507059e+37  ;;  %v3998_v3 = vld [vmem:[%s5689_s4 + $0xd0] sm:$0xff] }
 0x418   :  { %1041 = vmatpush.msrb.mxu1 %v5985_v10  ;;  %v527_v10 = vmul.f32 %v2669_v53, %v526_v63 }
 0x41a   :  { %1042 = vmatpush.msrb.mxu1 %v5986_v19  ;;  %v517_v19 = vsel %vm516_vm12, %v2667_v20, %v513_v12  ;;  %v528_v35 = vadd.f32 %v2669_v53, %v527_v10  ;;  %v4010_v10 = vld [vmem:[%s5689_s4 + $0xc0] sm:$0xff] }
 0x41b   :  { %v522_v27 = vsel %vm519_vm13, %v521_v23, %v517_v19  ;;  %v4016_v19 = vld [vmem:[%s5689_s4 + $0xb8] sm:$0xff]  ;;  %v4022_v23 = vld [vmem:[%s5689_s4 + $0xb0] sm:$0xff] }
 0x41c   :  { %v708_v55 = vsub.f32 1.0, %v522_v27  ;;  %v532_v20 = vsel %vm531_vm1, %v2669_v53, %v528_v35  ;;  %v706_v24 = vmul.f32 %v522_v27, %v3765_v15  ;;  %v3961_v15 = vld [vmem:[%s5689_s4 + $0xf8] sm:$0xff]  ;;  %v3973_v53 = vld [vmem:[%s5689_s4 + $0xe8] sm:$0xff] }
 0x41d   :  { %v537_v28 = vsel %vm534_vm2, %v536_v0, %v532_v20  ;;  %v4028_v27 = vld [vmem:[%s5689_s4 + $0xa8] sm:$0xff]  ;;  %v4040_v35 = vld [vmem:[%s5689_s4 + $0x98] sm:$0xff] }
 0x41e   :  { %v707_v12 = vmul.f32 %v537_v28, %v3769_v29  ;;  %v3967_v29 = vld [vmem:[%s5689_s4 + $0xf0] sm:$0xff] }
 0x478   :  { %v696_v46 = vpop.f32.mrf.mxu1 }
 0x479   :  { %v697_v1 = vadd.f32 %v696_v46, %v673_v60  ;;  %v709_v60 = vsub.f32 1.0, %v537_v28  ;;  %v3979_v46 = vld [vmem:[%s5689_s4 + $0xe0] sm:$0xff]  ;;  %v2553_v28 = vld [vmem:[%s5686_s1 + $0x28] sm:$0xff] }
 0x47b   :  { %v702_v5 = vadd.f32 %v2544_v56, %v697_v1  ;;  %v3992_v1 = vld [vmem:[%s5689_s4 + $0xd8] sm:$0xff] }
 0x47d   :  { %2670 = vtanh.f32 %v702_v5  ;;  %v4004_v5 = vld [vmem:[%s5689_s4 + $0xc8] sm:$0xff] }
 0x480   :  { %v699_v41 = vpop.f32.mrf.mxu1 }
 0x481   :  { %v700_v51 = vadd.f32 %v699_v41, %v676_v31  ;;  %v4034_v31 = vld [vmem:[%s5689_s4 + $0xa0] sm:$0xff]  ;;  %v4052_v41 = vld [vmem:[%s5689_s4 + $0x88] sm:$0xff] }
 0x483   :  { %v2671_v49 = vpop.eup %2670  ;;  %v703_v42 = vadd.f32 %v2545_v39, %v700_v51  ;;  %v4046_v39 = vld [vmem:[%s5689_s4 + $0x90] sm:$0xff]  ;;  %v4164_v51 = vld [vmem:[%s5690_s5 + $0x8] sm:$0xff] }
 0x484   :  { %v710_v6 = vmul.f32 %v2671_v49, %v708_v55  ;;  %6001 = vst [vmem:[#allocation41_spill] sm:$0xff] %v4164_v51  ;;  %v4170_v55 = vld [vmem:[%s5690_s5] sm:$0xff] }
 0x485   :  { %2672 = vtanh.f32 %v703_v42  ;;  %6002 = vst [vmem:[#allocation42_spill] sm:$0xff] %v4170_v55  ;;  %v2552_v49 = vld [vmem:[%s5686_s1 + $0x20] sm:$0xff] }
 0x486   :  { %v3945_v33 = vadd.f32 %v710_v6, %v706_v24 }
 0x488   :  { %756 = vmatmul.f32.vlgmr.msrb.gmra.mxu3 %v3945_v33  ;;  %845 = vmatmul.f32.vlgmr.msrb.gmra.mxu0 %v3945_v33 }
 0x48b   :  { %v2673_v63 = vpop.eup %2672 }
 0x48c   :  { %v711_v25 = vmul.f32 %v2673_v63, %v709_v60 }
 0x48e   :  { %v3950_v56 = vadd.f32 %v711_v25, %v707_v12 }
 0x490   :  { %728 = vmatpush.msra.mxu2 %v3950_v56  ;;  %759 = vmatmul.f32.gmra.mxu3 %v3950_v56 }
 0x491   :  { %848 = vmatmul.f32.gmra.mxu0 %v3950_v56 }
 0x492   :  { %729 = vmatpush.msra.mxu2 %v3945_v33 }
 0x493   :  { %2546 = vmatmul.msk.f32.vlgmr.msra.gmra.mxu2 %vm136_vm0, %v3838_v14 }
 0x494   :  { %763 = vmatpush.msrb.mxu2 %v3961_v15 }
 0x496   :  { %764 = vmatpush.msrb.mxu2 %v3967_v29 }
 0x498   :  { %765 = vmatpush.msrb.mxu2 %v3973_v53 }
 0x49a   :  { %766 = vmatpush.msrb.mxu2 %v3979_v46 }
 0x49b   :  { %2547 = vmatmul.msk.f32.gmra.mxu2 %vm136_vm0, %v3985_v8 }
 0x49c   :  { %767 = vmatpush.msrb.mxu2 %v3992_v1 }
 0x49e   :  { %768 = vmatpush.msrb.mxu2 %v3998_v3 }
 0x4a0   :  { %769 = vmatpush.msrb.mxu2 %v4004_v5 }
 0x4a2   :  { %770 = vmatpush.msrb.mxu2 %v4010_v10 }
 0x4a4   :  { %771 = vmatpush.msrb.mxu2 %v4016_v19 }
 0x4a6   :  { %772 = vmatpush.msrb.mxu2 %v4022_v23 }
 0x4a8   :  { %773 = vmatpush.msrb.mxu2 %v4028_v27 }
 0x4aa   :  { %774 = vmatpush.msrb.mxu2 %v4034_v31 }
 0x4ac   :  { %775 = vmatpush.msrb.mxu2 %v4040_v35 }
 0x4ae   :  { %776 = vmatpush.msrb.mxu2 %v4046_v39 }
 0x4b0   :  { %777 = vmatpush.msrb.mxu2 %v4052_v41 }
 0x4b2   :  { %778 = vmatpush.msrb.mxu2 %v4058_v47 }
 0x4b4   :  { %943 = vmatpush.msra.mxu2 %v3511_v4 }
 0x4b6   :  { %944 = vmatpush.msra.mxu2 %v3518_v2  ;;  %v4080_v2 = vld [vmem:[%s5690_s5 + $0x78] sm:$0xff] }
 0x4b7   :  { %5987 = vst [vmem:[#allocation13_spill] sm:$0xff] %v4080_v2 }
 0x4b8   :  { %945 = vmatpush.msra.mxu2 %v3524_v57  ;;  %v4086_v57 = vld [vmem:[%s5690_s5 + $0x70] sm:$0xff] }
 0x4b9   :  { %5988 = vst [vmem:[#allocation15_spill] sm:$0xff] %v4086_v57 }
 0x4ba   :  { %946 = vmatpush.msra.mxu2 %v3530_v58  ;;  %v4092_v58 = vld [vmem:[%s5690_s5 + $0x68] sm:$0xff] }
 0x4bb   :  { %5989 = vst [vmem:[#allocation17_spill] sm:$0xff] %v4092_v58 }
 0x4bc   :  { %947 = vmatpush.msra.mxu2 %v3536_v61 }
 0x4be   :  { %948 = vmatpush.msra.mxu2 %v3544_v26  ;;  %v4098_v26 = vld [vmem:[%s5690_s5 + $0x60] sm:$0xff] }
 0x4bf   :  { %5990 = vst [vmem:[#allocation19_spill] sm:$0xff] %v4098_v26 }
 0x4c0   :  { %949 = vmatpush.msra.mxu2 %v3561_v7  ;;  %v4110_v7 = vld [vmem:[%s5690_s5 + $0x50] sm:$0xff] }
 0x4c1   :  { %5992 = vst [vmem:[#allocation25_spill] sm:$0xff] %v4110_v7 }
 0x4c2   :  { %950 = vmatpush.msra.mxu2 %v3573_v22  ;;  %v4122_v22 = vld [vmem:[%s5690_s5 + $0x40] sm:$0xff] }
 0x4c3   :  { %5994 = vst [vmem:[#allocation31_spill] sm:$0xff] %v4122_v22 }
 0x4c4   :  { %951 = vmatpush.msra.mxu2 %v3585_v50  ;;  %v4128_v50 = vld [vmem:[%s5690_s5 + $0x38] sm:$0xff] }
 0x4c5   :  { %5995 = vst [vmem:[#allocation34_spill] sm:$0xff] %v4128_v50 }
 0x4c6   :  { %952 = vmatpush.msra.mxu2 %v3597_v38  ;;  %v4134_v38 = vld [vmem:[%s5690_s5 + $0x30] sm:$0xff] }
 0x4c7   :  { %5996 = vst [vmem:[#allocation46_spill] sm:$0xff] %v4134_v38 }
 0x4c8   :  { %953 = vmatpush.msra.mxu2 %v3609_v34  ;;  %v4140_v34 = vld [vmem:[%s5690_s5 + $0x28] sm:$0xff] }
 0x4c9   :  { %5997 = vst [vmem:[#allocation48_spill] sm:$0xff] %v4140_v34 }
 0x4ca   :  { %954 = vmatpush.msra.mxu2 %v5948_v16  ;;  %v4146_v16 = vld [vmem:[%s5690_s5 + $0x20] sm:$0xff] }
 0x4cb   :  { %5998 = vst [vmem:[#allocation50_spill] sm:$0xff] %v4146_v16 }
 0x4cc   :  { %955 = vmatpush.msra.mxu2 %v5949_v48  ;;  %v4152_v48 = vld [vmem:[%s5690_s5 + $0x18] sm:$0xff] }
 0x4cd   :  { %5999 = vst [vmem:[#allocation39_spill] sm:$0xff] %v4152_v48 }
 0x4ce   :  { %956 = vmatpush.msra.mxu2 %v5950_v21  ;;  %v4158_v21 = vld [vmem:[%s5690_s5 + $0x10] sm:$0xff] }
 0x4cf   :  { %6000 = vst [vmem:[#allocation40_spill] sm:$0xff] %v4158_v21 }
 0x4d0   :  { %957 = vmatpush.msra.mxu2 %v3657_v9  ;;  %v4116_v9 = vld [vmem:[%s5690_s5 + $0x48] sm:$0xff] }
 0x4d1   :  { %5993 = vst [vmem:[#allocation28_spill] sm:$0xff] %v4116_v9 }
 0x4d2   :  { %958 = vmatpush.msra.mxu2 %v3669_v18  ;;  %v4104_v18 = vld [vmem:[%s5690_s5 + $0x58] sm:$0xff] }
 0x4d3   :  { %5991 = vst [vmem:[#allocation22_spill] sm:$0xff] %v4104_v18 }
 0x505   :  { %v846_v45 = vpop.f32.mrf.mxu0 }
 0x50e   :  { %v849_v0 = vpop.f32.mrf.mxu0 }
 0x516   :  { %v731_v4 = vpop.f32.mrf.mxu2 }
 0x517   :  { %779 = vmatmul.f32.vlgmr.msrb.gmra.mxu2 %v731_v4  ;;  %868 = vmatmul.f32.vlgmr.msra.gmra.mxu1 %v731_v4 }
 0x518   :  { %1116 = vmatpush.msrb.mxu2 %v4080_v2 }
 0x51a   :  { %1117 = vmatpush.msrb.mxu2 %v4086_v57 }
 0x51c   :  { %1118 = vmatpush.msrb.mxu2 %v4092_v58 }
 0x51e   :  { %v734_v61 = vpop.f32.mrf.mxu2  ;;  %1119 = vmatpush.msrb.mxu2 %v4098_v26 }
 0x51f   :  { %782 = vmatmul.f32.gmra.mxu2 %v734_v61  ;;  %871 = vmatmul.f32.gmra.mxu1 %v734_v61 }
 0x520   :  { %1120 = vmatpush.msrb.mxu2 %v4104_v18 }
 0x522   :  { %1121 = vmatpush.msrb.mxu2 %v4110_v7 }
 0x524   :  { %1122 = vmatpush.msrb.mxu2 %v4116_v9 }
 0x526   :  { %1123 = vmatpush.msrb.mxu2 %v4122_v22 }
 0x528   :  { %1124 = vmatpush.msrb.mxu2 %v4128_v50 }
 0x52a   :  { %1125 = vmatpush.msrb.mxu2 %v4134_v38 }
 0x52c   :  { %1126 = vmatpush.msrb.mxu2 %v4140_v34 }
 0x52e   :  { %1127 = vmatpush.msrb.mxu2 %v4146_v16 }
 0x530   :  { %1128 = vmatpush.msrb.mxu2 %v4152_v48 }
 0x532   :  { %1129 = vmatpush.msrb.mxu2 %v4158_v21 }
 0x534   :  { %1130 = vmatpush.msrb.mxu2 %v4164_v51 }
 0x536   :  { %1131 = vmatpush.msrb.mxu2 %v4170_v55 }
 0x594   :  { %v869_v42 = vpop.f32.mrf.mxu1 }
 0x595   :  { %v870_v6 = vadd.f32 %v869_v42, %v846_v45 }
 0x597   :  { %v875_v20 = vadd.f32 %v2552_v49, %v870_v6 }
 0x599   :  { %v2554_v24 = vmul.f32 -1.442695, %v875_v20 }
 0x59b   :  { %2674 = vpow2.f32 %v2554_v24 }
 0x59c   :  { %v872_v60 = vpop.f32.mrf.mxu1 }
 0x59d   :  { %v873_v63 = vadd.f32 %v872_v60, %v849_v0 }
 0x59f   :  { %v876_v25 = vadd.f32 %v2553_v28, %v873_v63 }
 0x5a1   :  { %v2675_v12 = vpop.eup %2674  ;;  %v2555_v4 = vmul.f32 -1.442695, %v876_v25 }
 0x5a2   :  { %v883_v61 = vadd.f32 1.0, %v2675_v12 }
 0x5a3   :  { %2676 = vpow2.f32 %v2555_v4 }
 0x5a4   :  { %2678 = vrcp.f32 %v883_v61  ;;  %v896_v42 = vand.u32 2147483648, %v883_v61  ;;  %v894_v20 = vand.u32 2147483647, %v883_v61  ;;  %vm890_vm4 = vweird.f32 %v883_v61 }
 0x5a6   :  { %v897_v0 = vor.u32 1.1754944e-38, %v896_v42  ;;  %vm895_vm6 = vcmp.eq.f32.partialorder %v894_v20, 8.507059e+37  ;;  %v4212_v20 = vld [vmem:[%s5691_s6 + $0xd8] sm:$0xff] }
 0x5a9   :  { %v2677_v55 = vpop.eup %2676 }
 0x5aa   :  { %v2679_v51 = vpop.eup %2678  ;;  %v884_v21 = vadd.f32 1.0, %v2677_v55 }
 0x5ab   :  { %v886_v45 = vmul.f32 %v2679_v51, %v883_v61  ;;  %vm891_vm3 = vweird.f32 %v2679_v51 }
 0x5ac   :  { %2680 = vrcp.f32 %v884_v21  ;;  %vm892_vm5 = vmor %vm890_vm4, %vm891_vm3  ;;  %v911_v55 = vand.u32 2147483648, %v884_v21  ;;  %vm905_vm8 = vweird.f32 %v884_v21 }
 0x5ad   :  { %v887_v49 = vsub.f32 1.0, %v886_v45  ;;  %v909_v45 = vand.u32 2147483647, %v884_v21 }
 0x5af   :  { %v888_v6 = vmul.f32 %v2679_v51, %v887_v49  ;;  %vm910_vm10 = vcmp.eq.f32.partialorder %v909_v45, 8.507059e+37  ;;  %v4318_v45 = vld [vmem:[%s5690_s5 + $0x88] sm:$0xff] }
 0x5b0   :  { %6014 = vst [vmem:[#allocation32_spill] sm:$0xff] %v4318_v45 }
 0x5b1   :  { %v889_v24 = vadd.f32 %v2679_v51, %v888_v6  ;;  %v912_v6 = vor.u32 1.1754944e-38, %v911_v55  ;;  %v4306_v55 = vld [vmem:[%s5690_s5 + $0x98] sm:$0xff] }
 0x5b2   :  { %v2681_v48 = vpop.eup %2680  ;;  %6012 = vst [vmem:[#allocation26_spill] sm:$0xff] %v4306_v55 }
 0x5b3   :  { %v901_v28 = vmul.f32 %v2681_v48, %v884_v21  ;;  %v893_v60 = vsel %vm892_vm5, %v2679_v51, %v889_v24  ;;  %vm906_vm7 = vweird.f32 %v2681_v48  ;;  %v4186_v51 = vld [vmem:[%s5691_s6 + $0xf8] sm:$0xff]  ;;  %v4204_v21 = vld [vmem:[%s5691_s6 + $0xe0] sm:$0xff]  ;;  %v4218_v24 = vld [vmem:[%s5691_s6 + $0xd0] sm:$0xff] }
 0x5b4   :  { %v898_v63 = vsel %vm895_vm6, %v897_v0, %v893_v60  ;;  %vm907_vm9 = vmor %vm905_vm8, %vm906_vm7  ;;  %v4224_v0 = vld [vmem:[%s5691_s6 + $0xc8] sm:$0xff]  ;;  %v4236_v60 = vld [vmem:[%s5691_s6 + $0xb8] sm:$0xff] }
 0x5b5   :  { %v902_v25 = vsub.f32 1.0, %v901_v28  ;;  %v915_v12 = vmul.f32 %v898_v63, %v3945_v33  ;;  %v4230_v28 = vld [vmem:[%s5691_s6 + $0xc0] sm:$0xff]  ;;  %v4242_v63 = vld [vmem:[%s5691_s6 + $0xb0] sm:$0xff] }
 0x5b6   :  { %6003 = vst [vmem:[#allocation43_spill] sm:$0xff] %v4242_v63 }
 0x5b7   :  { %959 = vmatmul.f32.vlgmr.msra.gmra.mxu2 %v915_v12  ;;  %v903_v4 = vmul.f32 %v2681_v48, %v902_v25  ;;  %v4294_v25 = vld [vmem:[%s5690_s5 + $0xa8] sm:$0xff] }
 0x5b8   :  { %6010 = vst [vmem:[#allocation20_spill] sm:$0xff] %v4294_v25 }
 0x5b9   :  { %v904_v49 = vadd.f32 %v2681_v48, %v903_v4  ;;  %v4312_v4 = vld [vmem:[%s5690_s5 + $0x90] sm:$0xff] }
 0x5ba   :  { %6013 = vst [vmem:[#allocation29_spill] sm:$0xff] %v4312_v4 }
 0x5bb   :  { %v908_v61 = vsel %vm907_vm9, %v2681_v48, %v904_v49  ;;  %v4192_v48 = vld [vmem:[%s5691_s6 + $0xf0] sm:$0xff]  ;;  %v4324_v49 = vld [vmem:[%s5690_s5 + $0x80] sm:$0xff] }
 0x5bc   :  { %v913_v16 = vsel %vm910_vm10, %v912_v6, %v908_v61  ;;  %6015 = vst [vmem:[#allocation35_spill] sm:$0xff] %v4324_v49  ;;  %v757_v6 = vpop.f32.mrf.mxu3 }
 0x5bd   :  { %v916_v42 = vmul.f32 %v913_v16, %v3950_v56  ;;  %v4198_v16 = vld [vmem:[%s5691_s6 + $0xe8] sm:$0xff] }
 0x5bf   :  { %931 = vmatpush.msra.mxu3 %v916_v42  ;;  %962 = vmatmul.f32.gmra.mxu2 %v916_v42 }
 0x5c1   :  { %932 = vmatpush.msra.mxu3 %v915_v12  ;;  %v4300_v12 = vld [vmem:[%s5690_s5 + $0xa0] sm:$0xff] }
 0x5c2   :  { %2556 = vmatmul.msk.f32.vlgmr.msra.gmra.mxu3 %vm136_vm0, %v3838_v14  ;;  %6011 = vst [vmem:[#allocation23_spill] sm:$0xff] %v4300_v12 }
 0x5c3   :  { %966 = vmatpush.msrb.mxu3 %v4186_v51 }
 0x5c4   :  { %v760_v61 = vpop.f32.mrf.mxu3 }
 0x5c5   :  { %967 = vmatpush.msrb.mxu3 %v4192_v48 }
 0x5c7   :  { %968 = vmatpush.msrb.mxu3 %v4198_v16 }
 0x5c9   :  { %969 = vmatpush.msrb.mxu3 %v4204_v21 }
 0x5ca   :  { %2557 = vmatmul.msk.f32.gmra.mxu3 %vm136_vm0, %v3985_v8 }
 0x5cb   :  { %970 = vmatpush.msrb.mxu3 %v4212_v20 }
 0x5cd   :  { %971 = vmatpush.msrb.mxu3 %v4218_v24 }
 0x5cf   :  { %972 = vmatpush.msrb.mxu3 %v4224_v0 }
 0x5d1   :  { %973 = vmatpush.msrb.mxu3 %v4230_v28 }
 0x5d3   :  { %974 = vmatpush.msrb.mxu3 %v4236_v60 }
 0x5d5   :  { %975 = vmatpush.msrb.mxu3 %v4242_v63 }
 0x5d7   :  { %976 = vmatpush.msrb.mxu3 %v5961_v59  ;;  %v4288_v59 = vld [vmem:[%s5690_s5 + $0xb0] sm:$0xff] }
 0x5d8   :  { %6009 = vst [vmem:[#allocation52_spill] sm:$0xff] %v4288_v59 }
 0x5d9   :  { %977 = vmatpush.msrb.mxu3 %v3674_v30  ;;  %v4258_v30 = vld [vmem:[%s5690_s5 + $0xd8] sm:$0xff] }
 0x5da   :  { %6004 = vst [vmem:[#allocation44_spill] sm:$0xff] %v4258_v30 }
 0x5db   :  { %978 = vmatpush.msrb.mxu3 %v3681_v13  ;;  %v4264_v13 = vld [vmem:[%s5690_s5 + $0xd0] sm:$0xff] }
 0x5dc   :  { %6005 = vst [vmem:[#allocation45_spill] sm:$0xff] %v4264_v13 }
 0x5dd   :  { %979 = vmatpush.msrb.mxu3 %v3688_v54  ;;  %v4270_v54 = vld [vmem:[%s5690_s5 + $0xc8] sm:$0xff] }
 0x5de   :  { %6006 = vst [vmem:[#allocation47_spill] sm:$0xff] %v4270_v54 }
 0x5df   :  { %980 = vmatpush.msrb.mxu3 %v3695_v62  ;;  %v4276_v62 = vld [vmem:[%s5690_s5 + $0xc0] sm:$0xff] }
 0x5e0   :  { %6007 = vst [vmem:[#allocation49_spill] sm:$0xff] %v4276_v62 }
 0x5e1   :  { %981 = vmatpush.msrb.mxu3 %v3718_v43  ;;  %v4282_v43 = vld [vmem:[%s5690_s5 + $0xb8] sm:$0xff] }
 0x5e2   :  { %6008 = vst [vmem:[#allocation51_spill] sm:$0xff] %v4282_v43 }
 0x5e3   :  { %1139 = vmatpush.msra.mxu3 %v3863_v17 }
 0x5e5   :  { %1140 = vmatpush.msra.mxu3 %v3869_v44 }
 0x5e7   :  { %1141 = vmatpush.msra.mxu3 %v3875_v52 }
 0x5e9   :  { %1142 = vmatpush.msra.mxu3 %v3881_v11  ;;  %v2559_v11 = vld [vmem:[%s5687_s2 + $0x28] sm:$0xff] }
 0x5eb   :  { %1143 = vmatpush.msra.mxu3 %v4258_v30 }
 0x5ed   :  { %1144 = vmatpush.msra.mxu3 %v4264_v13 }
 0x5ef   :  { %1145 = vmatpush.msra.mxu3 %v4270_v54 }
 0x5f1   :  { %1146 = vmatpush.msra.mxu3 %v4276_v62 }
 0x5f3   :  { %1147 = vmatpush.msra.mxu3 %v4282_v43 }
 0x5f5   :  { %1148 = vmatpush.msra.mxu3 %v4288_v59 }
 0x5f7   :  { %1149 = vmatpush.msra.mxu3 %v4294_v25 }
 0x5f9   :  { %1150 = vmatpush.msra.mxu3 %v4300_v12 }
 0x5fb   :  { %1151 = vmatpush.msra.mxu3 %v4306_v55 }
 0x5fd   :  { %1152 = vmatpush.msra.mxu3 %v4312_v4 }
 0x5ff   :  { %1153 = vmatpush.msra.mxu3 %v4318_v45  ;;  %v4334_v45 = vld [vmem:[%s5689_s4 + $0x58] sm:$0xff] }
 0x600   :  { %6016 = vst [vmem:[#allocation12_spill] sm:$0xff] %v4334_v45 }
 0x601   :  { %1154 = vmatpush.msra.mxu3 %v4324_v49 }
 0x645   :  { %v934_v42 = vpop.f32.mrf.mxu3 }
 0x646   :  { %982 = vmatmul.f32.vlgmr.msrb.gmra.mxu3 %v934_v42  ;;  %v4340_v42 = vld [vmem:[%s5689_s4 + $0x50] sm:$0xff] }
 0x647   :  { %1314 = vmatpush.msrb.mxu3 %v3899_v32  ;;  %6017 = vst [vmem:[#allocation14_spill] sm:$0xff] %v4340_v42 }
 0x649   :  { %1315 = vmatpush.msrb.mxu3 %v3905_v36 }
 0x64b   :  { %1316 = vmatpush.msrb.mxu3 %v3911_v40  ;;  %v4346_v40 = vld [vmem:[%s5689_s4 + $0x48] sm:$0xff] }
 0x64c   :  { %6018 = vst [vmem:[#allocation16_spill] sm:$0xff] %v4346_v40 }
 0x64d   :  { %v937_v4 = vpop.f32.mrf.mxu3  ;;  %1317 = vmatpush.msrb.mxu3 %v3917_v37 }
 0x64e   :  { %985 = vmatmul.f32.gmra.mxu3 %v937_v4  ;;  %v4352_v4 = vld [vmem:[%s5689_s4 + $0x40] sm:$0xff] }
 0x64f   :  { %1318 = vmatpush.msrb.mxu3 %v4334_v45  ;;  %6019 = vst [vmem:[#allocation18_spill] sm:$0xff] %v4352_v4  ;;  %v4358_v45 = vld [vmem:[%s5689_s4 + $0x38] sm:$0xff] }
 0x650   :  { %6020 = vst [vmem:[#allocation21_spill] sm:$0xff] %v4358_v45 }
 0x651   :  { %1319 = vmatpush.msrb.mxu3 %v4340_v42  ;;  %v4364_v42 = vld [vmem:[%s5689_s4 + $0x30] sm:$0xff] }
 0x652   :  { %6021 = vst [vmem:[#allocation24_spill] sm:$0xff] %v4364_v42 }
 0x653   :  { %1320 = vmatpush.msrb.mxu3 %v4346_v40  ;;  %v4370_v40 = vld [vmem:[%s5689_s4 + $0x28] sm:$0xff] }
 0x654   :  { %6022 = vst [vmem:[#allocation27_spill] sm:$0xff] %v4370_v40 }
 0x655   :  { %1321 = vmatpush.msrb.mxu3 %v4352_v4  ;;  %v4376_v4 = vld [vmem:[%s5689_s4 + $0x20] sm:$0xff] }
 0x656   :  { %6023 = vst [vmem:[#allocation30_spill] sm:$0xff] %v4376_v4 }
 0x657   :  { %1322 = vmatpush.msrb.mxu3 %v4358_v45  ;;  %v4382_v45 = vld [vmem:[%s5689_s4 + $0x18] sm:$0xff] }
 0x658   :  { %6024 = vst [vmem:[#allocation33_spill] sm:$0xff] %v4382_v45 }
 0x659   :  { %1323 = vmatpush.msrb.mxu3 %v4364_v42  ;;  %v4388_v42 = vld [vmem:[%s5689_s4 + $0x10] sm:$0xff] }
 0x65a   :  { %6025 = vst [vmem:[#allocation36_spill] sm:$0xff] %v4388_v42 }
 0x65b   :  { %1324 = vmatpush.msrb.mxu3 %v4370_v40  ;;  %v4394_v40 = vld [vmem:[%s5689_s4 + $0x8] sm:$0xff] }
 0x65c   :  { %6026 = vst [vmem:[#allocation37_spill] sm:$0xff] %v4394_v40 }
 0x65d   :  { %1325 = vmatpush.msrb.mxu3 %v4376_v4  ;;  %v4400_v4 = vld [vmem:[%s5689_s4] sm:$0xff] }
 0x65e   :  { %6027 = vst [vmem:[#allocation38_spill] sm:$0xff] %v4400_v4 }
 0x65f   :  { %1326 = vmatpush.msrb.mxu3 %v4382_v45  ;;  %v780_v45 = vpop.f32.mrf.mxu2 }
 0x660   :  { %v781_v37 = vadd.f32 %v780_v45, %v757_v6 }
 0x661   :  { %1327 = vmatpush.msrb.mxu3 %v4388_v42  ;;  %v2548_v42 = vld [vmem:[%s5685_s0 + $0x20] sm:$0xff] }
 0x662   :  { %v786_v36 = vadd.f32 %v2548_v42, %v781_v37 }
 0x663   :  { %1328 = vmatpush.msrb.mxu3 %v4394_v40  ;;  %v2549_v40 = vld [vmem:[%s5685_s0 + $0x28] sm:$0xff] }
 0x664   :  { %v2550_v49 = vmul.f32 -1.442695, %v786_v36 }
 0x665   :  { %1329 = vmatpush.msrb.mxu3 %v4400_v4 }
 0x666   :  { %2682 = vpow2.f32 %v2550_v49 }
 0x667   :  { %v783_v32 = vpop.f32.mrf.mxu2 }
 0x668   :  { %v784_v55 = vadd.f32 %v783_v32, %v760_v61 }
 0x66a   :  { %v787_v12 = vadd.f32 %v2549_v40, %v784_v55  ;;  %v2558_v40 = vld [vmem:[%s5687_s2 + $0x20] sm:$0xff] }
 0x66c   :  { %v2551_v25 = vmul.f32 -1.442695, %v787_v12  ;;  %v2683_v59 = vpop.eup %2682 }
 0x66d   :  { %v794_v4 = vadd.f32 1.0, %v2683_v59 }
 0x66e   :  { %2684 = vpow2.f32 %v2551_v25 }
 0x66f   :  { %2686 = vrcp.f32 %v794_v4  ;;  %v960_v61 = vpop.f32.mrf.mxu2  ;;  %v807_v59 = vand.u32 2147483648, %v794_v4  ;;  %vm801_vm12 = vweird.f32 %v794_v4  ;;  %v805_v55 = vand.u32 2147483647, %v794_v4 }
 0x671   :  { %v808_v30 = vor.u32 1.1754944e-38, %v807_v59  ;;  %vm806_vm14 = vcmp.eq.f32.partialorder %v805_v55, 8.507059e+37 }
 0x674   :  { %v2685_v45 = vpop.eup %2684 }
 0x675   :  { %v795_v6 = vadd.f32 1.0, %v2685_v45  ;;  %v2687_v43 = vpop.eup %2686 }
 0x676   :  { %v797_v62 = vmul.f32 %v2687_v43, %v794_v4  ;;  %vm802_vm11 = vweird.f32 %v2687_v43 }
 0x677   :  { %2688 = vrcp.f32 %v795_v6  ;;  %vm803_vm13 = vmor %vm801_vm12, %vm802_vm11  ;;  %v822_v44 = vand.u32 2147483648, %v795_v6  ;;  %vm816_vm1 = vweird.f32 %v795_v6 }
 0x678   :  { %v798_v37 = vsub.f32 1.0, %v797_v62 }
 0x679   :  { %v823_v59 = vor.u32 1.1754944e-38, %v822_v44  ;;  %v4450_v44 = vld [vmem:[%s5691_s6 + $0x78] sm:$0xff] }
 0x67a   :  { %v799_v36 = vmul.f32 %v2687_v43, %v798_v37 }
 0x67c   :  { %v800_v13 = vadd.f32 %v2687_v43, %v799_v36 }
 0x67d   :  { %v2689_v42 = vpop.eup %2688 }
 0x67e   :  { %v812_v32 = vmul.f32 %v2689_v42, %v795_v6  ;;  %v804_v62 = vsel %vm803_vm13, %v2687_v43, %v800_v13  ;;  %vm817_vm15 = vweird.f32 %v2689_v42 }
 0x67f   :  { %v809_v37 = vsel %vm806_vm14, %v808_v30, %v804_v62  ;;  %vm818_vm2 = vmor %vm816_vm1, %vm817_vm15  ;;  %v4474_v62 = vld [vmem:[%s5691_s6 + $0x58] sm:$0xff] }
 0x680   :  { %v813_v54 = vsub.f32 1.0, %v812_v32  ;;  %v963_v32 = vpop.f32.mrf.mxu2  ;;  %v995_v4 = vsub.f32 1.0, %v809_v37  ;;  %v993_v30 = vmul.f32 %v809_v37, %v3945_v33  ;;  %v4456_v33 = vld [vmem:[%s5691_s6 + $0x70] sm:$0xff] }
 0x681   :  { %v4480_v37 = vld [vmem:[%s5691_s6 + $0x50] sm:$0xff] }
 0x682   :  { %v814_v45 = vmul.f32 %v2689_v42, %v813_v54 }
 0x684   :  { %v815_v36 = vadd.f32 %v2689_v42, %v814_v45 }
 0x686   :  { %v819_v43 = vsel %vm818_vm2, %v2689_v42, %v815_v36  ;;  %v4468_v42 = vld [vmem:[%s5691_s6 + $0x60] sm:$0xff] }
 0x687   :  { %v4492_v36 = vld [vmem:[%s5691_s6 + $0x40] sm:$0xff] }
 0x6c9   :  { %v983_v25 = vpop.f32.mrf.mxu3 }
 0x6ca   :  { %v984_v12 = vadd.f32 %v983_v25, %v960_v61  ;;  %v820_v25 = vand.u32 2147483647, %v795_v6 }
 0x6cc   :  { %v989_v49 = vadd.f32 %v2558_v40, %v984_v12  ;;  %vm821_vm3 = vcmp.eq.f32.partialorder %v820_v25, 8.507059e+37  ;;  %v4510_v25 = vld [vmem:[%s5691_s6 + $0x28] sm:$0xff] }
 0x6cd   :  { %v824_v55 = vsel %vm821_vm3, %v823_v59, %v819_v43  ;;  %v4534_v43 = vld [vmem:[%s5691_s6 + $0x8] sm:$0xff] }
 0x6ce   :  { %2690 = vtanh.f32 %v989_v49  ;;  %v994_v45 = vmul.f32 %v824_v55, %v3950_v56  ;;  %v4462_v56 = vld [vmem:[%s5691_s6 + $0x68] sm:$0xff]  ;;  %6028 = vst [vmem:[#allocation53_spill] sm:$0xff] %v4534_v43 }
 0x6d1   :  { %v986_v52 = vpop.f32.mrf.mxu3 }
 0x6d2   :  { %v987_v61 = vadd.f32 %v986_v52, %v963_v32  ;;  %v996_v52 = vsub.f32 1.0, %v824_v55  ;;  %v4486_v32 = vld [vmem:[%s5691_s6 + $0x48] sm:$0xff] }
 0x6d4   :  { %v2691_v40 = vpop.eup %2690  ;;  %v990_v13 = vadd.f32 %v2559_v11, %v987_v61  ;;  %v4498_v61 = vld [vmem:[%s5691_s6 + $0x38] sm:$0xff] }
 0x6d5   :  { %v997_v54 = vmul.f32 %v2691_v40, %v995_v4  ;;  %v4504_v4 = vld [vmem:[%s5691_s6 + $0x30] sm:$0xff]  ;;  %v4516_v40 = vld [vmem:[%s5691_s6 + $0x20] sm:$0xff] }
 0x6d6   :  { %2692 = vtanh.f32 %v990_v13  ;;  %v4522_v13 = vld [vmem:[%s5691_s6 + $0x18] sm:$0xff] }
 0x6d7   :  { %v4416_v12 = vadd.f32 %v997_v54, %v993_v30  ;;  %v4528_v54 = vld [vmem:[%s5691_s6 + $0x10] sm:$0xff]  ;;  %v4540_v30 = vld [vmem:[%s5691_s6] sm:$0xff] }
 0x6d8   :  { %6029 = vst [vmem:[#allocation54_spill] sm:$0xff] %v4540_v30 }
 0x6d9   :  { %1043 = vmatmul.f32.vlgmr.msrb.gmra.mxu1 %v4416_v12  ;;  %1132 = vmatmul.f32.vlgmr.msrb.gmra.mxu2 %v4416_v12 }
 0x6dc   :  { %v2693_v49 = vpop.eup %2692 }
 0x6dd   :  { %v998_v6 = vmul.f32 %v2693_v49, %v996_v52  ;;  %v6030_v52 = vld [vmem:[#allocation50_spill] sm:$0xff]  ;;  %v6031_v49 = vld [vmem:[#allocation39_spill] sm:$0xff] }
 0x6df   :  { %v4421_v11 = vadd.f32 %v998_v6, %v994_v45  ;;  %v6032_v6 = vld [vmem:[#allocation40_spill] sm:$0xff]  ;;  %v6033_v45 = vld [vmem:[#allocation41_spill] sm:$0xff] }
 0x6e1   :  { %1015 = vmatpush.msra.mxu0 %v4421_v11  ;;  %1046 = vmatmul.f32.gmra.mxu1 %v4421_v11 }
 0x6e2   :  { %1135 = vmatmul.f32.gmra.mxu2 %v4421_v11 }
 0x6e3   :  { %1016 = vmatpush.msra.mxu0 %v4416_v12 }
 0x6e4   :  { %2560 = vmatmul.msk.f32.vlgmr.msra.gmra.mxu0 %vm136_vm0, %v3838_v14 }
 0x6e5   :  { %1050 = vmatpush.msrb.mxu0 %v3961_v15 }
 0x6e7   :  { %1051 = vmatpush.msrb.mxu0 %v3967_v29 }
 0x6e9   :  { %1052 = vmatpush.msrb.mxu0 %v3973_v53 }
 0x6eb   :  { %1053 = vmatpush.msrb.mxu0 %v3979_v46 }
 0x6ec   :  { %2561 = vmatmul.msk.f32.gmra.mxu0 %vm136_vm0, %v3985_v8 }
 0x6ed   :  { %1054 = vmatpush.msrb.mxu0 %v3992_v1 }
 0x6ef   :  { %1055 = vmatpush.msrb.mxu0 %v3998_v3 }
 0x6f1   :  { %1056 = vmatpush.msrb.mxu0 %v4004_v5 }
 0x6f3   :  { %1057 = vmatpush.msrb.mxu0 %v4010_v10 }
 0x6f5   :  { %1058 = vmatpush.msrb.mxu0 %v4016_v19 }
 0x6f7   :  { %1059 = vmatpush.msrb.mxu0 %v4022_v23 }
 0x6f9   :  { %1060 = vmatpush.msrb.mxu0 %v4028_v27 }
 0x6fb   :  { %1061 = vmatpush.msrb.mxu0 %v4034_v31 }
 0x6fd   :  { %1062 = vmatpush.msrb.mxu0 %v4040_v35 }
 0x6ff   :  { %1063 = vmatpush.msrb.mxu0 %v4046_v39 }
 0x701   :  { %1064 = vmatpush.msrb.mxu0 %v4052_v41 }
 0x703   :  { %1065 = vmatpush.msrb.mxu0 %v4058_v47 }
 0x705   :  { %1230 = vmatpush.msra.mxu0 %v4450_v44 }
 0x707   :  { %1231 = vmatpush.msra.mxu0 %v4456_v33 }
 0x709   :  { %1232 = vmatpush.msra.mxu0 %v4462_v56 }
 0x70b   :  { %1233 = vmatpush.msra.mxu0 %v4468_v42 }
 0x70d   :  { %1234 = vmatpush.msra.mxu0 %v4474_v62 }
 0x70f   :  { %1235 = vmatpush.msra.mxu0 %v4480_v37 }
 0x711   :  { %1236 = vmatpush.msra.mxu0 %v4486_v32 }
 0x713   :  { %1237 = vmatpush.msra.mxu0 %v4492_v36 }
 0x715   :  { %1238 = vmatpush.msra.mxu0 %v4498_v61 }
 0x717   :  { %1239 = vmatpush.msra.mxu0 %v4504_v4 }
 0x719   :  { %1240 = vmatpush.msra.mxu0 %v4510_v25 }
 0x71b   :  { %1241 = vmatpush.msra.mxu0 %v4516_v40 }
 0x71d   :  { %1242 = vmatpush.msra.mxu0 %v4522_v13 }
 0x71f   :  { %1243 = vmatpush.msra.mxu0 %v4528_v54 }
 0x721   :  { %1244 = vmatpush.msra.mxu0 %v4534_v43 }
 0x723   :  { %1245 = vmatpush.msra.mxu0 %v4540_v30 }
 0x761   :  { %v1018_v59 = vpop.f32.mrf.mxu0 }
 0x762   :  { %1066 = vmatmul.f32.vlgmr.msrb.gmra.mxu0 %v1018_v59  ;;  %1155 = vmatmul.f32.vlgmr.msra.gmra.mxu3 %v1018_v59  ;;  %v6034_v59 = vld [vmem:[#allocation42_spill] sm:$0xff] }
 0x763   :  { %1403 = vmatpush.msrb.mxu0 %v4080_v2 }
 0x765   :  { %1404 = vmatpush.msrb.mxu0 %v4086_v57 }
 0x767   :  { %1405 = vmatpush.msrb.mxu0 %v4092_v58 }
 0x769   :  { %v1021_v55 = vpop.f32.mrf.mxu0  ;;  %1406 = vmatpush.msrb.mxu0 %v4098_v26 }
 0x76a   :  { %1069 = vmatmul.f32.gmra.mxu0 %v1021_v55  ;;  %1158 = vmatmul.f32.gmra.mxu3 %v1021_v55  ;;  %v1133_v55 = vpop.f32.mrf.mxu2 }
 0x76b   :  { %1407 = vmatpush.msrb.mxu0 %v4104_v18 }
 0x76d   :  { %1408 = vmatpush.msrb.mxu0 %v4110_v7 }
 0x76f   :  { %1409 = vmatpush.msrb.mxu0 %v4116_v9 }
 0x771   :  { %1410 = vmatpush.msrb.mxu0 %v4122_v22  ;;  %v2566_v22 = vld [vmem:[%s5686_s1 + $0x30] sm:$0xff] }
 0x773   :  { %1411 = vmatpush.msrb.mxu0 %v4128_v50 }
 0x775   :  { %1412 = vmatpush.msrb.mxu0 %v4134_v38 }
 0x777   :  { %1413 = vmatpush.msrb.mxu0 %v4140_v34  ;;  %v1136_v34 = vpop.f32.mrf.mxu2 }
 0x779   :  { %1414 = vmatpush.msrb.mxu0 %v6030_v52 }
 0x77b   :  { %1415 = vmatpush.msrb.mxu0 %v6031_v49  ;;  %v2567_v49 = vld [vmem:[%s5686_s1 + $0x38] sm:$0xff] }
 0x77d   :  { %1416 = vmatpush.msrb.mxu0 %v6032_v6 }
 0x77f   :  { %1417 = vmatpush.msrb.mxu0 %v6033_v45 }
 0x781   :  { %1418 = vmatpush.msrb.mxu0 %v6034_v59 }
 0x7e5   :  { %v1156_v50 = vpop.f32.mrf.mxu3 }
 0x7e6   :  { %v1157_v9 = vadd.f32 %v1156_v50, %v1133_v55 }
 0x7e8   :  { %v1162_v38 = vadd.f32 %v2566_v22, %v1157_v9 }
 0x7ea   :  { %v2568_v7 = vmul.f32 -1.442695, %v1162_v38 }
 0x7ec   :  { %2694 = vpow2.f32 %v2568_v7 }
 0x7ed   :  { %v1159_v6 = vpop.f32.mrf.mxu3 }
 0x7ee   :  { %v1160_v52 = vadd.f32 %v1159_v6, %v1136_v34 }
 0x7f0   :  { %v1163_v45 = vadd.f32 %v2567_v49, %v1160_v52 }
 0x7f2   :  { %v2695_v18 = vpop.eup %2694  ;;  %v2569_v59 = vmul.f32 -1.442695, %v1163_v45 }
 0x7f3   :  { %v1170_v26 = vadd.f32 1.0, %v2695_v18 }
 0x7f4   :  { %2696 = vpow2.f32 %v2569_v59 }
 0x7f5   :  { %2698 = vrcp.f32 %v1170_v26  ;;  %v1183_v7 = vand.u32 2147483648, %v1170_v26  ;;  %v1181_v38 = vand.u32 2147483647, %v1170_v26  ;;  %vm1177_vm5 = vweird.f32 %v1170_v26 }
 0x7f7   :  { %v1184_v34 = vor.u32 1.1754944e-38, %v1183_v7  ;;  %vm1182_vm7 = vcmp.eq.f32.partialorder %v1181_v38, 8.507059e+37  ;;  %v4614_v38 = vld [vmem:[%s5691_s6 + $0x80] sm:$0xff] }
 0x7f8   :  { %6040 = vst [vmem:[#allocation60_spill] sm:$0xff] %v4614_v38 }
 0x7fa   :  { %v2697_v58 = vpop.eup %2696 }
 0x7fb   :  { %v2699_v57 = vpop.eup %2698  ;;  %v1171_v2 = vadd.f32 1.0, %v2697_v58 }
 0x7fc   :  { %v1173_v50 = vmul.f32 %v2699_v57, %v1170_v26  ;;  %vm1178_vm4 = vweird.f32 %v2699_v57 }
 0x7fd   :  { %2700 = vrcp.f32 %v1171_v2  ;;  %vm1179_vm6 = vmor %vm1177_vm5, %vm1178_vm4  ;;  %v1198_v58 = vand.u32 2147483648, %v1171_v2  ;;  %vm1192_vm9 = vweird.f32 %v1171_v2 }
 0x7fe   :  { %v1174_v9 = vsub.f32 1.0, %v1173_v50  ;;  %v1196_v50 = vand.u32 2147483647, %v1171_v2 }
 0x800   :  { %v1175_v22 = vmul.f32 %v2699_v57, %v1174_v9  ;;  %vm1197_vm11 = vcmp.eq.f32.partialorder %v1196_v50, 8.507059e+37  ;;  %v6050_v50 = vld [vmem:[#allocation20_spill] sm:$0xff] }
 0x802   :  { %v1176_v55 = vadd.f32 %v2699_v57, %v1175_v22  ;;  %v1199_v22 = vor.u32 1.1754944e-38, %v1198_v58  ;;  %v6048_v58 = vld [vmem:[#allocation51_spill] sm:$0xff] }
 0x803   :  { %v2701_v30 = vpop.eup %2700 }
 0x804   :  { %v1188_v52 = vmul.f32 %v2701_v30, %v1171_v2  ;;  %v1180_v49 = vsel %vm1179_vm6, %v2699_v57, %v1176_v55  ;;  %vm1193_vm8 = vweird.f32 %v2701_v30  ;;  %v4590_v2 = vld [vmem:[%s5691_s6 + $0xa0] sm:$0xff]  ;;  %v4596_v57 = vld [vmem:[%s5691_s6 + $0x98] sm:$0xff] }
 0x805   :  { %v1185_v18 = vsel %vm1182_vm7, %v1184_v34, %v1180_v49  ;;  %vm1194_vm10 = vmor %vm1192_vm9, %vm1193_vm8  ;;  %6036 = vst [vmem:[#allocation56_spill] sm:$0xff] %v4590_v2  ;;  %v6041_v55 = vld [vmem:[#allocation5_spill] sm:$0xff]  ;;  %v6042_v34 = vld [vmem:[#allocation6_spill] sm:$0xff] }
 0x806   :  { %v1189_v6 = vsub.f32 1.0, %v1188_v52  ;;  %v1202_v45 = vmul.f32 %v1185_v18, %v4416_v12  ;;  %6037 = vst [vmem:[#allocation57_spill] sm:$0xff] %v4596_v57  ;;  %v6043_v52 = vld [vmem:[#allocation7_spill] sm:$0xff]  ;;  %v6044_v49 = vld [vmem:[#allocation44_spill] sm:$0xff]  ;;  %v6045_v18 = vld [vmem:[#allocation45_spill] sm:$0xff] }
 0x808   :  { %1246 = vmatmul.f32.vlgmr.msra.gmra.mxu0 %v1202_v45  ;;  %v1190_v59 = vmul.f32 %v2701_v30, %v1189_v6  ;;  %v6046_v6 = vld [vmem:[#allocation47_spill] sm:$0xff] }
 0x80a   :  { %v1191_v9 = vadd.f32 %v2701_v30, %v1190_v59  ;;  %v6049_v59 = vld [vmem:[#allocation52_spill] sm:$0xff] }
 0x80c   :  { %v1195_v26 = vsel %vm1194_vm10, %v2701_v30, %v1191_v9  ;;  %v4608_v30 = vld [vmem:[%s5691_s6 + $0x88] sm:$0xff] }
 0x80d   :  { %v1200_v43 = vsel %vm1197_vm11, %v1199_v22, %v1195_v26  ;;  %6039 = vst [vmem:[#allocation59_spill] sm:$0xff] %v4608_v30  ;;  %v6052_v9 = vld [vmem:[#allocation26_spill] sm:$0xff]  ;;  %v6053_v22 = vld [vmem:[#allocation29_spill] sm:$0xff]  ;;  %v6054_v26 = vld [vmem:[#allocation32_spill] sm:$0xff] }
 0x80e   :  { %v1203_v7 = vmul.f32 %v1200_v43, %v4421_v11  ;;  %v4602_v43 = vld [vmem:[%s5691_s6 + $0x90] sm:$0xff] }
 0x80f   :  { %6038 = vst [vmem:[#allocation58_spill] sm:$0xff] %v4602_v43 }
 0x810   :  { %1218 = vmatpush.msra.mxu1 %v1203_v7  ;;  %1249 = vmatmul.f32.gmra.mxu0 %v1203_v7  ;;  %v6055_v7 = vld [vmem:[#allocation35_spill] sm:$0xff] }
 0x812   :  { %1219 = vmatpush.msra.mxu1 %v1202_v45  ;;  %v6047_v45 = vld [vmem:[#allocation49_spill] sm:$0xff] }
 0x813   :  { %2570 = vmatmul.msk.f32.vlgmr.msra.gmra.mxu1 %vm136_vm0, %v3838_v14  ;;  %v4584_v14 = vld [vmem:[%s5691_s6 + $0xa8] sm:$0xff] }
 0x814   :  { %1253 = vmatpush.msrb.mxu1 %v4186_v51  ;;  %6035 = vst [vmem:[#allocation55_spill] sm:$0xff] %v4584_v14 }
 0x816   :  { %1254 = vmatpush.msrb.mxu1 %v4192_v48 }
 0x818   :  { %1255 = vmatpush.msrb.mxu1 %v4198_v16 }
 0x81a   :  { %1256 = vmatpush.msrb.mxu1 %v4204_v21 }
 0x81b   :  { %2571 = vmatmul.msk.f32.gmra.mxu1 %vm136_vm0, %v3985_v8 }
 0x81c   :  { %1257 = vmatpush.msrb.mxu1 %v4212_v20 }
 0x81e   :  { %1258 = vmatpush.msrb.mxu1 %v4218_v24 }
 0x820   :  { %1259 = vmatpush.msrb.mxu1 %v4224_v0 }
 0x822   :  { %1260 = vmatpush.msrb.mxu1 %v4230_v28 }
 0x824   :  { %1261 = vmatpush.msrb.mxu1 %v4236_v60 }
 0x826   :  { %1262 = vmatpush.msrb.mxu1 %v4242_v63 }
 0x828   :  { %1263 = vmatpush.msrb.mxu1 %v4584_v14 }
 0x82a   :  { %1264 = vmatpush.msrb.mxu1 %v4590_v2  ;;  %v2573_v2 = vld [vmem:[%s5687_s2 + $0x38] sm:$0xff] }
 0x82c   :  { %1265 = vmatpush.msrb.mxu1 %v4596_v57 }
 0x82e   :  { %1266 = vmatpush.msrb.mxu1 %v4602_v43 }
 0x830   :  { %1267 = vmatpush.msrb.mxu1 %v4608_v30 }
 0x832   :  { %1268 = vmatpush.msrb.mxu1 %v4614_v38 }
 0x834   :  { %1426 = vmatpush.msra.mxu1 %v3863_v17  ;;  %v6051_v17 = vld [vmem:[#allocation23_spill] sm:$0xff] }
 0x836   :  { %1427 = vmatpush.msra.mxu1 %v6041_v55  ;;  %v1044_v55 = vpop.f32.mrf.mxu1 }
 0x838   :  { %1428 = vmatpush.msra.mxu1 %v6042_v34 }
 0x83a   :  { %1429 = vmatpush.msra.mxu1 %v6043_v52 }
 0x83c   :  { %1430 = vmatpush.msra.mxu1 %v6044_v49 }
 0x83e   :  { %1431 = vmatpush.msra.mxu1 %v6045_v18  ;;  %v1047_v34 = vpop.f32.mrf.mxu1 }
 0x840   :  { %1432 = vmatpush.msra.mxu1 %v6046_v6  ;;  %v6064_v6 = vld [vmem:[#allocation21_spill] sm:$0xff] }
 0x842   :  { %1433 = vmatpush.msra.mxu1 %v6047_v45  ;;  %v6056_v45 = vld [vmem:[#allocation8_spill] sm:$0xff] }
 0x844   :  { %1434 = vmatpush.msra.mxu1 %v6048_v58  ;;  %v6057_v58 = vld [vmem:[#allocation9_spill] sm:$0xff] }
 0x846   :  { %1435 = vmatpush.msra.mxu1 %v6049_v59  ;;  %v6058_v59 = vld [vmem:[#allocation10_spill] sm:$0xff] }
 0x848   :  { %1436 = vmatpush.msra.mxu1 %v6050_v50 }
 0x84a   :  { %1437 = vmatpush.msra.mxu1 %v6051_v17  ;;  %v6059_v17 = vld [vmem:[#allocation11_spill] sm:$0xff] }
 0x84c   :  { %1438 = vmatpush.msra.mxu1 %v6052_v9  ;;  %v6060_v9 = vld [vmem:[#allocation12_spill] sm:$0xff] }
 0x84e   :  { %1439 = vmatpush.msra.mxu1 %v6053_v22  ;;  %v6061_v22 = vld [vmem:[#allocation14_spill] sm:$0xff] }
 0x850   :  { %1440 = vmatpush.msra.mxu1 %v6054_v26  ;;  %v6062_v26 = vld [vmem:[#allocation16_spill] sm:$0xff] }
 0x852   :  { %1441 = vmatpush.msra.mxu1 %v6055_v7  ;;  %v6063_v7 = vld [vmem:[#allocation18_spill] sm:$0xff] }
 0x890   :  { %v1221_v52 = vpop.f32.mrf.mxu1 }
 0x891   :  { %1269 = vmatmul.f32.vlgmr.msrb.gmra.mxu1 %v1221_v52  ;;  %v6065_v52 = vld [vmem:[#allocation24_spill] sm:$0xff] }
 0x892   :  { %1601 = vmatpush.msrb.mxu1 %v6056_v45  ;;  %v6066_v45 = vld [vmem:[#allocation27_spill] sm:$0xff] }
 0x894   :  { %1602 = vmatpush.msrb.mxu1 %v6057_v58  ;;  %v6067_v58 = vld [vmem:[#allocation30_spill] sm:$0xff] }
 0x896   :  { %1603 = vmatpush.msrb.mxu1 %v6058_v59  ;;  %v6068_v59 = vld [vmem:[#allocation33_spill] sm:$0xff] }
 0x898   :  { %v1224_v50 = vpop.f32.mrf.mxu1  ;;  %1604 = vmatpush.msrb.mxu1 %v6059_v17  ;;  %v6069_v17 = vld [vmem:[#allocation36_spill] sm:$0xff] }
 0x899   :  { %1272 = vmatmul.f32.gmra.mxu1 %v1224_v50  ;;  %v6070_v50 = vld [vmem:[#allocation37_spill] sm:$0xff] }
 0x89a   :  { %1605 = vmatpush.msrb.mxu1 %v6060_v9  ;;  %v6071_v9 = vld [vmem:[#allocation38_spill] sm:$0xff] }
 0x89c   :  { %1606 = vmatpush.msrb.mxu1 %v6061_v22  ;;  %v1067_v22 = vpop.f32.mrf.mxu0 }
 0x89e   :  { %1607 = vmatpush.msrb.mxu1 %v6062_v26  ;;  %v1068_v26 = vadd.f32 %v1067_v22, %v1044_v55 }
 0x8a0   :  { %1608 = vmatpush.msrb.mxu1 %v6063_v7 }
 0x8a2   :  { %1609 = vmatpush.msrb.mxu1 %v6064_v6  ;;  %v2562_v6 = vld [vmem:[%s5685_s0 + $0x30] sm:$0xff] }
 0x8a3   :  { %v1073_v7 = vadd.f32 %v2562_v6, %v1068_v26 }
 0x8a4   :  { %1610 = vmatpush.msrb.mxu1 %v6065_v52  ;;  %v1070_v52 = vpop.f32.mrf.mxu0 }
 0x8a5   :  { %v2564_v18 = vmul.f32 -1.442695, %v1073_v7 }
 0x8a6   :  { %1611 = vmatpush.msrb.mxu1 %v6066_v45  ;;  %v1071_v45 = vadd.f32 %v1070_v52, %v1047_v34 }
 0x8a7   :  { %2702 = vpow2.f32 %v2564_v18  ;;  %v2572_v18 = vld [vmem:[%s5687_s2 + $0x30] sm:$0xff] }
 0x8a8   :  { %1612 = vmatpush.msrb.mxu1 %v6067_v58 }
 0x8aa   :  { %1613 = vmatpush.msrb.mxu1 %v6068_v59  ;;  %v2563_v59 = vld [vmem:[%s5685_s0 + $0x38] sm:$0xff] }
 0x8ac   :  { %1614 = vmatpush.msrb.mxu1 %v6069_v17  ;;  %v1074_v17 = vadd.f32 %v2563_v59, %v1071_v45  ;;  %v1247_v52 = vpop.f32.mrf.mxu0 }
 0x8ae   :  { %1615 = vmatpush.msrb.mxu1 %v6070_v50  ;;  %v2565_v58 = vmul.f32 -1.442695, %v1074_v17  ;;  %v2703_v50 = vpop.eup %2702 }
 0x8b0   :  { %1616 = vmatpush.msrb.mxu1 %v6071_v9  ;;  %2704 = vpow2.f32 %v2565_v58  ;;  %v1081_v9 = vadd.f32 1.0, %v2703_v50 }
 0x8b2   :  { %2706 = vrcp.f32 %v1081_v9  ;;  %v1094_v58 = vand.u32 2147483648, %v1081_v9  ;;  %vm1088_vm13 = vweird.f32 %v1081_v9  ;;  %v1092_v17 = vand.u32 2147483647, %v1081_v9 }
 0x8b4   :  { %v1095_v57 = vor.u32 1.1754944e-38, %v1094_v58  ;;  %vm1093_vm15 = vcmp.eq.f32.partialorder %v1092_v17, 8.507059e+37 }
 0x8b6   :  { %v2705_v22 = vpop.eup %2704 }
 0x8b7   :  { %v1082_v55 = vadd.f32 1.0, %v2705_v22 }
 0x8b8   :  { %v2707_v49 = vpop.eup %2706 }
 0x8b9   :  { %2708 = vrcp.f32 %v1082_v55  ;;  %v1084_v38 = vmul.f32 %v2707_v49, %v1081_v9  ;;  %vm1089_vm12 = vweird.f32 %v2707_v49  ;;  %v1109_v63 = vand.u32 2147483648, %v1082_v55 }
 0x8ba   :  { %vm1090_vm14 = vmor %vm1088_vm13, %vm1089_vm12  ;;  %vm1103_vm2 = vweird.f32 %v1082_v55 }
 0x8bb   :  { %v1085_v6 = vsub.f32 1.0, %v1084_v38  ;;  %v1110_v58 = vor.u32 1.1754944e-38, %v1109_v63  ;;  %v4676_v63 = vld [vmem:[%s5688_s3] sm:$0xff] }
 0x8bd   :  { %v1086_v7 = vmul.f32 %v2707_v49, %v1085_v6 }
 0x8bf   :  { %v2709_v26 = vpop.eup %2708  ;;  %v1087_v43 = vadd.f32 %v2707_v49, %v1086_v7 }
 0x8c0   :  { %v1099_v34 = vmul.f32 %v2709_v26, %v1082_v55  ;;  %vm1104_vm1 = vweird.f32 %v2709_v26 }
 0x8c1   :  { %v1091_v38 = vsel %vm1090_vm14, %v2707_v49, %v1087_v43  ;;  %vm1105_vm3 = vmor %vm1103_vm2, %vm1104_vm1 }
 0x8c2   :  { %v1100_v30 = vsub.f32 1.0, %v1099_v34  ;;  %v1096_v6 = vsel %vm1093_vm15, %v1095_v57, %v1091_v38  ;;  %v1250_v34 = vpop.f32.mrf.mxu0 }
 0x8c3   :  { %v1282_v9 = vsub.f32 1.0, %v1096_v6  ;;  %v1280_v57 = vmul.f32 %v1096_v6, %v4416_v12  ;;  %v6087_v12 = vld [vmem:[#allocation40_spill] sm:$0xff] }
 0x8c4   :  { %v1101_v22 = vmul.f32 %v2709_v26, %v1100_v30  ;;  %v2580_v6 = vld [vmem:[%s5686_s1 + $0x40] sm:$0xff] }
 0x8c6   :  { %v1102_v7 = vadd.f32 %v2709_v26, %v1101_v22 }
 0x8c8   :  { %v1106_v49 = vsel %vm1105_vm3, %v2709_v26, %v1102_v7  ;;  %v6089_v26 = vld [vmem:[#allocation42_spill] sm:$0xff] }
 0x90e   :  { %v1270_v45 = vpop.f32.mrf.mxu1 }
 0x90f   :  { %v1271_v59 = vadd.f32 %v1270_v45, %v1247_v52  ;;  %v1107_v45 = vand.u32 2147483647, %v1082_v55 }
 0x911   :  { %v1276_v50 = vadd.f32 %v2572_v18, %v1271_v59  ;;  %vm1108_vm4 = vcmp.eq.f32.partialorder %v1107_v45, 8.507059e+37 }
 0x912   :  { %v1111_v17 = vsel %vm1108_vm4, %v1110_v58, %v1106_v49 }
 0x913   :  { %2710 = vtanh.f32 %v1276_v50  ;;  %v1281_v22 = vmul.f32 %v1111_v17, %v4421_v11  ;;  %v6088_v11 = vld [vmem:[#allocation41_spill] sm:$0xff] }
 0x916   :  { %v1273_v14 = vpop.f32.mrf.mxu1 }
 0x917   :  { %v1274_v52 = vadd.f32 %v1273_v14, %v1250_v34  ;;  %v1283_v14 = vsub.f32 1.0, %v1111_v17 }
 0x919   :  { %v2711_v18 = vpop.eup %2710  ;;  %v1277_v43 = vadd.f32 %v2573_v2, %v1274_v52 }
 0x91a   :  { %v1284_v30 = vmul.f32 %v2711_v18, %v1282_v9  ;;  %v2581_v18 = vld [vmem:[%s5686_s1 + $0x48] sm:$0xff] }
 0x91b   :  { %2712 = vtanh.f32 %v1277_v43 }
 0x91c   :  { %v4662_v59 = vadd.f32 %v1284_v30, %v1280_v57 }
 0x91e   :  { %1330 = vmatmul.f32.vlgmr.msrb.gmra.mxu3 %v4662_v59  ;;  %1419 = vmatmul.f32.vlgmr.msrb.gmra.mxu0 %v4662_v59 }
 0x921   :  { %v2713_v50 = vpop.eup %2712 }
 0x922   :  { %v1285_v55 = vmul.f32 %v2713_v50, %v1283_v14 }
 0x924   :  { %v4667_v2 = vadd.f32 %v1285_v55, %v1281_v22 }
 0x926   :  { %1302 = vmatpush.msra.mxu2 %v4667_v2  ;;  %1333 = vmatmul.f32.gmra.mxu3 %v4667_v2 }
 0x927   :  { %1422 = vmatmul.f32.gmra.mxu0 %v4667_v2 }
 0x928   :  { %1303 = vmatpush.msra.mxu2 %v4662_v59 }
 0x929   :  { %2574 = vmatmul.msk.f32.vlgmr.msra.gmra.mxu2 %vm136_vm0, %v4676_v63 }
 0x92a   :  { %1337 = vmatpush.msrb.mxu2 %v3961_v15  ;;  %v6072_v15 = vld [vmem:[#allocation53_spill] sm:$0xff] }
 0x92c   :  { %1338 = vmatpush.msrb.mxu2 %v3967_v29  ;;  %v6073_v29 = vld [vmem:[#allocation54_spill] sm:$0xff] }
 0x92e   :  { %1339 = vmatpush.msrb.mxu2 %v3973_v53 }
 0x930   :  { %1340 = vmatpush.msrb.mxu2 %v3979_v46  ;;  %v6074_v46 = vld [vmem:[#allocation13_spill] sm:$0xff] }
 0x931   :  { %2575 = vmatmul.msk.f32.gmra.mxu2 %vm136_vm0, %v3985_v8  ;;  %v6075_v8 = vld [vmem:[#allocation15_spill] sm:$0xff] }
 0x932   :  { %1341 = vmatpush.msrb.mxu2 %v3992_v1  ;;  %v6076_v1 = vld [vmem:[#allocation17_spill] sm:$0xff] }
 0x934   :  { %1342 = vmatpush.msrb.mxu2 %v3998_v3 }
 0x936   :  { %1343 = vmatpush.msrb.mxu2 %v4004_v5  ;;  %v6077_v5 = vld [vmem:[#allocation19_spill] sm:$0xff] }
 0x938   :  { %1344 = vmatpush.msrb.mxu2 %v4010_v10  ;;  %v6078_v10 = vld [vmem:[#allocation22_spill] sm:$0xff] }
 0x93a   :  { %1345 = vmatpush.msrb.mxu2 %v4016_v19  ;;  %v6079_v19 = vld [vmem:[#allocation25_spill] sm:$0xff] }
 0x93c   :  { %1346 = vmatpush.msrb.mxu2 %v4022_v23  ;;  %v6080_v23 = vld [vmem:[#allocation28_spill] sm:$0xff] }
 0x93e   :  { %1347 = vmatpush.msrb.mxu2 %v4028_v27  ;;  %v6081_v27 = vld [vmem:[#allocation31_spill] sm:$0xff] }
 0x940   :  { %1348 = vmatpush.msrb.mxu2 %v4034_v31  ;;  %v6082_v31 = vld [vmem:[#allocation34_spill] sm:$0xff] }
 0x942   :  { %1349 = vmatpush.msrb.mxu2 %v4040_v35  ;;  %v6083_v35 = vld [vmem:[#allocation46_spill] sm:$0xff] }
 0x944   :  { %1350 = vmatpush.msrb.mxu2 %v4046_v39  ;;  %v6084_v39 = vld [vmem:[#allocation48_spill] sm:$0xff] }
 0x946   :  { %1351 = vmatpush.msrb.mxu2 %v4052_v41  ;;  %v6085_v41 = vld [vmem:[#allocation50_spill] sm:$0xff] }
 0x948   :  { %1352 = vmatpush.msrb.mxu2 %v4058_v47  ;;  %v6086_v47 = vld [vmem:[#allocation39_spill] sm:$0xff] }
 0x94a   :  { %1517 = vmatpush.msra.mxu2 %v4450_v44 }
 0x94c   :  { %1518 = vmatpush.msra.mxu2 %v4456_v33 }
 0x94e   :  { %1519 = vmatpush.msra.mxu2 %v4462_v56 }
 0x950   :  { %1520 = vmatpush.msra.mxu2 %v4468_v42 }
 0x952   :  { %1521 = vmatpush.msra.mxu2 %v4474_v62 }
 0x954   :  { %1522 = vmatpush.msra.mxu2 %v4480_v37 }
 0x956   :  { %1523 = vmatpush.msra.mxu2 %v4486_v32 }
 0x958   :  { %1524 = vmatpush.msra.mxu2 %v4492_v36 }
 0x95a   :  { %1525 = vmatpush.msra.mxu2 %v4498_v61 }
 0x95c   :  { %1526 = vmatpush.msra.mxu2 %v4504_v4 }
 0x95e   :  { %1527 = vmatpush.msra.mxu2 %v4510_v25 }
 0x960   :  { %1528 = vmatpush.msra.mxu2 %v4516_v40 }
 0x962   :  { %1529 = vmatpush.msra.mxu2 %v4522_v13 }
 0x964   :  { %1530 = vmatpush.msra.mxu2 %v4528_v54 }
 0x966   :  { %1531 = vmatpush.msra.mxu2 %v6072_v15 }
 0x968   :  { %1532 = vmatpush.msra.mxu2 %v6073_v29 }
 0x99b   :  { %v1420_v38 = vpop.f32.mrf.mxu0 }
 0x9a4   :  { %v1423_v45 = vpop.f32.mrf.mxu0 }
 0x9ac   :  { %v1305_v53 = vpop.f32.mrf.mxu2 }
 0x9ad   :  { %1353 = vmatmul.f32.vlgmr.msrb.gmra.mxu2 %v1305_v53  ;;  %1442 = vmatmul.f32.vlgmr.msra.gmra.mxu1 %v1305_v53 }
 0x9ae   :  { %1690 = vmatpush.msrb.mxu2 %v6074_v46 }
 0x9b0   :  { %1691 = vmatpush.msrb.mxu2 %v6075_v8 }
 0x9b2   :  { %1692 = vmatpush.msrb.mxu2 %v6076_v1 }
 0x9b4   :  { %v1308_v3 = vpop.f32.mrf.mxu2  ;;  %1693 = vmatpush.msrb.mxu2 %v6077_v5 }
 0x9b5   :  { %1356 = vmatmul.f32.gmra.mxu2 %v1308_v3  ;;  %1445 = vmatmul.f32.gmra.mxu1 %v1308_v3 }
 0x9b6   :  { %1694 = vmatpush.msrb.mxu2 %v6078_v10 }
 0x9b8   :  { %1695 = vmatpush.msrb.mxu2 %v6079_v19 }
 0x9ba   :  { %1696 = vmatpush.msrb.mxu2 %v6080_v23 }
 0x9bc   :  { %1697 = vmatpush.msrb.mxu2 %v6081_v27 }
 0x9be   :  { %1698 = vmatpush.msrb.mxu2 %v6082_v31 }
 0x9c0   :  { %1699 = vmatpush.msrb.mxu2 %v6083_v35 }
 0x9c2   :  { %1700 = vmatpush.msrb.mxu2 %v6084_v39 }
 0x9c4   :  { %1701 = vmatpush.msrb.mxu2 %v6085_v41 }
 0x9c6   :  { %1702 = vmatpush.msrb.mxu2 %v6086_v47 }
 0x9c8   :  { %1703 = vmatpush.msrb.mxu2 %v6087_v12 }
 0x9ca   :  { %1704 = vmatpush.msrb.mxu2 %v6088_v11 }
 0x9cc   :  { %1705 = vmatpush.msrb.mxu2 %v6089_v26 }
 0xa2a   :  { %v1443_v34 = vpop.f32.mrf.mxu1 }
 0xa2b   :  { %v1444_v7 = vadd.f32 %v1443_v34, %v1420_v38  ;;  %v4747_v34 = vld [vmem:[%s5688_s3 + $0x8] sm:$0xff] }
 0xa2d   :  { %v1449_v52 = vadd.f32 %v2580_v6, %v1444_v7  ;;  %v6094_v7 = vld [vmem:[#allocation58_spill] sm:$0xff] }
 0xa2f   :  { %v2582_v9 = vmul.f32 -1.442695, %v1449_v52  ;;  %v6095_v52 = vld [vmem:[#allocation59_spill] sm:$0xff] }
 0xa31   :  { %2714 = vpow2.f32 %v2582_v9  ;;  %v6100_v9 = vld [vmem:[#allocation44_spill] sm:$0xff] }
 0xa32   :  { %v1446_v43 = vpop.f32.mrf.mxu1 }
 0xa33   :  { %v1447_v30 = vadd.f32 %v1446_v43, %v1423_v45  ;;  %v6101_v45 = vld [vmem:[#allocation45_spill] sm:$0xff] }
 0xa34   :  { %v6103_v43 = vld [vmem:[#allocation49_spill] sm:$0xff] }
 0xa35   :  { %v1450_v49 = vadd.f32 %v2581_v18, %v1447_v30  ;;  %v6102_v18 = vld [vmem:[#allocation47_spill] sm:$0xff] }
 0xa36   :  { %v6104_v30 = vld [vmem:[#allocation51_spill] sm:$0xff] }
 0xa37   :  { %v2715_v57 = vpop.eup %2714  ;;  %v2583_v58 = vmul.f32 -1.442695, %v1450_v49  ;;  %v6105_v49 = vld [vmem:[#allocation52_spill] sm:$0xff] }
 0xa38   :  { %v1457_v17 = vadd.f32 1.0, %v2715_v57  ;;  %v6106_v57 = vld [vmem:[#allocation20_spill] sm:$0xff] }
 0xa39   :  { %2716 = vpow2.f32 %v2583_v58  ;;  %v6107_v58 = vld [vmem:[#allocation23_spill] sm:$0xff] }
 0xa3a   :  { %2718 = vrcp.f32 %v1457_v17  ;;  %v1470_v46 = vand.u32 2147483648, %v1457_v17  ;;  %v1468_v1 = vand.u32 2147483647, %v1457_v17  ;;  %vm1464_vm6 = vweird.f32 %v1457_v17 }
 0xa3c   :  { %v1471_v10 = vor.u32 1.1754944e-38, %v1470_v46  ;;  %vm1469_vm8 = vcmp.eq.f32.partialorder %v1468_v1, 8.507059e+37  ;;  %v4808_v1 = vld [vmem:[%s5689_s4 + $0x70] sm:$0xff] }
 0xa3f   :  { %v2717_v14 = vpop.eup %2716 }
 0xa40   :  { %v2719_v50 = vpop.eup %2718  ;;  %v1458_v55 = vadd.f32 1.0, %v2717_v14  ;;  %v6109_v14 = vld [vmem:[#allocation29_spill] sm:$0xff] }
 0xa41   :  { %v1460_v22 = vmul.f32 %v2719_v50, %v1457_v17  ;;  %vm1465_vm5 = vweird.f32 %v2719_v50  ;;  %v6108_v17 = vld [vmem:[#allocation26_spill] sm:$0xff] }
 0xa42   :  { %2720 = vrcp.f32 %v1458_v55  ;;  %vm1466_vm7 = vmor %vm1464_vm6, %vm1465_vm5  ;;  %v1485_v39 = vand.u32 2147483648, %v1458_v55  ;;  %v1483_v47 = vand.u32 2147483647, %v1458_v55  ;;  %vm1479_vm10 = vweird.f32 %v1458_v55 }
 0xa43   :  { %v1461_v53 = vsub.f32 1.0, %v1460_v22  ;;  %v1331_v22 = vpop.f32.mrf.mxu3 }
 0xa44   :  { %v1486_v11 = vor.u32 1.1754944e-38, %v1485_v39  ;;  %vm1484_vm12 = vcmp.eq.f32.partialorder %v1483_v47, 8.507059e+37  ;;  %v6117_v39 = vld [vmem:[#allocation24_spill] sm:$0xff]  ;;  %v6119_v47 = vld [vmem:[#allocation30_spill] sm:$0xff] }
 0xa45   :  { %v1462_v8 = vmul.f32 %v2719_v50, %v1461_v53 }
 0xa47   :  { %v1463_v3 = vadd.f32 %v2719_v50, %v1462_v8  ;;  %v4802_v8 = vld [vmem:[%s5689_s4 + $0x78] sm:$0xff] }
 0xa48   :  { %v2721_v5 = vpop.eup %2720 }
 0xa49   :  { %v1475_v19 = vmul.f32 %v2721_v5, %v1458_v55  ;;  %v1467_v23 = vsel %vm1466_vm7, %v2719_v50, %v1463_v3  ;;  %vm1480_vm9 = vweird.f32 %v2721_v5  ;;  %v6110_v50 = vld [vmem:[#allocation32_spill] sm:$0xff]  ;;  %v6111_v55 = vld [vmem:[#allocation35_spill] sm:$0xff]  ;;  %v4814_v3 = vld [vmem:[%s5689_s4 + $0x68] sm:$0xff] }
 0xa4a   :  { %v1472_v27 = vsel %vm1469_vm8, %v1471_v10, %v1467_v23  ;;  %vm1481_vm11 = vmor %vm1479_vm10, %vm1480_vm9  ;;  %v4820_v10 = vld [vmem:[%s5689_s4 + $0x60] sm:$0xff]  ;;  %v6113_v23 = vld [vmem:[#allocation14_spill] sm:$0xff] }
 0xa4b   :  { %v1476_v31 = vsub.f32 1.0, %v1475_v19  ;;  %v1489_v35 = vmul.f32 %v1472_v27, %v4662_v59  ;;  %v1334_v53 = vpop.f32.mrf.mxu3  ;;  %v6112_v19 = vld [vmem:[#allocation12_spill] sm:$0xff] }
 0xa4c   :  { %v6114_v27 = vld [vmem:[#allocation16_spill] sm:$0xff] }
 0xa4d   :  { %1533 = vmatmul.f32.vlgmr.msra.gmra.mxu2 %v1489_v35  ;;  %v1477_v41 = vmul.f32 %v2721_v5, %v1476_v31  ;;  %v6115_v31 = vld [vmem:[#allocation18_spill] sm:$0xff] }
 0xa4f   :  { %v1478_v12 = vadd.f32 %v2721_v5, %v1477_v41  ;;  %v6118_v41 = vld [vmem:[#allocation27_spill] sm:$0xff] }
 0xa51   :  { %v1482_v26 = vsel %vm1481_vm11, %v2721_v5, %v1478_v12  ;;  %v6120_v12 = vld [vmem:[#allocation33_spill] sm:$0xff] }
 0xa52   :  { %v1487_v38 = vsel %vm1484_vm12, %v1486_v11, %v1482_v26  ;;  %v6121_v11 = vld [vmem:[#allocation36_spill] sm:$0xff]  ;;  %v6122_v26 = vld [vmem:[#allocation37_spill] sm:$0xff] }
 0xa53   :  { %v1490_v6 = vmul.f32 %v1487_v38, %v4667_v2  ;;  %v6123_v38 = vld [vmem:[#allocation38_spill] sm:$0xff] }
 0xa55   :  { %1505 = vmatpush.msra.mxu3 %v1490_v6  ;;  %1536 = vmatmul.f32.gmra.mxu2 %v1490_v6  ;;  %v1354_v6 = vpop.f32.mrf.mxu2 }
 0xa57   :  { %1506 = vmatpush.msra.mxu3 %v1489_v35  ;;  %v6116_v35 = vld [vmem:[#allocation21_spill] sm:$0xff] }
 0xa58   :  { %2584 = vmatmul.msk.f32.vlgmr.msra.gmra.mxu3 %vm136_vm0, %v4676_v63 }
 0xa59   :  { %1540 = vmatpush.msrb.mxu3 %v4186_v51  ;;  %v6090_v51 = vld [vmem:[#allocation43_spill] sm:$0xff] }
 0xa5b   :  { %1541 = vmatpush.msrb.mxu3 %v4192_v48  ;;  %v6091_v48 = vld [vmem:[#allocation55_spill] sm:$0xff] }
 0xa5d   :  { %1542 = vmatpush.msrb.mxu3 %v4198_v16  ;;  %v6092_v16 = vld [vmem:[#allocation56_spill] sm:$0xff] }
 0xa5f   :  { %1543 = vmatpush.msrb.mxu3 %v4204_v21  ;;  %v6093_v21 = vld [vmem:[#allocation57_spill] sm:$0xff] }
 0xa60   :  { %2585 = vmatmul.msk.f32.gmra.mxu3 %vm136_vm0, %v4747_v34 }
 0xa61   :  { %1544 = vmatpush.msrb.mxu3 %v4212_v20  ;;  %v6096_v20 = vld [vmem:[#allocation60_spill] sm:$0xff] }
 0xa63   :  { %1545 = vmatpush.msrb.mxu3 %v4218_v24  ;;  %v4766_v24 = vld [vmem:[%s5690_s5 + $0xf8] sm:$0xff] }
 0xa65   :  { %1546 = vmatpush.msrb.mxu3 %v4224_v0  ;;  %v4772_v0 = vld [vmem:[%s5690_s5 + $0xf0] sm:$0xff] }
 0xa66   :  { %6097 = vst [vmem:[#allocation5_spill] sm:$0xff] %v4772_v0 }
 0xa67   :  { %1547 = vmatpush.msrb.mxu3 %v4230_v28  ;;  %v4778_v28 = vld [vmem:[%s5690_s5 + $0xe8] sm:$0xff] }
 0xa68   :  { %6098 = vst [vmem:[#allocation6_spill] sm:$0xff] %v4778_v28 }
 0xa69   :  { %1548 = vmatpush.msrb.mxu3 %v4236_v60  ;;  %v4784_v60 = vld [vmem:[%s5690_s5 + $0xe0] sm:$0xff] }
 0xa6a   :  { %6099 = vst [vmem:[#allocation7_spill] sm:$0xff] %v4784_v60 }
 0xa6b   :  { %1549 = vmatpush.msrb.mxu3 %v6090_v51  ;;  %v1355_v51 = vadd.f32 %v1354_v6, %v1331_v22 }
 0xa6d   :  { %1550 = vmatpush.msrb.mxu3 %v6091_v48 }
 0xa6f   :  { %1551 = vmatpush.msrb.mxu3 %v6092_v16 }
 0xa71   :  { %1552 = vmatpush.msrb.mxu3 %v6093_v21 }
 0xa73   :  { %1553 = vmatpush.msrb.mxu3 %v6094_v7 }
 0xa75   :  { %1554 = vmatpush.msrb.mxu3 %v6095_v52 }
 0xa77   :  { %1555 = vmatpush.msrb.mxu3 %v6096_v20 }
 0xa79   :  { %1713 = vmatpush.msra.mxu3 %v4766_v24 }
 0xa7b   :  { %1714 = vmatpush.msra.mxu3 %v4772_v0 }
 0xa7d   :  { %1715 = vmatpush.msra.mxu3 %v4778_v28 }
 0xa7f   :  { %1716 = vmatpush.msra.mxu3 %v4784_v60 }
 0xa81   :  { %1717 = vmatpush.msra.mxu3 %v6100_v9  ;;  %v2576_v9 = vld [vmem:[%s5685_s0 + $0x40] sm:$0xff] }
 0xa83   :  { %1718 = vmatpush.msra.mxu3 %v6101_v45  ;;  %v1360_v45 = vadd.f32 %v2576_v9, %v1355_v51 }
 0xa85   :  { %1719 = vmatpush.msra.mxu3 %v6102_v18  ;;  %v1357_v18 = vpop.f32.mrf.mxu2 }
 0xa87   :  { %1720 = vmatpush.msra.mxu3 %v6103_v43  ;;  %v2578_v43 = vmul.f32 -1.442695, %v1360_v45 }
 0xa89   :  { %1721 = vmatpush.msra.mxu3 %v6104_v30  ;;  %v1358_v30 = vadd.f32 %v1357_v18, %v1334_v53  ;;  %2722 = vpow2.f32 %v2578_v43  ;;  %v2587_v43 = vld [vmem:[%s5687_s2 + $0x48] sm:$0xff] }
 0xa8b   :  { %1722 = vmatpush.msra.mxu3 %v6105_v49  ;;  %v2577_v49 = vld [vmem:[%s5685_s0 + $0x48] sm:$0xff] }
 0xa8d   :  { %1723 = vmatpush.msra.mxu3 %v6106_v57  ;;  %v1361_v57 = vadd.f32 %v2577_v49, %v1358_v30 }
 0xa8f   :  { %1724 = vmatpush.msra.mxu3 %v6107_v58  ;;  %v2579_v58 = vmul.f32 -1.442695, %v1361_v57 }
 0xa91   :  { %1725 = vmatpush.msra.mxu3 %v6108_v17  ;;  %v2723_v17 = vpop.eup %2722  ;;  %2724 = vpow2.f32 %v2579_v58 }
 0xa93   :  { %1726 = vmatpush.msra.mxu3 %v6109_v14  ;;  %v1368_v14 = vadd.f32 1.0, %v2723_v17 }
 0xa95   :  { %1727 = vmatpush.msra.mxu3 %v6110_v50  ;;  %2726 = vrcp.f32 %v1368_v14  ;;  %vm1375_vm14 = vweird.f32 %v1368_v14 }
 0xa97   :  { %1728 = vmatpush.msra.mxu3 %v6111_v55  ;;  %v2725_v50 = vpop.eup %2724 }
 0xa98   :  { %v1369_v55 = vadd.f32 1.0, %v2725_v50 }
 0xa9a   :  { %2728 = vrcp.f32 %v1369_v55  ;;  %v1396_v49 = vand.u32 2147483648, %v1369_v55  ;;  %vm1390_vm3 = vweird.f32 %v1369_v55  ;;  %v1394_v17 = vand.u32 2147483647, %v1369_v55 }
 0xa9b   :  { %v2727_v22 = vpop.eup %2726 }
 0xa9c   :  { %vm1376_vm13 = vweird.f32 %v2727_v22  ;;  %vm1395_vm5 = vcmp.eq.f32.partialorder %v1394_v17, 8.507059e+37 }
 0xa9d   :  { %vm1377_vm15 = vmor %vm1375_vm14, %vm1376_vm13 }
 0xadb   :  { %v1508_v46 = vpop.f32.mrf.mxu3 }
 0xadc   :  { %1556 = vmatmul.f32.vlgmr.msrb.gmra.mxu3 %v1508_v46  ;;  %v1371_v46 = vmul.f32 %v2727_v22, %v1368_v14 }
 0xadd   :  { %1888 = vmatpush.msrb.mxu3 %v4802_v8 }
 0xadf   :  { %1889 = vmatpush.msrb.mxu3 %v4808_v1 }
 0xae1   :  { %1890 = vmatpush.msrb.mxu3 %v4814_v3 }
 0xae3   :  { %v1511_v5 = vpop.f32.mrf.mxu3  ;;  %1891 = vmatpush.msrb.mxu3 %v4820_v10 }
 0xae4   :  { %1559 = vmatmul.f32.gmra.mxu3 %v1511_v5  ;;  %v1372_v5 = vsub.f32 1.0, %v1371_v46 }
 0xae5   :  { %1892 = vmatpush.msrb.mxu3 %v6112_v19  ;;  %v2729_v19 = vpop.eup %2728 }
 0xae6   :  { %v1386_v53 = vmul.f32 %v2729_v19, %v1369_v55  ;;  %vm1391_vm2 = vweird.f32 %v2729_v19 }
 0xae7   :  { %1893 = vmatpush.msrb.mxu3 %v6113_v23  ;;  %v1373_v23 = vmul.f32 %v2727_v22, %v1372_v5  ;;  %vm1392_vm4 = vmor %vm1390_vm3, %vm1391_vm2 }
 0xae9   :  { %1894 = vmatpush.msrb.mxu3 %v6114_v27  ;;  %v1534_v27 = vpop.f32.mrf.mxu2 }
 0xaeb   :  { %1895 = vmatpush.msrb.mxu3 %v6115_v31  ;;  %v1387_v31 = vsub.f32 1.0, %v1386_v53 }
 0xaed   :  { %1896 = vmatpush.msrb.mxu3 %v6116_v35  ;;  %v1374_v35 = vadd.f32 %v2727_v22, %v1373_v23  ;;  %v1397_v23 = vor.u32 1.1754944e-38, %v1396_v49  ;;  %v4956_v49 = vld [vmem:[%s5689_s4 + $0x80] sm:$0xff] }
 0xaef   :  { %1897 = vmatpush.msrb.mxu3 %v6117_v39  ;;  %v2586_v39 = vld [vmem:[%s5687_s2 + $0x40] sm:$0xff]  ;;  %v1378_v6 = vsel %vm1377_vm15, %v2727_v22, %v1374_v35 }
 0xaf1   :  { %1898 = vmatpush.msrb.mxu3 %v6118_v41  ;;  %v1537_v45 = vpop.f32.mrf.mxu2 }
 0xaf3   :  { %1899 = vmatpush.msrb.mxu3 %v6119_v47  ;;  %v1381_v47 = vand.u32 2147483648, %v1368_v14 }
 0xaf5   :  { %1900 = vmatpush.msrb.mxu3 %v6120_v12  ;;  %v1382_v51 = vor.u32 1.1754944e-38, %v1381_v47  ;;  %v4882_v47 = vld [vmem:[%s5689_s4 + $0xe0] sm:$0xff] }
 0xaf7   :  { %1901 = vmatpush.msrb.mxu3 %v6121_v11  ;;  %v1379_v11 = vand.u32 2147483647, %v1368_v14 }
 0xaf9   :  { %1902 = vmatpush.msrb.mxu3 %v6122_v26  ;;  %vm1380_vm1 = vcmp.eq.f32.partialorder %v1379_v11, 8.507059e+37  ;;  %v4896_v11 = vld [vmem:[%s5689_s4 + $0xd0] sm:$0xff] }
 0xafa   :  { %v1383_v9 = vsel %vm1380_vm1, %v1382_v51, %v1378_v6  ;;  %v4914_v6 = vld [vmem:[%s5689_s4 + $0xb8] sm:$0xff]  ;;  %v4920_v51 = vld [vmem:[%s5689_s4 + $0xb0] sm:$0xff] }
 0xafb   :  { %1903 = vmatpush.msrb.mxu3 %v6123_v38  ;;  %v1388_v38 = vmul.f32 %v2729_v19, %v1387_v31  ;;  %v1569_v58 = vsub.f32 1.0, %v1383_v9  ;;  %v1567_v5 = vmul.f32 %v1383_v9, %v4662_v59  ;;  %v4864_v59 = vld [vmem:[%s5689_s4 + $0xf8] sm:$0xff]  ;;  %v4926_v9 = vld [vmem:[%s5689_s4 + $0xa8] sm:$0xff] }
 0xafd   :  { %v1389_v18 = vadd.f32 %v2729_v19, %v1388_v38  ;;  %v4908_v38 = vld [vmem:[%s5689_s4 + $0xc0] sm:$0xff] }
 0xaff   :  { %v1393_v46 = vsel %vm1392_vm4, %v2729_v19, %v1389_v18  ;;  %v4876_v19 = vld [vmem:[%s5689_s4 + $0xe8] sm:$0xff]  ;;  %v4938_v18 = vld [vmem:[%s5689_s4 + $0x98] sm:$0xff] }
 0xb5f   :  { %v1557_v41 = vpop.f32.mrf.mxu3 }
 0xb60   :  { %v1558_v12 = vadd.f32 %v1557_v41, %v1534_v27  ;;  %v1398_v27 = vsel %vm1395_vm5, %v1397_v23, %v1393_v46 }
 0xb61   :  { %v1570_v31 = vsub.f32 1.0, %v1398_v27 }
 0xb62   :  { %v1563_v26 = vadd.f32 %v2586_v39, %v1558_v12  ;;  %v1568_v39 = vmul.f32 %v1398_v27, %v4667_v2  ;;  %v4870_v2 = vld [vmem:[%s5689_s4 + $0xf0] sm:$0xff]  ;;  %v4890_v12 = vld [vmem:[%s5689_s4 + $0xd8] sm:$0xff] }
 0xb63   :  { %v2595_v27 = vld [vmem:[%s5686_s1 + $0x58] sm:$0xff] }
 0xb64   :  { %2730 = vtanh.f32 %v1563_v26  ;;  %v4902_v26 = vld [vmem:[%s5689_s4 + $0xc8] sm:$0xff] }
 0xb67   :  { %v1560_v30 = vpop.f32.mrf.mxu3 }
 0xb68   :  { %v1561_v57 = vadd.f32 %v1560_v30, %v1537_v45  ;;  %v4932_v45 = vld [vmem:[%s5689_s4 + $0xa0] sm:$0xff]  ;;  %v4950_v30 = vld [vmem:[%s5689_s4 + $0x88] sm:$0xff] }
 0xb6a   :  { %v2731_v14 = vpop.eup %2730  ;;  %v1564_v50 = vadd.f32 %v2587_v43, %v1561_v57  ;;  %v4944_v43 = vld [vmem:[%s5689_s4 + $0x90] sm:$0xff]  ;;  %v5062_v57 = vld [vmem:[%s5690_s5 + $0x8] sm:$0xff] }
 0xb6b   :  { %v1571_v22 = vmul.f32 %v2731_v14, %v1569_v58  ;;  %6127 = vst [vmem:[#allocation11_spill] sm:$0xff] %v5062_v57  ;;  %v5068_v58 = vld [vmem:[%s5690_s5] sm:$0xff]  ;;  %v2594_v14 = vld [vmem:[%s5686_s1 + $0x50] sm:$0xff] }
 0xb6c   :  { %2732 = vtanh.f32 %v1564_v50  ;;  %6128 = vst [vmem:[#allocation53_spill] sm:$0xff] %v5068_v58 }
 0xb6d   :  { %v4848_v53 = vadd.f32 %v1571_v22, %v1567_v5 }
 0xb6f   :  { %1617 = vmatmul.f32.vlgmr.msrb.gmra.mxu1 %v4848_v53  ;;  %1706 = vmatmul.f32.vlgmr.msrb.gmra.mxu2 %v4848_v53 }
 0xb72   :  { %v2733_v35 = vpop.eup %2732 }
 0xb73   :  { %v1572_v55 = vmul.f32 %v2733_v35, %v1570_v31 }
 0xb75   :  { %v4853_v41 = vadd.f32 %v1572_v55, %v1568_v39 }
 0xb77   :  { %1589 = vmatpush.msra.mxu0 %v4853_v41  ;;  %1620 = vmatmul.f32.gmra.mxu1 %v4853_v41 }
 0xb78   :  { %1709 = vmatmul.f32.gmra.mxu2 %v4853_v41 }
 0xb79   :  { %1590 = vmatpush.msra.mxu0 %v4848_v53 }
 0xb7a   :  { %2588 = vmatmul.msk.f32.vlgmr.msra.gmra.mxu0 %vm136_vm0, %v4676_v63 }
 0xb7b   :  { %1624 = vmatpush.msrb.mxu0 %v4864_v59 }
 0xb7d   :  { %1625 = vmatpush.msrb.mxu0 %v4870_v2 }
 0xb7f   :  { %1626 = vmatpush.msrb.mxu0 %v4876_v19 }
 0xb81   :  { %1627 = vmatpush.msrb.mxu0 %v4882_v47 }
 0xb82   :  { %2589 = vmatmul.msk.f32.gmra.mxu0 %vm136_vm0, %v4747_v34 }
 0xb83   :  { %1628 = vmatpush.msrb.mxu0 %v4890_v12 }
 0xb85   :  { %1629 = vmatpush.msrb.mxu0 %v4896_v11 }
 0xb87   :  { %1630 = vmatpush.msrb.mxu0 %v4902_v26 }
 0xb89   :  { %1631 = vmatpush.msrb.mxu0 %v4908_v38 }
 0xb8b   :  { %1632 = vmatpush.msrb.mxu0 %v4914_v6 }
 0xb8d   :  { %1633 = vmatpush.msrb.mxu0 %v4920_v51 }
 0xb8f   :  { %1634 = vmatpush.msrb.mxu0 %v4926_v9 }
 0xb91   :  { %1635 = vmatpush.msrb.mxu0 %v4932_v45 }
 0xb93   :  { %1636 = vmatpush.msrb.mxu0 %v4938_v18 }
 0xb95   :  { %1637 = vmatpush.msrb.mxu0 %v4944_v43 }
 0xb97   :  { %1638 = vmatpush.msrb.mxu0 %v4950_v30 }
 0xb99   :  { %1639 = vmatpush.msrb.mxu0 %v4956_v49 }
 0xb9b   :  { %1804 = vmatpush.msra.mxu0 %v4450_v44 }
 0xb9d   :  { %1805 = vmatpush.msra.mxu0 %v4456_v33  ;;  %v4978_v33 = vld [vmem:[%s5690_s5 + $0x78] sm:$0xff] }
 0xb9f   :  { %1806 = vmatpush.msra.mxu0 %v4462_v56  ;;  %v4984_v56 = vld [vmem:[%s5690_s5 + $0x70] sm:$0xff] }
 0xba1   :  { %1807 = vmatpush.msra.mxu0 %v4468_v42  ;;  %v4990_v42 = vld [vmem:[%s5690_s5 + $0x68] sm:$0xff] }
 0xba3   :  { %1808 = vmatpush.msra.mxu0 %v4474_v62 }
 0xba5   :  { %1809 = vmatpush.msra.mxu0 %v4480_v37  ;;  %v4996_v37 = vld [vmem:[%s5690_s5 + $0x60] sm:$0xff] }
 0xba7   :  { %1810 = vmatpush.msra.mxu0 %v4486_v32  ;;  %v5002_v32 = vld [vmem:[%s5690_s5 + $0x58] sm:$0xff] }
 0xba9   :  { %1811 = vmatpush.msra.mxu0 %v4492_v36  ;;  %v5008_v36 = vld [vmem:[%s5690_s5 + $0x50] sm:$0xff] }
 0xbab   :  { %1812 = vmatpush.msra.mxu0 %v4498_v61  ;;  %v5014_v61 = vld [vmem:[%s5690_s5 + $0x48] sm:$0xff] }
 0xbad   :  { %1813 = vmatpush.msra.mxu0 %v4504_v4  ;;  %v5020_v4 = vld [vmem:[%s5690_s5 + $0x40] sm:$0xff] }
 0xbaf   :  { %1814 = vmatpush.msra.mxu0 %v4510_v25  ;;  %v5026_v25 = vld [vmem:[%s5690_s5 + $0x38] sm:$0xff] }
 0xbb1   :  { %1815 = vmatpush.msra.mxu0 %v4516_v40  ;;  %v5032_v40 = vld [vmem:[%s5690_s5 + $0x30] sm:$0xff] }
 0xbb3   :  { %1816 = vmatpush.msra.mxu0 %v4522_v13  ;;  %v5038_v13 = vld [vmem:[%s5690_s5 + $0x28] sm:$0xff] }
 0xbb5   :  { %1817 = vmatpush.msra.mxu0 %v4528_v54  ;;  %v5044_v54 = vld [vmem:[%s5690_s5 + $0x20] sm:$0xff] }
 0xbb6   :  { %6124 = vst [vmem:[#allocation8_spill] sm:$0xff] %v5044_v54 }
 0xbb7   :  { %1818 = vmatpush.msra.mxu0 %v6072_v15  ;;  %v5050_v15 = vld [vmem:[%s5690_s5 + $0x18] sm:$0xff] }
 0xbb8   :  { %6125 = vst [vmem:[#allocation9_spill] sm:$0xff] %v5050_v15 }
 0xbb9   :  { %1819 = vmatpush.msra.mxu0 %v6073_v29  ;;  %v5056_v29 = vld [vmem:[%s5690_s5 + $0x10] sm:$0xff] }
 0xbba   :  { %6126 = vst [vmem:[#allocation10_spill] sm:$0xff] %v5056_v29 }
 0xbf2   :  { %v1707_v17 = vpop.f32.mrf.mxu2 }
 0xbf7   :  { %v1592_v44 = vpop.f32.mrf.mxu0 }
 0xbf8   :  { %1640 = vmatmul.f32.vlgmr.msrb.gmra.mxu0 %v1592_v44  ;;  %1729 = vmatmul.f32.vlgmr.msra.gmra.mxu3 %v1592_v44 }
 0xbf9   :  { %1977 = vmatpush.msrb.mxu0 %v4978_v33 }
 0xbfb   :  { %1978 = vmatpush.msrb.mxu0 %v4984_v56  ;;  %v1710_v23 = vpop.f32.mrf.mxu2 }
 0xbfd   :  { %1979 = vmatpush.msrb.mxu0 %v4990_v42 }
 0xbff   :  { %v1595_v62 = vpop.f32.mrf.mxu0  ;;  %1980 = vmatpush.msrb.mxu0 %v4996_v37 }
 0xc00   :  { %1643 = vmatmul.f32.gmra.mxu0 %v1595_v62  ;;  %1732 = vmatmul.f32.gmra.mxu3 %v1595_v62 }
 0xc01   :  { %1981 = vmatpush.msrb.mxu0 %v5002_v32 }
 0xc03   :  { %1982 = vmatpush.msrb.mxu0 %v5008_v36 }
 0xc05   :  { %1983 = vmatpush.msrb.mxu0 %v5014_v61 }
 0xc07   :  { %1984 = vmatpush.msrb.mxu0 %v5020_v4 }
 0xc09   :  { %1985 = vmatpush.msrb.mxu0 %v5026_v25 }
 0xc0b   :  { %1986 = vmatpush.msrb.mxu0 %v5032_v40 }
 0xc0d   :  { %1987 = vmatpush.msrb.mxu0 %v5038_v13 }
 0xc0f   :  { %1988 = vmatpush.msrb.mxu0 %v5044_v54 }
 0xc11   :  { %1989 = vmatpush.msrb.mxu0 %v5050_v15 }
 0xc13   :  { %1990 = vmatpush.msrb.mxu0 %v5056_v29 }
 0xc15   :  { %1991 = vmatpush.msrb.mxu0 %v5062_v57 }
 0xc17   :  { %1992 = vmatpush.msrb.mxu0 %v5068_v58 }
 0xc7b   :  { %v1730_v50 = vpop.f32.mrf.mxu3 }
 0xc7c   :  { %v1731_v22 = vadd.f32 %v1730_v50, %v1707_v17 }
 0xc7e   :  { %v1736_v46 = vadd.f32 %v2594_v14, %v1731_v22 }
 0xc80   :  { %v2596_v5 = vmul.f32 -1.442695, %v1736_v46 }
 0xc82   :  { %2734 = vpow2.f32 %v2596_v5 }
 0xc83   :  { %v1733_v31 = vpop.f32.mrf.mxu3 }
 0xc84   :  { %v1734_v35 = vadd.f32 %v1733_v31, %v1710_v23 }
 0xc86   :  { %v1737_v55 = vadd.f32 %v2595_v27, %v1734_v35 }
 0xc88   :  { %v2735_v39 = vpop.eup %2734  ;;  %v2597_v44 = vmul.f32 -1.442695, %v1737_v55 }
 0xc89   :  { %v1744_v62 = vadd.f32 1.0, %v2735_v39 }
 0xc8a   :  { %2736 = vpow2.f32 %v2597_v44 }
 0xc8b   :  { %2738 = vrcp.f32 %v1744_v62  ;;  %v1757_v50 = vand.u32 2147483648, %v1744_v62  ;;  %v1755_v46 = vand.u32 2147483647, %v1744_v62  ;;  %vm1751_vm7 = vweird.f32 %v1744_v62 }
 0xc8d   :  { %v1758_v23 = vor.u32 1.1754944e-38, %v1757_v50  ;;  %vm1756_vm9 = vcmp.eq.f32.partialorder %v1755_v46, 8.507059e+37  ;;  %v5110_v46 = vld [vmem:[%s5691_s6 + $0xd8] sm:$0xff] }
 0xc90   :  { %v2737_v58 = vpop.eup %2736 }
 0xc91   :  { %v2739_v57 = vpop.eup %2738  ;;  %v1745_v29 = vadd.f32 1.0, %v2737_v58 }
 0xc92   :  { %v1747_v17 = vmul.f32 %v2739_v57, %v1744_v62  ;;  %vm1752_vm6 = vweird.f32 %v2739_v57 }
 0xc93   :  { %2740 = vrcp.f32 %v1745_v29  ;;  %vm1753_vm8 = vmor %vm1751_vm7, %vm1752_vm6  ;;  %v1772_v58 = vand.u32 2147483648, %v1745_v29  ;;  %vm1766_vm11 = vweird.f32 %v1745_v29 }
 0xc94   :  { %v1748_v14 = vsub.f32 1.0, %v1747_v17  ;;  %v1770_v17 = vand.u32 2147483647, %v1745_v29 }
 0xc95   :  { %v1773_v62 = vor.u32 1.1754944e-38, %v1772_v58  ;;  %v5204_v58 = vld [vmem:[%s5690_s5 + $0x98] sm:$0xff] }
 0xc96   :  { %v1749_v22 = vmul.f32 %v2739_v57, %v1748_v14  ;;  %vm1771_vm13 = vcmp.eq.f32.partialorder %v1770_v17, 8.507059e+37  ;;  %6139 = vst [vmem:[#allocation46_spill] sm:$0xff] %v5204_v58  ;;  %v5216_v17 = vld [vmem:[%s5690_s5 + $0x88] sm:$0xff] }
 0xc97   :  { %6141 = vst [vmem:[#allocation50_spill] sm:$0xff] %v5216_v17 }
 0xc98   :  { %v1750_v5 = vadd.f32 %v2739_v57, %v1749_v22 }
 0xc99   :  { %v2741_v15 = vpop.eup %2740 }
 0xc9a   :  { %v1762_v27 = vmul.f32 %v2741_v15, %v1745_v29  ;;  %v1754_v31 = vsel %vm1753_vm8, %v2739_v57, %v1750_v5  ;;  %vm1767_vm10 = vweird.f32 %v2741_v15  ;;  %v5084_v57 = vld [vmem:[%s5691_s6 + $0xf8] sm:$0xff]  ;;  %v5102_v29 = vld [vmem:[%s5691_s6 + $0xe0] sm:$0xff]  ;;  %v5116_v5 = vld [vmem:[%s5691_s6 + $0xd0] sm:$0xff] }
 0xc9b   :  { %v1759_v35 = vsel %vm1756_vm9, %v1758_v23, %v1754_v31  ;;  %vm1768_vm12 = vmor %vm1766_vm11, %vm1767_vm10  ;;  %v5122_v23 = vld [vmem:[%s5691_s6 + $0xc8] sm:$0xff]  ;;  %v5134_v31 = vld [vmem:[%s5691_s6 + $0xb8] sm:$0xff] }
 0xc9c   :  { %v1763_v55 = vsub.f32 1.0, %v1762_v27  ;;  %v1776_v39 = vmul.f32 %v1759_v35, %v4848_v53  ;;  %v5128_v27 = vld [vmem:[%s5691_s6 + $0xc0] sm:$0xff]  ;;  %6129 = vst [vmem:[#allocation54_spill] sm:$0xff] %v5134_v31  ;;  %v5140_v35 = vld [vmem:[%s5691_s6 + $0xb0] sm:$0xff] }
 0xc9d   :  { %6130 = vst [vmem:[#allocation13_spill] sm:$0xff] %v5140_v35 }
 0xc9e   :  { %1820 = vmatmul.f32.vlgmr.msra.gmra.mxu0 %v1776_v39  ;;  %v1764_v44 = vmul.f32 %v2741_v15, %v1763_v55  ;;  %v5192_v55 = vld [vmem:[%s5690_s5 + $0xa8] sm:$0xff] }
 0xc9f   :  { %6137 = vst [vmem:[#allocation31_spill] sm:$0xff] %v5192_v55 }
 0xca0   :  { %v1765_v14 = vadd.f32 %v2741_v15, %v1764_v44  ;;  %v5210_v44 = vld [vmem:[%s5690_s5 + $0x90] sm:$0xff] }
 0xca1   :  { %6140 = vst [vmem:[#allocation48_spill] sm:$0xff] %v5210_v44 }
 0xca2   :  { %v1769_v22 = vsel %vm1768_vm12, %v2741_v15, %v1765_v14  ;;  %v5090_v15 = vld [vmem:[%s5691_s6 + $0xf0] sm:$0xff]  ;;  %v5222_v14 = vld [vmem:[%s5690_s5 + $0x80] sm:$0xff] }
 0xca3   :  { %v1774_v54 = vsel %vm1771_vm13, %v1773_v62, %v1769_v22  ;;  %6142 = vst [vmem:[#allocation39_spill] sm:$0xff] %v5222_v14  ;;  %v1618_v62 = vpop.f32.mrf.mxu1 }
 0xca4   :  { %v1777_v50 = vmul.f32 %v1774_v54, %v4853_v41  ;;  %v5096_v54 = vld [vmem:[%s5691_s6 + $0xe8] sm:$0xff] }
 0xca6   :  { %1792 = vmatpush.msra.mxu1 %v1777_v50  ;;  %1823 = vmatmul.f32.gmra.mxu0 %v1777_v50 }
 0xca8   :  { %1793 = vmatpush.msra.mxu1 %v1776_v39  ;;  %v5198_v39 = vld [vmem:[%s5690_s5 + $0xa0] sm:$0xff] }
 0xca9   :  { %2598 = vmatmul.msk.f32.vlgmr.msra.gmra.mxu1 %vm136_vm0, %v4676_v63  ;;  %6138 = vst [vmem:[#allocation34_spill] sm:$0xff] %v5198_v39 }
 0xcaa   :  { %1827 = vmatpush.msrb.mxu1 %v5084_v57 }
 0xcab   :  { %v1621_v22 = vpop.f32.mrf.mxu1 }
 0xcac   :  { %1828 = vmatpush.msrb.mxu1 %v5090_v15 }
 0xcae   :  { %1829 = vmatpush.msrb.mxu1 %v5096_v54 }
 0xcb0   :  { %1830 = vmatpush.msrb.mxu1 %v5102_v29 }
 0xcb1   :  { %2599 = vmatmul.msk.f32.gmra.mxu1 %vm136_vm0, %v4747_v34 }
 0xcb2   :  { %1831 = vmatpush.msrb.mxu1 %v5110_v46 }
 0xcb4   :  { %1832 = vmatpush.msrb.mxu1 %v5116_v5 }
 0xcb6   :  { %1833 = vmatpush.msrb.mxu1 %v5122_v23 }
 0xcb8   :  { %1834 = vmatpush.msrb.mxu1 %v5128_v27 }
 0xcba   :  { %1835 = vmatpush.msrb.mxu1 %v5134_v31 }
 0xcbc   :  { %1836 = vmatpush.msrb.mxu1 %v5140_v35 }
 0xcbe   :  { %1837 = vmatpush.msrb.mxu1 %v6091_v48  ;;  %v5156_v48 = vld [vmem:[%s5690_s5 + $0xd8] sm:$0xff] }
 0xcbf   :  { %6131 = vst [vmem:[#allocation15_spill] sm:$0xff] %v5156_v48 }
 0xcc0   :  { %1838 = vmatpush.msrb.mxu1 %v6092_v16  ;;  %v5162_v16 = vld [vmem:[%s5690_s5 + $0xd0] sm:$0xff] }
 0xcc1   :  { %6132 = vst [vmem:[#allocation17_spill] sm:$0xff] %v5162_v16 }
 0xcc2   :  { %1839 = vmatpush.msrb.mxu1 %v6093_v21  ;;  %v5168_v21 = vld [vmem:[%s5690_s5 + $0xc8] sm:$0xff] }
 0xcc3   :  { %6133 = vst [vmem:[#allocation19_spill] sm:$0xff] %v5168_v21 }
 0xcc4   :  { %1840 = vmatpush.msrb.mxu1 %v6094_v7  ;;  %v5174_v7 = vld [vmem:[%s5690_s5 + $0xc0] sm:$0xff] }
 0xcc5   :  { %6134 = vst [vmem:[#allocation22_spill] sm:$0xff] %v5174_v7 }
 0xcc6   :  { %1841 = vmatpush.msrb.mxu1 %v6095_v52  ;;  %v5180_v52 = vld [vmem:[%s5690_s5 + $0xb8] sm:$0xff] }
 0xcc7   :  { %6135 = vst [vmem:[#allocation25_spill] sm:$0xff] %v5180_v52 }
 0xcc8   :  { %1842 = vmatpush.msrb.mxu1 %v6096_v20  ;;  %v5186_v20 = vld [vmem:[%s5690_s5 + $0xb0] sm:$0xff] }
 0xcc9   :  { %6136 = vst [vmem:[#allocation28_spill] sm:$0xff] %v5186_v20 }
 0xcca   :  { %2000 = vmatpush.msra.mxu1 %v4766_v24 }
 0xccc   :  { %2001 = vmatpush.msra.mxu1 %v4772_v0 }
 0xcce   :  { %2002 = vmatpush.msra.mxu1 %v4778_v28 }
 0xcd0   :  { %2003 = vmatpush.msra.mxu1 %v4784_v60  ;;  %v2601_v60 = vld [vmem:[%s5687_s2 + $0x58] sm:$0xff] }
 0xcd2   :  { %2004 = vmatpush.msra.mxu1 %v5156_v48 }
 0xcd4   :  { %2005 = vmatpush.msra.mxu1 %v5162_v16 }
 0xcd6   :  { %2006 = vmatpush.msra.mxu1 %v5168_v21 }
 0xcd8   :  { %2007 = vmatpush.msra.mxu1 %v5174_v7 }
 0xcda   :  { %2008 = vmatpush.msra.mxu1 %v5180_v52 }
 0xcdc   :  { %2009 = vmatpush.msra.mxu1 %v5186_v20 }
 0xcde   :  { %2010 = vmatpush.msra.mxu1 %v5192_v55 }
 0xce0   :  { %2011 = vmatpush.msra.mxu1 %v5198_v39  ;;  %v2591_v39 = vld [vmem:[%s5685_s0 + $0x58] sm:$0xff] }
 0xce2   :  { %2012 = vmatpush.msra.mxu1 %v5204_v58 }
 0xce4   :  { %2013 = vmatpush.msra.mxu1 %v5210_v44 }
 0xce6   :  { %2014 = vmatpush.msra.mxu1 %v5216_v17  ;;  %v2956_v17 = vld [vmem:[%s5689_s4 + $0x58] sm:$0xff] }
 0xce8   :  { %2015 = vmatpush.msra.mxu1 %v5222_v14  ;;  %v2957_v14 = vld [vmem:[%s5689_s4 + $0x50] sm:$0xff] }
 0xd26   :  { %v1795_v50 = vpop.f32.mrf.mxu1 }
 0xd27   :  { %1843 = vmatmul.f32.vlgmr.msrb.gmra.mxu1 %v1795_v50  ;;  %v2965_v50 = vld [vmem:[%s5689_s4 + $0x10] sm:$0xff] }
 0xd28   :  { %2175 = vmatpush.msrb.mxu1 %v4802_v8  ;;  %v2958_v8 = vld [vmem:[%s5689_s4 + $0x48] sm:$0xff] }
 0xd2a   :  { %2176 = vmatpush.msrb.mxu1 %v4808_v1  ;;  %v2959_v1 = vld [vmem:[%s5689_s4 + $0x40] sm:$0xff] }
 0xd2c   :  { %2177 = vmatpush.msrb.mxu1 %v4814_v3  ;;  %v2960_v3 = vld [vmem:[%s5689_s4 + $0x38] sm:$0xff] }
 0xd2e   :  { %v1798_v44 = vpop.f32.mrf.mxu1  ;;  %2178 = vmatpush.msrb.mxu1 %v4820_v10  ;;  %v2961_v10 = vld [vmem:[%s5689_s4 + $0x30] sm:$0xff] }
 0xd2f   :  { %1846 = vmatmul.f32.gmra.mxu1 %v1798_v44  ;;  %v2962_v44 = vld [vmem:[%s5689_s4 + $0x28] sm:$0xff] }
 0xd30   :  { %2179 = vmatpush.msrb.mxu1 %v2956_v17  ;;  %v2963_v17 = vld [vmem:[%s5689_s4 + $0x20] sm:$0xff] }
 0xd32   :  { %2180 = vmatpush.msrb.mxu1 %v2957_v14  ;;  %v2964_v14 = vld [vmem:[%s5689_s4 + $0x18] sm:$0xff] }
 0xd34   :  { %2181 = vmatpush.msrb.mxu1 %v2958_v8  ;;  %v2966_v8 = vld [vmem:[%s5689_s4 + $0x8] sm:$0xff] }
 0xd36   :  { %2182 = vmatpush.msrb.mxu1 %v2959_v1  ;;  %v2967_v1 = vld [vmem:[%s5689_s4] sm:$0xff] }
 0xd38   :  { %2183 = vmatpush.msrb.mxu1 %v2960_v3  ;;  %v1641_v3 = vpop.f32.mrf.mxu0 }
 0xd3a   :  { %2184 = vmatpush.msrb.mxu1 %v2961_v10  ;;  %v1642_v10 = vadd.f32 %v1641_v3, %v1618_v62 }
 0xd3c   :  { %2185 = vmatpush.msrb.mxu1 %v2962_v44  ;;  %v2590_v44 = vld [vmem:[%s5685_s0 + $0x50] sm:$0xff] }
 0xd3e   :  { %2186 = vmatpush.msrb.mxu1 %v2963_v17  ;;  %v1647_v17 = vadd.f32 %v2590_v44, %v1642_v10 }
 0xd40   :  { %2187 = vmatpush.msrb.mxu1 %v2964_v14  ;;  %v1644_v14 = vpop.f32.mrf.mxu0  ;;  %v2592_v58 = vmul.f32 -1.442695, %v1647_v17 }
 0xd42   :  { %2188 = vmatpush.msrb.mxu1 %v2965_v50  ;;  %v1645_v50 = vadd.f32 %v1644_v14, %v1621_v22  ;;  %2742 = vpow2.f32 %v2592_v58 }
 0xd44   :  { %2189 = vmatpush.msrb.mxu1 %v2966_v8  ;;  %v1648_v8 = vadd.f32 %v2591_v39, %v1645_v50  ;;  %v2600_v39 = vld [vmem:[%s5687_s2 + $0x50] sm:$0xff] }
 0xd46   :  { %2190 = vmatpush.msrb.mxu1 %v2967_v1  ;;  %v2593_v55 = vmul.f32 -1.442695, %v1648_v8 }
 0xd48   :  { %v2743_v20 = vpop.eup %2742  ;;  %2744 = vpow2.f32 %v2593_v55  ;;  %v1821_v14 = vpop.f32.mrf.mxu0 }
 0xd49   :  { %v1655_v1 = vadd.f32 1.0, %v2743_v20 }
 0xd4b   :  { %2746 = vrcp.f32 %v1655_v1  ;;  %v1668_v20 = vand.u32 2147483648, %v1655_v1  ;;  %vm1662_vm15 = vweird.f32 %v1655_v1  ;;  %v1666_v50 = vand.u32 2147483647, %v1655_v1 }
 0xd4d   :  { %v1669_v48 = vor.u32 1.1754944e-38, %v1668_v20  ;;  %vm1667_vm2 = vcmp.eq.f32.partialorder %v1666_v50, 8.507059e+37 }
 0xd4e   :  { %v2745_v62 = vpop.eup %2744 }
 0xd4f   :  { %v1656_v3 = vadd.f32 1.0, %v2745_v62 }
 0xd51   :  { %v2747_v52 = vpop.eup %2746  ;;  %2748 = vrcp.f32 %v1656_v3  ;;  %v1683_v0 = vand.u32 2147483648, %v1656_v3  ;;  %vm1677_vm4 = vweird.f32 %v1656_v3 }
 0xd52   :  { %v1658_v7 = vmul.f32 %v2747_v52, %v1655_v1  ;;  %vm1663_vm14 = vweird.f32 %v2747_v52 }
 0xd53   :  { %vm1664_vm1 = vmor %vm1662_vm15, %vm1663_vm14  ;;  %v1684_v20 = vor.u32 1.1754944e-38, %v1683_v0  ;;  %v5318_v0 = vld [vmem:[%s5691_s6 + $0x70] sm:$0xff] }
 0xd54   :  { %v1659_v10 = vsub.f32 1.0, %v1658_v7 }
 0xd56   :  { %v1660_v17 = vmul.f32 %v2747_v52, %v1659_v10 }
 0xd57   :  { %v2749_v44 = vpop.eup %2748 }
 0xd58   :  { %v1673_v22 = vmul.f32 %v2749_v44, %v1656_v3  ;;  %v1661_v16 = vadd.f32 %v2747_v52, %v1660_v17  ;;  %vm1678_vm3 = vweird.f32 %v2749_v44 }
 0xd59   :  { %vm1679_vm5 = vmor %vm1677_vm4, %vm1678_vm3 }
 0xd5a   :  { %v1674_v21 = vsub.f32 1.0, %v1673_v22  ;;  %v1665_v7 = vsel %vm1664_vm1, %v2747_v52, %v1661_v16  ;;  %v1824_v22 = vpop.f32.mrf.mxu0 }
 0xd5b   :  { %v1670_v10 = vsel %vm1667_vm2, %v1669_v48, %v1665_v7  ;;  %v5342_v7 = vld [vmem:[%s5691_s6 + $0x50] sm:$0xff] }
 0xd5c   :  { %v1675_v62 = vmul.f32 %v2749_v44, %v1674_v21  ;;  %v1856_v1 = vsub.f32 1.0, %v1670_v10  ;;  %v1854_v48 = vmul.f32 %v1670_v10, %v4848_v53  ;;  %v5324_v53 = vld [vmem:[%s5691_s6 + $0x68] sm:$0xff] }
 0xd5d   :  { %v5348_v10 = vld [vmem:[%s5691_s6 + $0x48] sm:$0xff] }
 0xd5e   :  { %v1676_v17 = vadd.f32 %v2749_v44, %v1675_v62 }
 0xd60   :  { %v1680_v52 = vsel %vm1679_vm5, %v2749_v44, %v1676_v17  ;;  %v5336_v44 = vld [vmem:[%s5691_s6 + $0x58] sm:$0xff] }
 0xd61   :  { %v5360_v17 = vld [vmem:[%s5691_s6 + $0x38] sm:$0xff] }
 0xda4   :  { %v1844_v55 = vpop.f32.mrf.mxu1 }
 0xda5   :  { %v1845_v58 = vadd.f32 %v1844_v55, %v1821_v14  ;;  %v1681_v55 = vand.u32 2147483647, %v1656_v3 }
 0xda7   :  { %v1850_v8 = vadd.f32 %v2600_v39, %v1845_v58  ;;  %vm1682_vm6 = vcmp.eq.f32.partialorder %v1681_v55, 8.507059e+37  ;;  %v5378_v55 = vld [vmem:[%s5691_s6 + $0x20] sm:$0xff] }
 0xda8   :  { %v1685_v50 = vsel %vm1682_vm6, %v1684_v20, %v1680_v52  ;;  %v5402_v52 = vld [vmem:[%s5691_s6] sm:$0xff] }
 0xda9   :  { %2750 = vtanh.f32 %v1850_v8  ;;  %v1855_v62 = vmul.f32 %v1685_v50, %v4853_v41  ;;  %v5330_v41 = vld [vmem:[%s5691_s6 + $0x60] sm:$0xff]  ;;  %6143 = vst [vmem:[#allocation40_spill] sm:$0xff] %v5402_v52 }
 0xdac   :  { %v1847_v28 = vpop.f32.mrf.mxu1 }
 0xdad   :  { %v1848_v14 = vadd.f32 %v1847_v28, %v1824_v22  ;;  %v1857_v28 = vsub.f32 1.0, %v1685_v50  ;;  %v5354_v22 = vld [vmem:[%s5691_s6 + $0x40] sm:$0xff] }
 0xdaf   :  { %v2751_v39 = vpop.eup %2750  ;;  %v1851_v16 = vadd.f32 %v2601_v60, %v1848_v14  ;;  %v5366_v14 = vld [vmem:[%s5691_s6 + $0x30] sm:$0xff] }
 0xdb0   :  { %v1858_v21 = vmul.f32 %v2751_v39, %v1856_v1  ;;  %v5372_v1 = vld [vmem:[%s5691_s6 + $0x28] sm:$0xff]  ;;  %v5384_v39 = vld [vmem:[%s5691_s6 + $0x18] sm:$0xff] }
 0xdb1   :  { %2752 = vtanh.f32 %v1851_v16  ;;  %v5390_v16 = vld [vmem:[%s5691_s6 + $0x10] sm:$0xff] }
 0xdb2   :  { %v5278_v58 = vadd.f32 %v1858_v21, %v1854_v48  ;;  %v5396_v21 = vld [vmem:[%s5691_s6 + $0x8] sm:$0xff] }
 0xdb4   :  { %1904 = vmatmul.f32.vlgmr.msrb.gmra.mxu3 %v5278_v58  ;;  %1993 = vmatmul.f32.vlgmr.msrb.gmra.mxu0 %v5278_v58 }
 0xdb7   :  { %v2753_v8 = vpop.eup %2752 }
 0xdb8   :  { %v1859_v3 = vmul.f32 %v2753_v8, %v1857_v28  ;;  %v2609_v28 = vld [vmem:[%s5686_s1 + $0x68] sm:$0xff] }
 0xdba   :  { %v5283_v60 = vadd.f32 %v1859_v3, %v1855_v62 }
 0xdbc   :  { %1876 = vmatpush.msra.mxu2 %v5283_v60  ;;  %1907 = vmatmul.f32.gmra.mxu3 %v5283_v60 }
 0xdbd   :  { %1996 = vmatmul.f32.gmra.mxu0 %v5283_v60 }
 0xdbe   :  { %1877 = vmatpush.msra.mxu2 %v5278_v58 }
 0xdbf   :  { %2602 = vmatmul.msk.f32.vlgmr.msra.gmra.mxu2 %vm136_vm0, %v4676_v63  ;;  %v5312_v63 = vld [vmem:[%s5691_s6 + $0x78] sm:$0xff] }
 0xdc0   :  { %1911 = vmatpush.msrb.mxu2 %v4864_v59 }
 0xdc2   :  { %1912 = vmatpush.msrb.mxu2 %v4870_v2 }
 0xdc4   :  { %1913 = vmatpush.msrb.mxu2 %v4876_v19 }
 0xdc6   :  { %1914 = vmatpush.msrb.mxu2 %v4882_v47 }
 0xdc7   :  { %2603 = vmatmul.msk.f32.gmra.mxu2 %vm136_vm0, %v4747_v34 }
 0xdc8   :  { %1915 = vmatpush.msrb.mxu2 %v4890_v12 }
 0xdca   :  { %1916 = vmatpush.msrb.mxu2 %v4896_v11 }
 0xdcc   :  { %1917 = vmatpush.msrb.mxu2 %v4902_v26 }
 0xdce   :  { %1918 = vmatpush.msrb.mxu2 %v4908_v38 }
 0xdd0   :  { %1919 = vmatpush.msrb.mxu2 %v4914_v6 }
 0xdd2   :  { %1920 = vmatpush.msrb.mxu2 %v4920_v51 }
 0xdd4   :  { %1921 = vmatpush.msrb.mxu2 %v4926_v9 }
 0xdd6   :  { %1922 = vmatpush.msrb.mxu2 %v4932_v45 }
 0xdd8   :  { %1923 = vmatpush.msrb.mxu2 %v4938_v18 }
 0xdda   :  { %1924 = vmatpush.msrb.mxu2 %v4944_v43 }
 0xddc   :  { %1925 = vmatpush.msrb.mxu2 %v4950_v30 }
 0xdde   :  { %1926 = vmatpush.msrb.mxu2 %v4956_v49 }
 0xde0   :  { %2091 = vmatpush.msra.mxu2 %v5312_v63 }
 0xde2   :  { %2092 = vmatpush.msra.mxu2 %v5318_v0 }
 0xde4   :  { %2093 = vmatpush.msra.mxu2 %v5324_v53 }
 0xde6   :  { %2094 = vmatpush.msra.mxu2 %v5330_v41 }
 0xde8   :  { %2095 = vmatpush.msra.mxu2 %v5336_v44 }
 0xdea   :  { %2096 = vmatpush.msra.mxu2 %v5342_v7 }
 0xdec   :  { %2097 = vmatpush.msra.mxu2 %v5348_v10 }
 0xdee   :  { %2098 = vmatpush.msra.mxu2 %v5354_v22 }
 0xdf0   :  { %2099 = vmatpush.msra.mxu2 %v5360_v17 }
 0xdf2   :  { %2100 = vmatpush.msra.mxu2 %v5366_v14 }
 0xdf4   :  { %2101 = vmatpush.msra.mxu2 %v5372_v1 }
 0xdf6   :  { %2102 = vmatpush.msra.mxu2 %v5378_v55 }
 0xdf8   :  { %2103 = vmatpush.msra.mxu2 %v5384_v39 }
 0xdfa   :  { %2104 = vmatpush.msra.mxu2 %v5390_v16 }
 0xdfc   :  { %2105 = vmatpush.msra.mxu2 %v5396_v21 }
 0xdfe   :  { %2106 = vmatpush.msra.mxu2 %v5402_v52 }
 0xe42   :  { %v1879_v48 = vpop.f32.mrf.mxu2 }
 0xe43   :  { %1927 = vmatmul.f32.vlgmr.msrb.gmra.mxu2 %v1879_v48  ;;  %2016 = vmatmul.f32.vlgmr.msra.gmra.mxu1 %v1879_v48 }
 0xe44   :  { %2264 = vmatpush.msrb.mxu2 %v4978_v33  ;;  %v6144_v33 = vld [vmem:[#allocation8_spill] sm:$0xff] }
 0xe46   :  { %2265 = vmatpush.msrb.mxu2 %v4984_v56  ;;  %v6145_v56 = vld [vmem:[#allocation9_spill] sm:$0xff] }
 0xe48   :  { %2266 = vmatpush.msrb.mxu2 %v4990_v42  ;;  %v6146_v42 = vld [vmem:[#allocation10_spill] sm:$0xff] }
 0xe4a   :  { %v1882_v20 = vpop.f32.mrf.mxu2  ;;  %2267 = vmatpush.msrb.mxu2 %v4996_v37  ;;  %v6147_v37 = vld [vmem:[#allocation11_spill] sm:$0xff] }
 0xe4b   :  { %1930 = vmatmul.f32.gmra.mxu2 %v1882_v20  ;;  %2019 = vmatmul.f32.gmra.mxu1 %v1882_v20 }
 0xe4c   :  { %2268 = vmatpush.msrb.mxu2 %v5002_v32  ;;  %v6148_v32 = vld [vmem:[#allocation53_spill] sm:$0xff] }
 0xe4e   :  { %2269 = vmatpush.msrb.mxu2 %v5008_v36  ;;  %v1994_v36 = vpop.f32.mrf.mxu0 }
 0xe50   :  { %2270 = vmatpush.msrb.mxu2 %v5014_v61  ;;  %v2608_v61 = vld [vmem:[%s5686_s1 + $0x60] sm:$0xff] }
 0xe52   :  { %2271 = vmatpush.msrb.mxu2 %v5020_v4 }
 0xe54   :  { %2272 = vmatpush.msrb.mxu2 %v5026_v25 }
 0xe56   :  { %2273 = vmatpush.msrb.mxu2 %v5032_v40 }
 0xe58   :  { %2274 = vmatpush.msrb.mxu2 %v5038_v13  ;;  %v1997_v13 = vpop.f32.mrf.mxu0 }
 0xe5a   :  { %2275 = vmatpush.msrb.mxu2 %v6144_v33 }
 0xe5c   :  { %2276 = vmatpush.msrb.mxu2 %v6145_v56 }
 0xe5e   :  { %2277 = vmatpush.msrb.mxu2 %v6146_v42 }
 0xe60   :  { %2278 = vmatpush.msrb.mxu2 %v6147_v37 }
 0xe62   :  { %2279 = vmatpush.msrb.mxu2 %v6148_v32 }
 0xec0   :  { %v2017_v4 = vpop.f32.mrf.mxu1 }
 0xec1   :  { %v2018_v25 = vadd.f32 %v2017_v4, %v1994_v36 }
 0xec3   :  { %v2023_v40 = vadd.f32 %v2608_v61, %v2018_v25 }
 0xec5   :  { %v2610_v50 = vmul.f32 -1.442695, %v2023_v40 }
 0xec7   :  { %2754 = vpow2.f32 %v2610_v50 }
 0xec8   :  { %v2020_v8 = vpop.f32.mrf.mxu1 }
 0xec9   :  { %v2021_v3 = vadd.f32 %v2020_v8, %v1997_v13 }
 0xecb   :  { %v2024_v62 = vadd.f32 %v2609_v28, %v2021_v3 }
 0xecd   :  { %v2755_v48 = vpop.eup %2754  ;;  %v2611_v20 = vmul.f32 -1.442695, %v2024_v62 }
 0xece   :  { %v2031_v33 = vadd.f32 1.0, %v2755_v48 }
 0xecf   :  { %2756 = vpow2.f32 %v2611_v20 }
 0xed0   :  { %2758 = vrcp.f32 %v2031_v33  ;;  %v2044_v61 = vand.u32 2147483648, %v2031_v33  ;;  %v2042_v25 = vand.u32 2147483647, %v2031_v33  ;;  %vm2038_vm8 = vweird.f32 %v2031_v33 }
 0xed2   :  { %v2045_v13 = vor.u32 1.1754944e-38, %v2044_v61  ;;  %vm2043_vm10 = vcmp.eq.f32.partialorder %v2042_v25, 8.507059e+37  ;;  %v5469_v25 = vld [vmem:[%s5691_s6 + $0x90] sm:$0xff] }
 0xed3   :  { %6152 = vst [vmem:[#allocation55_spill] sm:$0xff] %v5469_v25 }
 0xed5   :  { %v2757_v56 = vpop.eup %2756 }
 0xed6   :  { %v2759_v42 = vpop.eup %2758  ;;  %v2032_v37 = vadd.f32 1.0, %v2757_v56 }
 0xed7   :  { %v2034_v32 = vmul.f32 %v2759_v42, %v2031_v33  ;;  %vm2039_vm7 = vweird.f32 %v2759_v42 }
 0xed8   :  { %2760 = vrcp.f32 %v2032_v37  ;;  %vm2040_vm9 = vmor %vm2038_vm8, %vm2039_vm7  ;;  %v2059_v20 = vand.u32 2147483648, %v2032_v37  ;;  %vm2053_vm12 = vweird.f32 %v2032_v37 }
 0xed9   :  { %v2035_v36 = vsub.f32 1.0, %v2034_v32  ;;  %v2057_v32 = vand.u32 2147483647, %v2032_v37 }
 0xeda   :  { %v2060_v33 = vor.u32 1.1754944e-38, %v2059_v20  ;;  %v6161_v20 = vld [vmem:[#allocation22_spill] sm:$0xff] }
 0xedb   :  { %v2036_v4 = vmul.f32 %v2759_v42, %v2035_v36  ;;  %vm2058_vm14 = vcmp.eq.f32.partialorder %v2057_v32, 8.507059e+37  ;;  %v6163_v32 = vld [vmem:[#allocation28_spill] sm:$0xff] }
 0xedd   :  { %v2037_v40 = vadd.f32 %v2759_v42, %v2036_v4 }
 0xede   :  { %v2761_v50 = vpop.eup %2760 }
 0xedf   :  { %v2049_v28 = vmul.f32 %v2761_v50, %v2032_v37  ;;  %v2041_v8 = vsel %vm2040_vm9, %v2759_v42, %v2037_v40  ;;  %vm2054_vm11 = vweird.f32 %v2761_v50  ;;  %v5432_v42 = vld [vmem:[%s5688_s3] sm:$0xff]  ;;  %v5463_v37 = vld [vmem:[%s5691_s6 + $0x98] sm:$0xff]  ;;  %v5475_v40 = vld [vmem:[%s5691_s6 + $0x88] sm:$0xff] }
 0xee0   :  { %v2046_v3 = vsel %vm2043_vm10, %v2045_v13, %v2041_v8  ;;  %vm2055_vm13 = vmor %vm2053_vm12, %vm2054_vm11  ;;  %6151 = vst [vmem:[#allocation43_spill] sm:$0xff] %v5463_v37  ;;  %v6155_v13 = vld [vmem:[#allocation5_spill] sm:$0xff]  ;;  %v6157_v8 = vld [vmem:[#allocation7_spill] sm:$0xff] }
 0xee1   :  { %v2050_v62 = vsub.f32 1.0, %v2049_v28  ;;  %v2063_v48 = vmul.f32 %v2046_v3, %v5278_v58  ;;  %6153 = vst [vmem:[#allocation56_spill] sm:$0xff] %v5475_v40  ;;  %v6156_v28 = vld [vmem:[#allocation6_spill] sm:$0xff]  ;;  %v6158_v3 = vld [vmem:[#allocation15_spill] sm:$0xff] }
 0xee3   :  { %2107 = vmatmul.f32.vlgmr.msra.gmra.mxu2 %v2063_v48  ;;  %v2051_v56 = vmul.f32 %v2761_v50, %v2050_v62  ;;  %v6159_v62 = vld [vmem:[#allocation17_spill] sm:$0xff] }
 0xee5   :  { %v2052_v36 = vadd.f32 %v2761_v50, %v2051_v56  ;;  %v6162_v56 = vld [vmem:[#allocation25_spill] sm:$0xff] }
 0xee7   :  { %v2056_v4 = vsel %vm2055_vm13, %v2761_v50, %v2052_v36  ;;  %v5481_v50 = vld [vmem:[%s5691_s6 + $0x80] sm:$0xff]  ;;  %v6164_v36 = vld [vmem:[#allocation31_spill] sm:$0xff] }
 0xee8   :  { %v2061_v52 = vsel %vm2058_vm14, %v2060_v33, %v2056_v4  ;;  %6154 = vst [vmem:[#allocation57_spill] sm:$0xff] %v5481_v50  ;;  %v6166_v33 = vld [vmem:[#allocation46_spill] sm:$0xff]  ;;  %v6167_v4 = vld [vmem:[#allocation48_spill] sm:$0xff] }
 0xee9   :  { %v2064_v61 = vmul.f32 %v2061_v52, %v5283_v60  ;;  %v5451_v52 = vld [vmem:[%s5691_s6 + $0xa8] sm:$0xff] }
 0xeea   :  { %6149 = vst [vmem:[#allocation41_spill] sm:$0xff] %v5451_v52 }
 0xeeb   :  { %2079 = vmatpush.msra.mxu3 %v2064_v61  ;;  %2110 = vmatmul.f32.gmra.mxu2 %v2064_v61  ;;  %v6168_v61 = vld [vmem:[#allocation50_spill] sm:$0xff] }
 0xeed   :  { %2080 = vmatpush.msra.mxu3 %v2063_v48  ;;  %v6160_v48 = vld [vmem:[#allocation19_spill] sm:$0xff] }
 0xeee   :  { %2612 = vmatmul.msk.f32.vlgmr.msra.gmra.mxu3 %vm136_vm0, %v5432_v42 }
 0xeef   :  { %2114 = vmatpush.msrb.mxu3 %v5084_v57 }
 0xef1   :  { %2115 = vmatpush.msrb.mxu3 %v5090_v15 }
 0xef3   :  { %2116 = vmatpush.msrb.mxu3 %v5096_v54 }
 0xef5   :  { %2117 = vmatpush.msrb.mxu3 %v5102_v29 }
 0xef6   :  { %2613 = vmatmul.msk.f32.gmra.mxu3 %vm136_vm0, %v4747_v34  ;;  %v5457_v34 = vld [vmem:[%s5691_s6 + $0xa0] sm:$0xff] }
 0xef7   :  { %2118 = vmatpush.msrb.mxu3 %v5110_v46  ;;  %6150 = vst [vmem:[#allocation42_spill] sm:$0xff] %v5457_v34 }
 0xef9   :  { %2119 = vmatpush.msrb.mxu3 %v5116_v5 }
 0xefb   :  { %2120 = vmatpush.msrb.mxu3 %v5122_v23 }
 0xefd   :  { %2121 = vmatpush.msrb.mxu3 %v5128_v27 }
 0xeff   :  { %2122 = vmatpush.msrb.mxu3 %v5134_v31 }
 0xf01   :  { %2123 = vmatpush.msrb.mxu3 %v5140_v35 }
 0xf03   :  { %2124 = vmatpush.msrb.mxu3 %v5451_v52  ;;  %v2615_v52 = vld [vmem:[%s5687_s2 + $0x68] sm:$0xff] }
 0xf05   :  { %2125 = vmatpush.msrb.mxu3 %v5457_v34 }
 0xf07   :  { %2126 = vmatpush.msrb.mxu3 %v5463_v37 }
 0xf09   :  { %2127 = vmatpush.msrb.mxu3 %v5469_v25 }
 0xf0b   :  { %2128 = vmatpush.msrb.mxu3 %v5475_v40 }
 0xf0d   :  { %2129 = vmatpush.msrb.mxu3 %v5481_v50 }
 0xf0f   :  { %2287 = vmatpush.msra.mxu3 %v4766_v24  ;;  %v6165_v24 = vld [vmem:[#allocation34_spill] sm:$0xff] }
 0xf11   :  { %2288 = vmatpush.msra.mxu3 %v6155_v13  ;;  %v6169_v13 = vld [vmem:[#allocation39_spill] sm:$0xff] }
 0xf13   :  { %2289 = vmatpush.msra.mxu3 %v6156_v28  ;;  %v1905_v28 = vpop.f32.mrf.mxu3 }
 0xf15   :  { %2290 = vmatpush.msra.mxu3 %v6157_v8 }
 0xf17   :  { %2291 = vmatpush.msra.mxu3 %v6158_v3 }
 0xf19   :  { %2292 = vmatpush.msra.mxu3 %v6159_v62 }
 0xf1b   :  { %2293 = vmatpush.msra.mxu3 %v6160_v48  ;;  %v1908_v8 = vpop.f32.mrf.mxu3  ;;  %v1928_v48 = vpop.f32.mrf.mxu2 }
 0xf1d   :  { %2294 = vmatpush.msra.mxu3 %v6161_v20  ;;  %v1929_v20 = vadd.f32 %v1928_v48, %v1905_v28 }
 0xf1f   :  { %2295 = vmatpush.msra.mxu3 %v6162_v56  ;;  %v2604_v56 = vld [vmem:[%s5685_s0 + $0x60] sm:$0xff] }
 0xf21   :  { %2296 = vmatpush.msra.mxu3 %v6163_v32  ;;  %v1934_v32 = vadd.f32 %v2604_v56, %v1929_v20 }
 0xf23   :  { %2297 = vmatpush.msra.mxu3 %v6164_v36  ;;  %v1931_v36 = vpop.f32.mrf.mxu2 }
 0xf25   :  { %2298 = vmatpush.msra.mxu3 %v6165_v24  ;;  %v2606_v24 = vmul.f32 -1.442695, %v1934_v32 }
 0xf27   :  { %2299 = vmatpush.msra.mxu3 %v6166_v33  ;;  %v1932_v33 = vadd.f32 %v1931_v36, %v1908_v8  ;;  %2762 = vpow2.f32 %v2606_v24  ;;  %v2614_v24 = vld [vmem:[%s5687_s2 + $0x60] sm:$0xff] }
 0xf29   :  { %2300 = vmatpush.msra.mxu3 %v6167_v4  ;;  %v2605_v4 = vld [vmem:[%s5685_s0 + $0x68] sm:$0xff] }
 0xf2b   :  { %2301 = vmatpush.msra.mxu3 %v6168_v61  ;;  %v1935_v61 = vadd.f32 %v2605_v4, %v1932_v33 }
 0xf2d   :  { %2302 = vmatpush.msra.mxu3 %v6169_v13  ;;  %v2607_v13 = vmul.f32 -1.442695, %v1935_v61 }
 0xf2f   :  { %2764 = vpow2.f32 %v2607_v13 }
 0xf66   :  { %v2108_v36 = vpop.f32.mrf.mxu2 }
 0xf71   :  { %v2082_v3 = vpop.f32.mrf.mxu3 }
 0xf72   :  { %2130 = vmatmul.f32.vlgmr.msrb.gmra.mxu3 %v2082_v3  ;;  %v2763_v3 = vpop.eup %2762 }
 0xf73   :  { %v2765_v28 = vpop.eup %2764 }
 0xf74   :  { %v1943_v48 = vadd.f32 1.0, %v2765_v28 }
 0xf76   :  { %v1970_v31 = vand.u32 2147483648, %v1943_v48  ;;  %vm1964_vm5 = vweird.f32 %v1943_v48 }
 0xf79   :  { %v2085_v62 = vpop.f32.mrf.mxu3 }
 0xf7a   :  { %2133 = vmatmul.f32.gmra.mxu3 %v2085_v62  ;;  %v1942_v62 = vadd.f32 1.0, %v2763_v3 }
 0xf7c   :  { %2766 = vrcp.f32 %v1942_v62  ;;  %v1955_v4 = vand.u32 2147483648, %v1942_v62  ;;  %vm1949_vm1 = vweird.f32 %v1942_v62  ;;  %v1953_v13 = vand.u32 2147483647, %v1942_v62 }
 0xf7d   :  { %2768 = vrcp.f32 %v1943_v48 }
 0xf7e   :  { %v1956_v34 = vor.u32 1.1754944e-38, %v1955_v4  ;;  %vm1954_vm3 = vcmp.eq.f32.partialorder %v1953_v13, 8.507059e+37  ;;  %v1971_v4 = vor.u32 1.1754944e-38, %v1970_v31  ;;  %v5533_v31 = vld [vmem:[%s5688_s3 + $0x8] sm:$0xff] }
 0xf82   :  { %v2767_v50 = vpop.eup %2766 }
 0xf83   :  { %v1945_v40 = vmul.f32 %v2767_v50, %v1942_v62  ;;  %v2769_v56 = vpop.eup %2768  ;;  %vm1950_vm15 = vweird.f32 %v2767_v50 }
 0xf84   :  { %v1960_v8 = vmul.f32 %v2769_v56, %v1943_v48  ;;  %vm1951_vm2 = vmor %vm1949_vm1, %vm1950_vm15  ;;  %vm1965_vm4 = vweird.f32 %v2769_v56 }
 0xf85   :  { %v1946_v20 = vsub.f32 1.0, %v1945_v40  ;;  %vm1966_vm6 = vmor %vm1964_vm5, %vm1965_vm4 }
 0xf86   :  { %v1961_v25 = vsub.f32 1.0, %v1960_v8  ;;  %v2111_v8 = vpop.f32.mrf.mxu2 }
 0xf87   :  { %v1947_v32 = vmul.f32 %v2767_v50, %v1946_v20 }
 0xf88   :  { %v1962_v28 = vmul.f32 %v2769_v56, %v1961_v25 }
 0xf89   :  { %v1948_v37 = vadd.f32 %v2767_v50, %v1947_v32 }
 0xf8a   :  { %v1963_v32 = vadd.f32 %v2769_v56, %v1962_v28 }
 0xf8b   :  { %v1952_v40 = vsel %vm1951_vm2, %v2767_v50, %v1948_v37 }
 0xf8c   :  { %v1957_v20 = vsel %vm1954_vm3, %v1956_v34, %v1952_v40  ;;  %v1967_v50 = vsel %vm1966_vm6, %v2769_v56, %v1963_v32 }
 0xf8d   :  { %v2143_v62 = vsub.f32 1.0, %v1957_v20  ;;  %v2141_v34 = vmul.f32 %v1957_v20, %v5278_v58 }
 0xff5   :  { %v2131_v33 = vpop.f32.mrf.mxu3 }
 0xff6   :  { %v2132_v61 = vadd.f32 %v2131_v33, %v2108_v36  ;;  %v1968_v33 = vand.u32 2147483647, %v1943_v48 }
 0xff8   :  { %v2137_v3 = vadd.f32 %v2614_v24, %v2132_v61  ;;  %vm1969_vm7 = vcmp.eq.f32.partialorder %v1968_v33, 8.507059e+37 }
 0xff9   :  { %v1972_v13 = vsel %vm1969_vm7, %v1971_v4, %v1967_v50  ;;  %v2618_v4 = vld [vmem:[%s5685_s0 + $0x70] sm:$0xff] }
 0xffa   :  { %2770 = vtanh.f32 %v2137_v3  ;;  %v2142_v28 = vmul.f32 %v1972_v13, %v5283_v60 }
 0xffd   :  { %v2134_v35 = vpop.f32.mrf.mxu3 }
 0xffe   :  { %v2135_v36 = vadd.f32 %v2134_v35, %v2111_v8  ;;  %v2144_v35 = vsub.f32 1.0, %v1972_v13 }
0x1000   :  { %v2771_v24 = vpop.eup %2770  ;;  %v2138_v37 = vadd.f32 %v2615_v52, %v2135_v36 }
0x1001   :  { %v2145_v25 = vmul.f32 %v2771_v24, %v2143_v62  ;;  %v6176_v24 = vld [vmem:[#allocation55_spill] sm:$0xff] }
0x1002   :  { %2772 = vtanh.f32 %v2138_v37  ;;  %v6177_v37 = vld [vmem:[#allocation56_spill] sm:$0xff] }
0x1003   :  { %v5513_v61 = vadd.f32 %v2145_v25, %v2141_v34 }
0x1005   :  { %2191 = vmatmul.f32.vlgmr.msrb.gmra.mxu1 %v5513_v61  ;;  %2280 = vmatmul.f32.vlgmr.msrb.gmra.mxu2 %v5513_v61 }
0x1008   :  { %v2773_v3 = vpop.eup %2772 }
0x1009   :  { %v2146_v48 = vmul.f32 %v2773_v3, %v2144_v35 }
0x100b   :  { %v5518_v52 = vadd.f32 %v2146_v48, %v2142_v28  ;;  %v2619_v28 = vld [vmem:[%s5685_s0 + $0x78] sm:$0xff] }
0x100d   :  { %2163 = vmatpush.msra.mxu0 %v5518_v52  ;;  %2194 = vmatmul.f32.gmra.mxu1 %v5518_v52 }
0x100e   :  { %2283 = vmatmul.f32.gmra.mxu2 %v5518_v52 }
0x100f   :  { %2164 = vmatpush.msra.mxu0 %v5513_v61 }
0x1010   :  { %2616 = vmatmul.msk.f32.vlgmr.msra.gmra.mxu0 %vm136_vm0, %v5432_v42 }
0x1011   :  { %2198 = vmatpush.msrb.mxu0 %v4864_v59  ;;  %v6170_v59 = vld [vmem:[#allocation40_spill] sm:$0xff] }
0x1013   :  { %2199 = vmatpush.msrb.mxu0 %v4870_v2 }
0x1015   :  { %2200 = vmatpush.msrb.mxu0 %v4876_v19 }
0x1017   :  { %2201 = vmatpush.msrb.mxu0 %v4882_v47 }
0x1018   :  { %2617 = vmatmul.msk.f32.gmra.mxu0 %vm136_vm0, %v5533_v31 }
0x1019   :  { %2202 = vmatpush.msrb.mxu0 %v4890_v12  ;;  %v2622_v12 = vld [vmem:[%s5686_s1 + $0x70] sm:$0xff] }
0x101b   :  { %2203 = vmatpush.msrb.mxu0 %v4896_v11 }
0x101d   :  { %2204 = vmatpush.msrb.mxu0 %v4902_v26 }
0x101f   :  { %2205 = vmatpush.msrb.mxu0 %v4908_v38 }
0x1021   :  { %2206 = vmatpush.msrb.mxu0 %v4914_v6 }
0x1023   :  { %2207 = vmatpush.msrb.mxu0 %v4920_v51 }
0x1025   :  { %2208 = vmatpush.msrb.mxu0 %v4926_v9  ;;  %v2623_v9 = vld [vmem:[%s5686_s1 + $0x78] sm:$0xff] }
0x1027   :  { %2209 = vmatpush.msrb.mxu0 %v4932_v45 }
0x1029   :  { %2210 = vmatpush.msrb.mxu0 %v4938_v18 }
0x102b   :  { %2211 = vmatpush.msrb.mxu0 %v4944_v43 }
0x102d   :  { %2212 = vmatpush.msrb.mxu0 %v4950_v30 }
0x102f   :  { %2213 = vmatpush.msrb.mxu0 %v4956_v49 }
0x1031   :  { %2378 = vmatpush.msra.mxu0 %v5312_v63 }
0x1033   :  { %2379 = vmatpush.msra.mxu0 %v5318_v0 }
0x1035   :  { %2380 = vmatpush.msra.mxu0 %v5324_v53 }
0x1037   :  { %2381 = vmatpush.msra.mxu0 %v5330_v41 }
0x1039   :  { %2382 = vmatpush.msra.mxu0 %v5336_v44 }
0x103b   :  { %2383 = vmatpush.msra.mxu0 %v5342_v7 }
0x103d   :  { %2384 = vmatpush.msra.mxu0 %v5348_v10 }
0x103f   :  { %2385 = vmatpush.msra.mxu0 %v5354_v22 }
0x1041   :  { %2386 = vmatpush.msra.mxu0 %v5360_v17 }
0x1043   :  { %2387 = vmatpush.msra.mxu0 %v5366_v14 }
0x1045   :  { %2388 = vmatpush.msra.mxu0 %v5372_v1 }
0x1047   :  { %2389 = vmatpush.msra.mxu0 %v5378_v55 }
0x1049   :  { %2390 = vmatpush.msra.mxu0 %v5384_v39 }
0x104b   :  { %2391 = vmatpush.msra.mxu0 %v5390_v16 }
0x104d   :  { %2392 = vmatpush.msra.mxu0 %v5396_v21 }
0x104f   :  { %2393 = vmatpush.msra.mxu0 %v6170_v59 }
0x1088   :  { %v2281_v47 = vpop.f32.mrf.mxu2 }
0x108d   :  { %v2166_v2 = vpop.f32.mrf.mxu0 }
0x108e   :  { %2214 = vmatmul.f32.vlgmr.msrb.gmra.mxu0 %v2166_v2  ;;  %2303 = vmatmul.f32.vlgmr.msra.gmra.mxu3 %v2166_v2 }
0x1091   :  { %v2284_v51 = vpop.f32.mrf.mxu2 }
0x1095   :  { %v2169_v19 = vpop.f32.mrf.mxu0 }
0x1096   :  { %2217 = vmatmul.f32.gmra.mxu0 %v2169_v19  ;;  %2306 = vmatmul.f32.gmra.mxu3 %v2169_v19 }
0x110b   :  { %v2215_v50 = vpop.f32.mrf.mxu0 }
0x1111   :  { %v2304_v11 = vpop.f32.mrf.mxu3 }
0x1112   :  { %v2305_v26 = vadd.f32 %v2304_v11, %v2281_v47 }
0x1113   :  { %v2218_v35 = vpop.f32.mrf.mxu0 }
0x1114   :  { %v2310_v38 = vadd.f32 %v2622_v12, %v2305_v26 }
0x1116   :  { %v2624_v6 = vmul.f32 -1.442695, %v2310_v38 }
0x1118   :  { %2774 = vpow2.f32 %v2624_v6 }
0x1119   :  { %v2307_v45 = vpop.f32.mrf.mxu3 }
0x111a   :  { %v2308_v18 = vadd.f32 %v2307_v45, %v2284_v51  ;;  %v2477_v51 = vld [vmem:[%s5693_s8 + $0x78] sm:$0xff] }
0x111b   :  { %2482 = vmatpush.msrb.mxu3 %v2477_v51 }
0x111c   :  { %v2311_v43 = vadd.f32 %v2623_v9, %v2308_v18  ;;  %v2476_v9 = vld [vmem:[%s5693_s8 + $0x70] sm:$0xff] }
0x111d   :  { %2483 = vmatpush.msrb.mxu3 %v2476_v9 }
0x111e   :  { %v2775_v30 = vpop.eup %2774  ;;  %v2625_v49 = vmul.f32 -1.442695, %v2311_v43  ;;  %v2475_v43 = vld [vmem:[%s5693_s8 + $0x68] sm:$0xff] }
0x111f   :  { %v2318_v58 = vadd.f32 1.0, %v2775_v30  ;;  %2484 = vmatpush.msrb.mxu3 %v2475_v43 }
0x1120   :  { %2776 = vpow2.f32 %v2625_v49  ;;  %v2474_v49 = vld [vmem:[%s5693_s8 + $0x60] sm:$0xff] }
0x1121   :  { %2778 = vrcp.f32 %v2318_v58  ;;  %v2331_v44 = vand.u32 2147483648, %v2318_v58  ;;  %v2329_v10 = vand.u32 2147483647, %v2318_v58  ;;  %vm2325_vm9 = vweird.f32 %v2318_v58  ;;  %2485 = vmatpush.msrb.mxu3 %v2474_v49 }
0x1123   :  { %v2332_v14 = vor.u32 1.1754944e-38, %v2331_v44  ;;  %vm2330_vm11 = vcmp.eq.f32.partialorder %v2329_v10, 8.507059e+37  ;;  %v2473_v44 = vld [vmem:[%s5693_s8 + $0x58] sm:$0xff] }
0x1124   :  { %2486 = vmatpush.msrb.mxu3 %v2473_v44 }
0x1126   :  { %v2777_v60 = vpop.eup %2776 }
0x1127   :  { %v2779_v63 = vpop.eup %2778  ;;  %v2319_v0 = vadd.f32 1.0, %v2777_v60  ;;  %v2628_v60 = vld [vmem:[%s5687_s2 + $0x70] sm:$0xff] }
0x1128   :  { %v2321_v53 = vmul.f32 %v2779_v63, %v2318_v58  ;;  %vm2326_vm8 = vweird.f32 %v2779_v63 }
0x1129   :  { %2780 = vrcp.f32 %v2319_v0  ;;  %vm2327_vm10 = vmor %vm2325_vm9, %vm2326_vm8  ;;  %v2346_v56 = vand.u32 2147483648, %v2319_v0  ;;  %v2344_v20 = vand.u32 2147483647, %v2319_v0  ;;  %vm2340_vm13 = vweird.f32 %v2319_v0 }
0x112a   :  { %v2322_v41 = vsub.f32 1.0, %v2321_v53  ;;  %vm2502_vm9 = vcmask 9216  }
0x112b   :  { %v2347_v32 = vor.u32 1.1754944e-38, %v2346_v56  ;;  %vm2345_vm15 = vcmp.eq.f32.partialorder %v2344_v20, 8.507059e+37  ;;  %v2629_v56 = vld [vmem:[%s5687_s2 + $0x78] sm:$0xff] }
0x112c   :  { %v2323_v7 = vmul.f32 %v2779_v63, %v2322_v41 }
0x112e   :  { %v2324_v22 = vadd.f32 %v2779_v63, %v2323_v7 }
0x112f   :  { %v2781_v17 = vpop.eup %2780 }
0x1130   :  { %v2336_v1 = vmul.f32 %v2781_v17, %v2319_v0  ;;  %v2328_v55 = vsel %vm2327_vm10, %v2779_v63, %v2324_v22  ;;  %vm2341_vm12 = vweird.f32 %v2781_v17  ;;  %v2472_v22 = vld [vmem:[%s5693_s8 + $0x50] sm:$0xff] }
0x1131   :  { %v2333_v39 = vsel %vm2330_vm11, %v2332_v14, %v2328_v55  ;;  %vm2342_vm14 = vmor %vm2340_vm13, %vm2341_vm12  ;;  %v2471_v55 = vld [vmem:[%s5693_s8 + $0x48] sm:$0xff]  ;;  %2487 = vmatpush.msrb.mxu3 %v2472_v22 }
0x1132   :  { %v2337_v16 = vsub.f32 1.0, %v2336_v1  ;;  %v2350_v21 = vmul.f32 %v2333_v39, %v5513_v61 }
0x1133   :  { %2488 = vmatpush.msrb.mxu3 %v2471_v55 }
0x1134   :  { %2394 = vmatmul.f32.vlgmr.msra.gmra.mxu0 %v2350_v21  ;;  %v2338_v40 = vmul.f32 %v2781_v17, %v2337_v16  ;;  %v2470_v16 = vld [vmem:[%s5693_s8 + $0x40] sm:$0xff] }
0x1135   :  { %2489 = vmatpush.msrb.mxu3 %v2470_v16 }
0x1136   :  { %v2339_v8 = vadd.f32 %v2781_v17, %v2338_v40 }
0x1138   :  { %v2343_v36 = vsel %vm2342_vm14, %v2781_v17, %v2339_v8 }
0x1139   :  { %v2348_v62 = vsel %vm2345_vm15, %v2347_v32, %v2343_v36  ;;  %v2469_v36 = vld [vmem:[%s5693_s8 + $0x38] sm:$0xff] }
0x113a   :  { %v2351_v33 = vmul.f32 %v2348_v62, %v5518_v52  ;;  %2490 = vmatpush.msrb.mxu3 %v2469_v36 }
0x113c   :  { %2366 = vmatpush.msra.mxu1 %v2351_v33  ;;  %2397 = vmatmul.f32.gmra.mxu0 %v2351_v33 }
0x113e   :  { %2367 = vmatpush.msra.mxu1 %v2350_v21 }
0x113f   :  { %2626 = vmatmul.msk.f32.vlgmr.msra.gmra.mxu1 %vm136_vm0, %v5432_v42  ;;  %v6171_v42 = vld [vmem:[#allocation54_spill] sm:$0xff] }
0x1140   :  { %2401 = vmatpush.msrb.mxu1 %v5084_v57  ;;  %v6172_v57 = vld [vmem:[#allocation13_spill] sm:$0xff] }
0x1142   :  { %2402 = vmatpush.msrb.mxu1 %v5090_v15  ;;  %v6173_v15 = vld [vmem:[#allocation41_spill] sm:$0xff] }
0x1144   :  { %2403 = vmatpush.msrb.mxu1 %v5096_v54  ;;  %v6174_v54 = vld [vmem:[#allocation42_spill] sm:$0xff] }
0x1146   :  { %2404 = vmatpush.msrb.mxu1 %v5102_v29  ;;  %v6175_v29 = vld [vmem:[#allocation43_spill] sm:$0xff] }
0x1147   :  { %2627 = vmatmul.msk.f32.gmra.mxu1 %vm136_vm0, %v5533_v31 }
0x1148   :  { %2405 = vmatpush.msrb.mxu1 %v5110_v46  ;;  %v6178_v46 = vld [vmem:[#allocation57_spill] sm:$0xff] }
0x114a   :  { %2406 = vmatpush.msrb.mxu1 %v5116_v5  ;;  %v2192_v5 = vpop.f32.mrf.mxu1 }
0x114b   :  { %v2216_v34 = vadd.f32 %v2215_v50, %v2192_v5 }
0x114c   :  { %2407 = vmatpush.msrb.mxu1 %v5122_v23 }
0x114d   :  { %v2221_v13 = vadd.f32 %v2618_v4, %v2216_v34  ;;  %v2464_v34 = vld [vmem:[%s5693_s8 + $0x10] sm:$0xff] }
0x114e   :  { %2408 = vmatpush.msrb.mxu1 %v5128_v27 }
0x114f   :  { %v2620_v3 = vmul.f32 -1.442695, %v2221_v13 }
0x1150   :  { %2409 = vmatpush.msrb.mxu1 %v6171_v42 }
0x1151   :  { %2782 = vpow2.f32 %v2620_v3 }
0x1152   :  { %2410 = vmatpush.msrb.mxu1 %v6172_v57  ;;  %v2195_v23 = vpop.f32.mrf.mxu1 }
0x1153   :  { %v2219_v48 = vadd.f32 %v2218_v35, %v2195_v23  ;;  %v2463_v35 = vld [vmem:[%s5693_s8 + $0x8] sm:$0xff] }
0x1154   :  { %2411 = vmatpush.msrb.mxu1 %v6173_v15  ;;  %v2468_v15 = vld [vmem:[%s5693_s8 + $0x30] sm:$0xff] }
0x1155   :  { %v2222_v31 = vadd.f32 %v2619_v28, %v2219_v48  ;;  %2491 = vmatpush.msrb.mxu3 %v2468_v15  ;;  %v2438_v48 = vld [vmem:[%s5692_s7] sm:$0x3]  ;;  %s2513_s7 = sshll.u32 %s5696_s11, 4  ;;  %s2514_s7 = int_to_ptr.hbm [resolvable:$true] %s2513_s7 }
0x1156   :  { %2412 = vmatpush.msrb.mxu1 %v6174_v54 }
0x1157   :  { %v2621_v59 = vmul.f32 -1.442695, %v2222_v31  ;;  %v2783_v2 = vpop.eup %2782  ;;  %v2633_v31 = vld [vmem:[%s5694_s9] ss:$0 sm:$0xff] }
0x1158   :  { %2413 = vmatpush.msrb.mxu1 %v6175_v29  ;;  %v2229_v19 = vadd.f32 1.0, %v2783_v2 }
0x1159   :  { %2784 = vpow2.f32 %v2621_v59 }
0x115a   :  { %2414 = vmatpush.msrb.mxu1 %v6176_v24  ;;  %2786 = vrcp.f32 %v2229_v19  ;;  %v2242_v41 = vand.u32 2147483648, %v2229_v19  ;;  %vm2236_vm2 = vweird.f32 %v2229_v19  ;;  %v2240_v7 = vand.u32 2147483647, %v2229_v19 }
0x115c   :  { %2415 = vmatpush.msrb.mxu1 %v6177_v37  ;;  %v2243_v1 = vor.u32 1.1754944e-38, %v2242_v41  ;;  %vm2241_vm4 = vcmp.eq.f32.partialorder %v2240_v7, 8.507059e+37 }
0x115e   :  { %2416 = vmatpush.msrb.mxu1 %v6178_v46  ;;  %v2467_v46 = vld [vmem:[%s5693_s8 + $0x28] sm:$0xff] }
0x115f   :  { %v2785_v47 = vpop.eup %2784  ;;  %2492 = vmatpush.msrb.mxu3 %v2467_v46 }
0x1160   :  { %v5599_v12 = vadd.f32 1.0, %v2785_v47  ;;  %v2787_v11 = vpop.eup %2786 }
0x1161   :  { %v2232_v26 = vmul.f32 %v2787_v11, %v2229_v19  ;;  %vm2237_vm1 = vweird.f32 %v2787_v11 }
0x1162   :  { %2788 = vrcp.f32 %v5599_v12  ;;  %vm2238_vm3 = vmor %vm2236_vm2, %vm2237_vm1  ;;  %v2257_v32 = vand.u32 2147483648, %v5599_v12  ;;  %vm2251_vm6 = vweird.f32 %v5599_v12  ;;  %v2255_v62 = vand.u32 2147483647, %v5599_v12 }
0x1163   :  { %v2233_v38 = vsub.f32 1.0, %v2232_v26 }
0x1164   :  { %v2258_v37 = vor.u32 1.1754944e-38, %v2257_v32  ;;  %vm2256_vm8 = vcmp.eq.f32.partialorder %v2255_v62, 8.507059e+37 }
0x1165   :  { %v2234_v18 = vmul.f32 %v2787_v11, %v2233_v38 }
0x1167   :  { %v2235_v0 = vadd.f32 %v2787_v11, %v2234_v18 }
0x1168   :  { %v5602_v6 = vpop.eup %2788 }
0x1169   :  { %v2247_v45 = vmul.f32 %v5602_v6, %v5599_v12  ;;  %v2239_v14 = vsel %vm2238_vm3, %v2787_v11, %v2235_v0  ;;  %vm2252_vm5 = vweird.f32 %v5602_v6 }
0x116a   :  { %v2244_v39 = vsel %vm2241_vm4, %v2243_v1, %v2239_v14  ;;  %vm2253_vm7 = vmor %vm2251_vm6, %vm2252_vm5 }
0x116b   :  { %v2248_v58 = vsub.f32 1.0, %v2247_v45  ;;  %v2430_v33 = vsub.f32 1.0, %v2244_v39  ;;  %v2428_v29 = vmul.f32 %v2244_v39, %v5513_v61  ;;  %v2465_v61 = vld [vmem:[%s5693_s8 + $0x18] sm:$0xff] }
0x116d   :  { %v2249_v17 = vmul.f32 %v5602_v6, %v2248_v58 }
0x116f   :  { %v2250_v20 = vadd.f32 %v5602_v6, %v2249_v17 }
0x1171   :  { %v2254_v54 = vsel %vm2253_vm7, %v5602_v6, %v2250_v20 }
0x1172   :  { %v2259_v23 = vsel %vm2256_vm8, %v2258_v37, %v2254_v54 }
0x1173   :  { %v2429_v4 = vmul.f32 %v2259_v23, %v5518_v52  ;;  %v2462_v52 = vld [vmem:[%s5693_s8] sm:$0xff] }
0x11b1   :  { %v2395_v30 = vpop.f32.mrf.mxu0 }
0x11b9   :  { %v2398_v21 = vpop.f32.mrf.mxu0 }
0x11bc   :  { %v2369_v25 = vpop.f32.mrf.mxu1 }
0x11bd   :  { %2417 = vmatmul.f32.vlgmr.msrb.gmra.mxu1 %v2369_v25  ;;  %v2466_v25 = vld [vmem:[%s5693_s8 + $0x20] sm:$0xff] }
0x11be   :  { %2493 = vmatpush.msrb.mxu3 %v2466_v25 }
0x11c0   :  { %2494 = vmatpush.msrb.mxu3 %v2465_v61 }
0x11c2   :  { %2495 = vmatpush.msrb.mxu3 %v2464_v34 }
0x11c4   :  { %v2372_v27 = vpop.f32.mrf.mxu1  ;;  %2496 = vmatpush.msrb.mxu3 %v2463_v35 }
0x11c5   :  { %2420 = vmatmul.f32.gmra.mxu1 %v2372_v27  ;;  %v2431_v27 = vsub.f32 1.0, %v2259_v23 }
0x11c6   :  { %2497 = vmatpush.msrb.mxu3 %v2462_v52 }
0x123a   :  { %v2418_v63 = vpop.f32.mrf.mxu1 }
0x123b   :  { %v2419_v53 = vadd.f32 %v2418_v63, %v2395_v30 }
0x123d   :  { %v2424_v10 = vadd.f32 %v2628_v60, %v2419_v53 }
0x123f   :  { %2790 = vtanh.f32 %v2424_v10 }
0x1242   :  { %v2421_v40 = vpop.f32.mrf.mxu1 }
0x1243   :  { %v2422_v8 = vadd.f32 %v2421_v40, %v2398_v21 }
0x1245   :  { %v2791_v42 = vpop.eup %2790  ;;  %v2425_v57 = vadd.f32 %v2629_v56, %v2422_v8 }
0x1246   :  { %v2432_v24 = vmul.f32 %v2791_v42, %v2430_v33 }
0x1247   :  { %2792 = vtanh.f32 %v2425_v57 }
0x1248   :  { %v2434_v5 = vadd.f32 %v2432_v24, %v2428_v29 }
0x124a   :  { %2436 = vst [vmem:[%s5695_s10] sm:$0xff] %v2434_v5 }
0x124d   :  { %v2793_v50 = vpop.eup %2792 }
0x124e   :  { %v2433_v13 = vmul.f32 %v2793_v50, %v2431_v27 }
0x1250   :  { %v2435_v3 = vadd.f32 %v2433_v13, %v2429_v4 }
0x1252   :  { %2437 = vst [vmem:[%s5695_s10 + $0x8] sm:$0xff] %v2435_v3  ;;  %2456 = vmatpush.msra.mxu2 %v2435_v3  ;;  %s3019_s10 = smov [#allocation2]  }
0x1253   :  { %s2511_s4 = sshll.u32 %s3019_s10, 4  ;;  %s2512_s4 = int_to_ptr.vmem [resolvable:$true] %s2511_s4 }
0x1254   :  { %2457 = vmatpush.msra.mxu2 %v2434_v5 }
0x1255   :  { %2630 = vmatmul.msk.f32.vlgmr.msra.gmra.mxu2 %vm136_vm0, %v2438_v48 }
0x12d8   :  { %v2459_v28 = vpop.f32.mrf.mxu2 }
0x12d9   :  { %2498 = vmatmul.f32.vlgmr.msrb.gmra.mxu3 %v2459_v28 }
0x135c   :  { %v2499_v59 = vpop.f32.mrf.mxu3 }
0x135d   :  { %v2500_v2 = vadd.f32 %v2633_v31, %v2499_v59 }
0x135f   :  { %2503 = vst.msk [vmem:[#allocation2] sm:$0x3] %vm2502_vm9, %v2500_v2 }
0x1360   :  { %2516 = dma.vmem_to_hbm [thread:$0]  %s2512_s4, 32, %s2514_s7, [#allocation3]  }
0x1361   :  { %3016 = dma.done.wait [#allocation3], 32  }
0x1362   :  { %3017 = vsyncadd [#allocation3], 4294967264 }
0x1363   :  { %2523 = vsyncpa [#allocation3], 1 }

</bundles_post_ra>
